<compile_context>
chip_gen: v7x
topology: tpu7x:2x2x1
jax: 0.10.0
libtpu: 0.0.40
codegen_flags: <defaults>
</compile_context>

<pallas_src>
import functools

import jax
import jax.numpy as jnp
import numpy as np
from jax import lax
from jax.experimental import pallas as pl
from jax.experimental.pallas import tpu as pltpu


def _round_up(x, m):
    return (x + m - 1) // m * m


# ------------------------------ Pallas kernel --------------------------------

def _bilstm_layer_kernel(gxf_ref, gxb_ref, whf_ref, whb_ref,
                         outf_ref, outb_ref,
                         hf_scr, cf_scr, hb_scr, cb_scr, *, Hp):
    """One bidirectional LSTM layer; one time-chunk per grid step.

    gxf_ref / gxb_ref: (Tc, Bp, 4*Hp) bf16 precomputed input gates (x @ W_ih + b),
        forward chunk i and backward chunk N-1-i respectively.
    whf_ref / whb_ref: (Hp, 4*Hp) bf16 recurrent weights (pre-transposed).
    outf_ref / outb_ref: (Tc, Bp, Hp) bf16 hidden-state outputs.
    h scratch (bf16) / c scratch (f32): recurrent state carried across grid steps.
    Gate order along the 4*Hp axis: i, f, g, o (PyTorch convention).
    """
    Tc = gxf_ref.shape[0]

    @pl.when(pl.program_id(0) == 0)
    def _init():
        hf_scr[...] = jnp.zeros_like(hf_scr)
        cf_scr[...] = jnp.zeros_like(cf_scr)
        hb_scr[...] = jnp.zeros_like(hb_scr)
        cb_scr[...] = jnp.zeros_like(cb_scr)

    def sigmoid(x):
        # One EUP op (tanh) instead of exp + reciprocal.
        return 0.5 * jnp.tanh(0.5 * x) + 0.5

    def cell(gates, c):
        i = sigmoid(gates[:, 0 * Hp:1 * Hp])
        f = sigmoid(gates[:, 1 * Hp:2 * Hp])
        g = jnp.tanh(gates[:, 2 * Hp:3 * Hp])
        o = sigmoid(gates[:, 3 * Hp:4 * Hp])
        c_new = f * c + i * g
        h_new = (o * jnp.tanh(c_new)).astype(jnp.bfloat16)
        return h_new, c_new

    def body(t, carry):
        hf, cf, hb, cb = carry          # h: bf16 vregs, c: f32 vregs (no scratch roundtrip)
        tb = Tc - 1 - t                 # backward direction walks its chunk in reverse
        # Two independent recurrences interleaved: only the small (Bp,Hp)x(Hp,4Hp)
        # recurrent matmul sits on the sequential critical path.  f32 accumulation on
        # top of the bf16 gate stream; W_hh is read from its ref here (not hoisted).
        gf = gxf_ref[t].astype(jnp.float32) + jnp.dot(
            hf, whf_ref[...], preferred_element_type=jnp.float32)
        gb = gxb_ref[tb].astype(jnp.float32) + jnp.dot(
            hb, whb_ref[...], preferred_element_type=jnp.float32)
        hf, cf = cell(gf, cf)
        hb, cb = cell(gb, cb)
        outf_ref[t] = hf
        outb_ref[tb] = hb
        return hf, cf, hb, cb

    carry0 = (hf_scr[...], cf_scr[...], hb_scr[...], cb_scr[...])
    hf, cf, hb, cb = lax.fori_loop(0, Tc, body, carry0, unroll=4)

    # Single scratch write per chunk to carry state to the next grid step.
    hf_scr[...] = hf
    cf_scr[...] = cf
    hb_scr[...] = hb
    cb_scr[...] = cb


def _bilstm_layer_pallas(gx_f, gx_b, whh_f_t, whh_b_t, time_chunk):
    """Run one fused-bidirectional LSTM layer. Returns (y_fwd, y_bwd), each (Tp,Bp,Hp) bf16."""
    Tp, Bp, G = gx_f.shape
    Hp = whh_f_t.shape[0]
    Tc = time_chunk
    assert Tp % Tc == 0
    N = Tp // Tc

    # Streamed VMEM footprint (double-buffered by the pipeline) + state scratch; used as
    # the scoped VMEM limit so larger-than-default chunks still compile (v5e default 16MiB).
    vmem_bytes = (2 * 2 * Tc * Bp * G * 2        # gate streams (bf16)
                  + 2 * 2 * Tc * Bp * Hp * 2     # outputs (bf16)
                  + 2 * 2 * Hp * G * 2           # W_hh (bf16)
                  + 2 * Bp * Hp * (2 + 4))       # h (bf16) / c (f32) scratch
    vmem_limit = min(max(int(vmem_bytes * 1.25) + (2 << 20), 16 << 20), 64 << 20)

    kernel = functools.partial(_bilstm_layer_kernel, Hp=Hp)
    out_shape = (jax.ShapeDtypeStruct((Tp, Bp, Hp), jnp.bfloat16),
                 jax.ShapeDtypeStruct((Tp, Bp, Hp), jnp.bfloat16))
    return pl.pallas_call(
        kernel,
        out_shape=out_shape,
        grid=(N,),
        in_specs=[
            pl.BlockSpec((Tc, Bp, G), lambda i: (i, 0, 0)),            # fwd gates, chunk i
            pl.BlockSpec((Tc, Bp, G), lambda i: (N - 1 - i, 0, 0)),    # bwd gates, reversed chunks
            pl.BlockSpec((Hp, G), lambda i: (0, 0)),                   # W_hh fwd
            pl.BlockSpec((Hp, G), lambda i: (0, 0)),                   # W_hh bwd
        ],
        out_specs=(
            pl.BlockSpec((Tc, Bp, Hp), lambda i: (i, 0, 0)),
            pl.BlockSpec((Tc, Bp, Hp), lambda i: (N - 1 - i, 0, 0)),
        ),
        scratch_shapes=[
            pltpu.VMEM((Bp, Hp), jnp.bfloat16),   # h fwd
            pltpu.VMEM((Bp, Hp), jnp.float32),    # c fwd
            pltpu.VMEM((Bp, Hp), jnp.bfloat16),   # h bwd
            pltpu.VMEM((Bp, Hp), jnp.float32),    # c bwd
        ],
        compiler_params=pltpu.CompilerParams(
            dimension_semantics=("arbitrary",),    # sequential carry over time chunks
            vmem_limit_bytes=vmem_limit),
    )(gx_f, gx_b, whh_f_t, whh_b_t)


# ------------------------- parameter preparation ------------------------------

def prepare_blstm_params(params, hidden_size):
    """Pad / transpose / cast PyTorch-layout LSTM weights once, outside jit.

    params: list over layers; each layer is [fwd, bwd] of
            (w_ih (4H, Din), w_hh (4H, H), b_ih (4H,), b_hh (4H,)).
    Returns (prepared, Hp) where each direction becomes
            (wih_t (Din or 2Hp, 4Hp) bf16, whh_t (Hp, 4Hp) bf16, bias (4Hp,) f32).
    """
    H = hidden_size
    Hp = _round_up(max(H, 128), 128)
    prepared = []
    for layer_idx, layer in enumerate(params):
        layer_prep = []
        for (w_ih, w_hh, b_ih, b_hh) in layer:
            din = w_ih.shape[1]
            # Pad each gate's H rows to Hp -> (4*Hp, din).
            wih = jnp.pad(jnp.asarray(w_ih, jnp.float32).reshape(4, H, din),
                          ((0, 0), (0, Hp - H), (0, 0))).reshape(4 * Hp, din)
            if layer_idx > 0:
                # Deeper layers consume [y_fwd (Hp) | y_bwd (Hp)]: split the 2H input
                # columns and pad each half to Hp (padded y columns are always zero),
                # then keep them concatenated so the input projection is ONE K=2Hp matmul.
                wf = jnp.pad(wih[:, :H], ((0, 0), (0, Hp - H)))
                wb = jnp.pad(wih[:, H:], ((0, 0), (0, Hp - H)))
                wih = jnp.concatenate([wf, wb], axis=1)          # (4Hp, 2Hp)
            wih_t = wih.T.astype(jnp.bfloat16)                    # (Din or 2Hp, 4Hp)
            whh = jnp.pad(jnp.asarray(w_hh, jnp.float32).reshape(4, H, H),
                          ((0, 0), (0, Hp - H), (0, Hp - H))).reshape(4 * Hp, Hp)
            whh_t = whh.T.astype(jnp.bfloat16)                    # (Hp, 4*Hp)
            bias = jnp.pad((jnp.asarray(b_ih, jnp.float32)
                            + jnp.asarray(b_hh, jnp.float32)).reshape(4, H),
                           ((0, 0), (0, Hp - H))).reshape(4 * Hp)
            layer_prep.append((wih_t, whh_t, bias))
        prepared.append(tuple(layer_prep))
    return tuple(prepared), Hp


# ------------------------------- forward pass ---------------------------------

def _choose_time_chunk(T, Bp, Hp, vmem_budget_bytes=32 << 20):
    """Pick the time chunk so the streamed (double-buffered) VMEM footprint fits budget."""
    per_step = 40 * Bp * Hp                     # bf16 gates (32*) + bf16 outputs (8*)
    fixed = 32 * Hp * Hp + 12 * Bp * Hp         # W_hh (double buffered) + state scratch
    avail = max(vmem_budget_bytes - fixed, per_step * 8)
    tc = max(8, min(int(avail // per_step), 512))
    return max(1, min(tc, T))


def _input_gates(x_tbd, wih_t, bias, valid):
    """gates_x = x @ wih_t + bias, zeroed at padded time steps, stored in bf16."""
    Tp, Bp, D = x_tbd.shape
    G = wih_t.shape[1]
    acc = jnp.dot(x_tbd.reshape(Tp * Bp, D).astype(jnp.bfloat16), wih_t,
                  preferred_element_type=jnp.float32).reshape(Tp, Bp, G)
    # NOTE: the mask must cover the bias as well -- zero gate pre-activations are a fixed
    # point of the LSTM cell from zero state, so the backward direction's padded head never
    # perturbs the real outputs.  Padded *batch* rows keep gates == bias (garbage h); those
    # rows are independent per-row and sliced away at the end, so they are left unmasked.
    return ((acc + bias[None, None, :]) * valid).astype(jnp.bfloat16)


@functools.partial(jax.jit, static_argnames=("hidden_size", "time_chunk"))
def blstm_forward(x_btd, prepared, *, hidden_size, time_chunk=None):
    """x_btd: (B, T, input_size) batch_first -> (B, T, 2*hidden_size) float32."""
    H = hidden_size
    B, T, _ = x_btd.shape
    # bf16 activations: pad B to a multiple of 16 (bf16 sublane tile) -> full, unmasked
    # per-timestep (Bp, Hp) stores.
    Bp = _round_up(max(B, 16), 16)
    Hp = prepared[0][0][1].shape[0]
    Tc = _choose_time_chunk(T, Bp, Hp) if time_chunk is None else max(1, min(time_chunk, T))
    Tp = _round_up(T, Tc)

    x = jnp.transpose(x_btd, (1, 0, 2)).astype(jnp.float32)          # time-major (T, B, Din)
    x = jnp.pad(x, ((0, Tp - T), (0, Bp - B), (0, 0)))
    valid = (jnp.arange(Tp) < T).astype(jnp.float32)[:, None, None]  # (Tp, 1, 1)

    layer_in = x
    yf = yb = None
    for (fwd, bwd) in prepared:
        gx_f = _input_gates(layer_in, fwd[0], fwd[2], valid)
        gx_b = _input_gates(layer_in, bwd[0], bwd[2], valid)
        yf, yb = _bilstm_layer_pallas(gx_f, gx_b, fwd[1], bwd[1], Tc)
        layer_in = jnp.concatenate([yf, yb], axis=-1)                # (Tp, Bp, 2Hp) bf16

    out = jnp.concatenate([yf[:T, :B, :H], yb[:T, :B, :H]], axis=-1)  # (T, B, 2H)
    return jnp.transpose(out, (1, 0, 2)).astype(jnp.float32)          # (B, T, 2H)


# ------------------------------ pure-JAX reference ----------------------------

def _lstm_ref_dir(x_tbd, w_ih, w_hh, b_ih, b_hh):
    T, B, _ = x_tbd.shape
    H = w_hh.shape[1]
    h = jnp.zeros((B, H), jnp.float32)
    c = jnp.zeros((B, H), jnp.float32)
    outs = []
    for t in range(T):
        gates = x_tbd[t] @ w_ih.T + b_ih + h @ w_hh.T + b_hh
        i = jax.nn.sigmoid(gates[:, :H])
        f = jax.nn.sigmoid(gates[:, H:2 * H])
        g = jnp.tanh(gates[:, 2 * H:3 * H])
        o = jax.nn.sigmoid(gates[:, 3 * H:])
        c = f * c + i * g
        h = o * jnp.tanh(c)
        outs.append(h)
    return jnp.stack(outs, 0)


def blstm_ref(x_btd, params):
    x_tbd = jnp.transpose(x_btd, (1, 0, 2)).astype(jnp.float32)
    for layer in params:
        yf = _lstm_ref_dir(x_tbd, *layer[0])
        yb = _lstm_ref_dir(x_tbd[::-1], *layer[1])[::-1]
        x_tbd = jnp.concatenate([yf, yb], -1)
    return jnp.transpose(x_tbd, (1, 0, 2))


# ------------------------------- parameter init --------------------------------

def init_blstm_params(key, input_size, hidden_size, num_layers=2):
    k = 1.0 / np.sqrt(hidden_size)
    params = []
    for layer in range(num_layers):
        din = input_size if layer == 0 else 2 * hidden_size
        layer_params = []
        for _direction in range(2):
            key, k1, k2, k3, k4 = jax.random.split(key, 5)
            w_ih = jax.random.uniform(k1, (4 * hidden_size, din), jnp.float32, -k, k)
            w_hh = jax.random.uniform(k2, (4 * hidden_size, hidden_size), jnp.float32, -k, k)
            b_ih = jax.random.uniform(k3, (4 * hidden_size,), jnp.float32, -k, k)
            b_hh = jax.random.uniform(k4, (4 * hidden_size,), jnp.float32, -k, k)
            layer_params.append((w_ih, w_hh, b_ih, b_hh))
        params.append(layer_params)
    return params


if __name__ == "__main__":
    B, T, input_size, hidden_size = 2, 10, 16, 32
    key = jax.random.PRNGKey(0)
    key, xkey = jax.random.split(key)
    x = jax.random.normal(xkey, (B, T, input_size), jnp.float32)
    params = init_blstm_params(key, input_size, hidden_size, num_layers=2)

    prepared, _Hp = prepare_blstm_params(params, hidden_size)
    ref = blstm_ref(x, params)

    # time_chunk=4 exercises multi-chunk streaming, the h/c carry across grid steps, and
    # the zero-padded time tail (T=10 -> Tp=12).
    out = blstm_forward(x, prepared, hidden_size=hidden_size, time_chunk=4)
    out = jax.block_until_ready(out)
    assert out.shape == (B, T, 2 * hidden_size), out.shape
    # bf16 weights / activations / gate stream -> relaxed tolerance vs f32 reference.
    np.testing.assert_allclose(np.asarray(out), np.asarray(ref), rtol=5e-2, atol=5e-2)

    # Also exercise the VMEM-budget-derived chunk (single chunk here).
    out2 = blstm_forward(x, prepared, hidden_size=hidden_size)
    out2 = jax.block_until_ready(out2)
    np.testing.assert_allclose(np.asarray(out2), np.asarray(ref), rtol=5e-2, atol=5e-2)

    print("KERNEL_OK")
</pallas_src>

<mosaic_0001>
module attributes {stable_mosaic.version = 11 : i64} {
  func.func @_bilstm_layer_kernel(%arg0: i32, %arg1: memref<4x16x512xbf16, #tpu.memory_space<vmem>>, %arg2: memref<4x16x512xbf16, #tpu.memory_space<vmem>>, %arg3: memref<128x512xbf16, #tpu.memory_space<vmem>>, %arg4: memref<128x512xbf16, #tpu.memory_space<vmem>>, %arg5: memref<4x16x128xbf16, #tpu.memory_space<vmem>>, %arg6: memref<4x16x128xbf16, #tpu.memory_space<vmem>>, %arg7: memref<16x128xbf16, #tpu.memory_space<vmem>>, %arg8: memref<16x128xf32, #tpu.memory_space<vmem>>, %arg9: memref<16x128xbf16, #tpu.memory_space<vmem>>, %arg10: memref<16x128xf32, #tpu.memory_space<vmem>>) attributes {dimension_semantics = [#tpu.dimension_semantics<arbitrary>], iteration_bounds = array<i64: 3>, scalar_prefetch = 0 : i64, scratch_operands = 4 : i64, tpu.core_type = #tpu.core_type<tc>, window_params = [{transform_indices = @transform_0, window_bounds = array<i64: 4, 16, 512>}, {transform_indices = @transform_1, window_bounds = array<i64: 4, 16, 512>}, {pipeline_mode = #tpu.pipeline_mode<synchronous>, transform_indices = @transform_2, window_bounds = array<i64: 128, 512>}, {pipeline_mode = #tpu.pipeline_mode<synchronous>, transform_indices = @transform_3, window_bounds = array<i64: 128, 512>}, {transform_indices = @transform_4, window_bounds = array<i64: 4, 16, 128>}, {transform_indices = @transform_5, window_bounds = array<i64: 4, 16, 128>}]} {
    %c0_i32 = arith.constant 0 : i32
    %0 = arith.cmpi eq, %arg0, %c0_i32 : i32
    %1 = arith.extui %0 : i1 to i32
    %c0_i32_0 = arith.constant 0 : i32
    %2 = arith.cmpi ne, %1, %c0_i32_0 : i32
    scf.if %2 {
      %cst_148 = arith.constant 0.000000e+00 : bf16
      %359 = vector.broadcast %cst_148 : bf16 to vector<16x128xbf16>
      %c0_149 = arith.constant 0 : index
      %c0_150 = arith.constant 0 : index
      %360 = vector.load %arg7[%c0_149, %c0_150] : memref<16x128xbf16, #tpu.memory_space<vmem>>, vector<16x128xbf16>
      tpu.vector_store %arg7[%c0_149, %c0_150], %359 {strides = array<i32>} : memref<16x128xbf16, #tpu.memory_space<vmem>>, vector<16x128xbf16>,
      %cst_151 = arith.constant 0.000000e+00 : f32
      %361 = vector.broadcast %cst_151 : f32 to vector<16x128xf32>
      %c0_152 = arith.constant 0 : index
      %c0_153 = arith.constant 0 : index
      %362 = vector.load %arg8[%c0_152, %c0_153] : memref<16x128xf32, #tpu.memory_space<vmem>>, vector<16x128xf32>
      tpu.vector_store %arg8[%c0_152, %c0_153], %361 {strides = array<i32>} : memref<16x128xf32, #tpu.memory_space<vmem>>, vector<16x128xf32>,
      %cst_154 = arith.constant 0.000000e+00 : bf16
      %363 = vector.broadcast %cst_154 : bf16 to vector<16x128xbf16>
      %c0_155 = arith.constant 0 : index
      %c0_156 = arith.constant 0 : index
      %364 = vector.load %arg9[%c0_155, %c0_156] : memref<16x128xbf16, #tpu.memory_space<vmem>>, vector<16x128xbf16>
      tpu.vector_store %arg9[%c0_155, %c0_156], %363 {strides = array<i32>} : memref<16x128xbf16, #tpu.memory_space<vmem>>, vector<16x128xbf16>,
      %cst_157 = arith.constant 0.000000e+00 : f32
      %365 = vector.broadcast %cst_157 : f32 to vector<16x128xf32>
      %c0_158 = arith.constant 0 : index
      %c0_159 = arith.constant 0 : index
      %366 = vector.load %arg10[%c0_158, %c0_159] : memref<16x128xf32, #tpu.memory_space<vmem>>, vector<16x128xf32>
      tpu.vector_store %arg10[%c0_158, %c0_159], %365 {strides = array<i32>} : memref<16x128xf32, #tpu.memory_space<vmem>>, vector<16x128xf32>,
    } else {
    }
    %c0 = arith.constant 0 : index
    %c0_1 = arith.constant 0 : index
    %3 = vector.load %arg7[%c0, %c0_1] : memref<16x128xbf16, #tpu.memory_space<vmem>>, vector<16x128xbf16>
    %c0_2 = arith.constant 0 : index
    %c0_3 = arith.constant 0 : index
    %4 = vector.load %arg8[%c0_2, %c0_3] : memref<16x128xf32, #tpu.memory_space<vmem>>, vector<16x128xf32>
    %c0_4 = arith.constant 0 : index
    %c0_5 = arith.constant 0 : index
    %5 = vector.load %arg9[%c0_4, %c0_5] : memref<16x128xbf16, #tpu.memory_space<vmem>>, vector<16x128xbf16>
    %c0_6 = arith.constant 0 : index
    %c0_7 = arith.constant 0 : index
    %6 = vector.load %arg10[%c0_6, %c0_7] : memref<16x128xf32, #tpu.memory_space<vmem>>, vector<16x128xf32>
    %c0_i32_8 = arith.constant 0 : i32
    %c3_i32 = arith.constant 3 : i32
    %7 = arith.subi %c3_i32, %c0_i32_8 : i32
    %8 = arith.index_cast %c0_i32_8 : i32 to index
    %c0_9 = arith.constant 0 : index
    %c0_10 = arith.constant 0 : index
    %9 = vector.load %arg1[%8, %c0_9, %c0_10] : memref<4x16x512xbf16, #tpu.memory_space<vmem>>, vector<1x16x512xbf16>
    %10 = vector.shape_cast %9 : vector<1x16x512xbf16> to vector<16x512xbf16>
    %11 = arith.extf %10 : vector<16x512xbf16> to vector<16x512xf32>
    %c0_11 = arith.constant 0 : index
    %c0_12 = arith.constant 0 : index
    %12 = vector.load %arg3[%c0_11, %c0_12] : memref<128x512xbf16, #tpu.memory_space<vmem>>, vector<128x512xbf16>
    %cst = arith.constant dense<0.000000e+00> : vector<16x512xf32>
    %13 = tpu.matmul %3, %12, %cst {dimension_numbers = #tpu.dot_dimension_numbers<[1], [0], [0], [1], [0, 0, 1, 1], [], []>} : vector<16x128xbf16>, vector<128x512xbf16>, vector<16x512xf32> -> vector<16x512xf32>
    %14 = arith.addf %11, %13 : vector<16x512xf32>
    %15 = arith.index_cast %7 : i32 to index
    %c0_13 = arith.constant 0 : index
    %c0_14 = arith.constant 0 : index
    %16 = vector.load %arg2[%15, %c0_13, %c0_14] : memref<4x16x512xbf16, #tpu.memory_space<vmem>>, vector<1x16x512xbf16>
    %17 = vector.shape_cast %16 : vector<1x16x512xbf16> to vector<16x512xbf16>
    %18 = arith.extf %17 : vector<16x512xbf16> to vector<16x512xf32>
    %c0_15 = arith.constant 0 : index
    %c0_16 = arith.constant 0 : index
    %19 = vector.load %arg4[%c0_15, %c0_16] : memref<128x512xbf16, #tpu.memory_space<vmem>>, vector<128x512xbf16>
    %cst_17 = arith.constant dense<0.000000e+00> : vector<16x512xf32>
    %20 = tpu.matmul %5, %19, %cst_17 {dimension_numbers = #tpu.dot_dimension_numbers<[1], [0], [0], [1], [0, 0, 1, 1], [], []>} : vector<16x128xbf16>, vector<128x512xbf16>, vector<16x512xf32> -> vector<16x512xf32>
    %21 = arith.addf %18, %20 : vector<16x512xf32>
    %22 = vector.extract_strided_slice %14 {offsets = [0, 0], sizes = [16, 128], strides = [1, 1]} : vector<16x512xf32> to vector<16x128xf32>
    %cst_18 = arith.constant 5.000000e-01 : f32
    %23 = vector.broadcast %cst_18 : f32 to vector<16x128xf32>
    %24 = arith.mulf %23, %22 : vector<16x128xf32>
    %25 = math.tanh %24 : vector<16x128xf32>
    %cst_19 = arith.constant 5.000000e-01 : f32
    %26 = vector.broadcast %cst_19 : f32 to vector<16x128xf32>
    %27 = arith.mulf %26, %25 : vector<16x128xf32>
    %cst_20 = arith.constant 5.000000e-01 : f32
    %28 = vector.broadcast %cst_20 : f32 to vector<16x128xf32>
    %29 = arith.addf %27, %28 : vector<16x128xf32>
    %30 = vector.extract_strided_slice %14 {offsets = [0, 128], sizes = [16, 128], strides = [1, 1]} : vector<16x512xf32> to vector<16x128xf32>
    %cst_21 = arith.constant 5.000000e-01 : f32
    %31 = vector.broadcast %cst_21 : f32 to vector<16x128xf32>
    %32 = arith.mulf %31, %30 : vector<16x128xf32>
    %33 = math.tanh %32 : vector<16x128xf32>
    %cst_22 = arith.constant 5.000000e-01 : f32
    %34 = vector.broadcast %cst_22 : f32 to vector<16x128xf32>
    %35 = arith.mulf %34, %33 : vector<16x128xf32>
    %cst_23 = arith.constant 5.000000e-01 : f32
    %36 = vector.broadcast %cst_23 : f32 to vector<16x128xf32>
    %37 = arith.addf %35, %36 : vector<16x128xf32>
    %38 = vector.extract_strided_slice %14 {offsets = [0, 256], sizes = [16, 128], strides = [1, 1]} : vector<16x512xf32> to vector<16x128xf32>
    %39 = math.tanh %38 : vector<16x128xf32>
    %40 = vector.extract_strided_slice %14 {offsets = [0, 384], sizes = [16, 128], strides = [1, 1]} : vector<16x512xf32> to vector<16x128xf32>
    %cst_24 = arith.constant 5.000000e-01 : f32
    %41 = vector.broadcast %cst_24 : f32 to vector<16x128xf32>
    %42 = arith.mulf %41, %40 : vector<16x128xf32>
    %43 = math.tanh %42 : vector<16x128xf32>
    %cst_25 = arith.constant 5.000000e-01 : f32
    %44 = vector.broadcast %cst_25 : f32 to vector<16x128xf32>
    %45 = arith.mulf %44, %43 : vector<16x128xf32>
    %cst_26 = arith.constant 5.000000e-01 : f32
    %46 = vector.broadcast %cst_26 : f32 to vector<16x128xf32>
    %47 = arith.addf %45, %46 : vector<16x128xf32>
    %48 = arith.mulf %37, %4 : vector<16x128xf32>
    %49 = arith.mulf %29, %39 : vector<16x128xf32>
    %50 = arith.addf %48, %49 : vector<16x128xf32>
    %51 = math.tanh %50 : vector<16x128xf32>
    %52 = arith.mulf %47, %51 : vector<16x128xf32>
    %53 = arith.truncf %52 : vector<16x128xf32> to vector<16x128xbf16>
    %54 = vector.extract_strided_slice %21 {offsets = [0, 0], sizes = [16, 128], strides = [1, 1]} : vector<16x512xf32> to vector<16x128xf32>
    %cst_27 = arith.constant 5.000000e-01 : f32
    %55 = vector.broadcast %cst_27 : f32 to vector<16x128xf32>
    %56 = arith.mulf %55, %54 : vector<16x128xf32>
    %57 = math.tanh %56 : vector<16x128xf32>
    %cst_28 = arith.constant 5.000000e-01 : f32
    %58 = vector.broadcast %cst_28 : f32 to vector<16x128xf32>
    %59 = arith.mulf %58, %57 : vector<16x128xf32>
    %cst_29 = arith.constant 5.000000e-01 : f32
    %60 = vector.broadcast %cst_29 : f32 to vector<16x128xf32>
    %61 = arith.addf %59, %60 : vector<16x128xf32>
    %62 = vector.extract_strided_slice %21 {offsets = [0, 128], sizes = [16, 128], strides = [1, 1]} : vector<16x512xf32> to vector<16x128xf32>
    %cst_30 = arith.constant 5.000000e-01 : f32
    %63 = vector.broadcast %cst_30 : f32 to vector<16x128xf32>
    %64 = arith.mulf %63, %62 : vector<16x128xf32>
    %65 = math.tanh %64 : vector<16x128xf32>
    %cst_31 = arith.constant 5.000000e-01 : f32
    %66 = vector.broadcast %cst_31 : f32 to vector<16x128xf32>
    %67 = arith.mulf %66, %65 : vector<16x128xf32>
    %cst_32 = arith.constant 5.000000e-01 : f32
    %68 = vector.broadcast %cst_32 : f32 to vector<16x128xf32>
    %69 = arith.addf %67, %68 : vector<16x128xf32>
    %70 = vector.extract_strided_slice %21 {offsets = [0, 256], sizes = [16, 128], strides = [1, 1]} : vector<16x512xf32> to vector<16x128xf32>
    %71 = math.tanh %70 : vector<16x128xf32>
    %72 = vector.extract_strided_slice %21 {offsets = [0, 384], sizes = [16, 128], strides = [1, 1]} : vector<16x512xf32> to vector<16x128xf32>
    %cst_33 = arith.constant 5.000000e-01 : f32
    %73 = vector.broadcast %cst_33 : f32 to vector<16x128xf32>
    %74 = arith.mulf %73, %72 : vector<16x128xf32>
    %75 = math.tanh %74 : vector<16x128xf32>
    %cst_34 = arith.constant 5.000000e-01 : f32
    %76 = vector.broadcast %cst_34 : f32 to vector<16x128xf32>
    %77 = arith.mulf %76, %75 : vector<16x128xf32>
    %cst_35 = arith.constant 5.000000e-01 : f32
    %78 = vector.broadcast %cst_35 : f32 to vector<16x128xf32>
    %79 = arith.addf %77, %78 : vector<16x128xf32>
    %80 = arith.mulf %69, %6 : vector<16x128xf32>
    %81 = arith.mulf %61, %71 : vector<16x128xf32>
    %82 = arith.addf %80, %81 : vector<16x128xf32>
    %83 = math.tanh %82 : vector<16x128xf32>
    %84 = arith.mulf %79, %83 : vector<16x128xf32>
    %85 = arith.truncf %84 : vector<16x128xf32> to vector<16x128xbf16>
    %86 = arith.index_cast %c0_i32_8 : i32 to index
    %c0_36 = arith.constant 0 : index
    %c0_37 = arith.constant 0 : index
    %87 = vector.load %arg5[%86, %c0_36, %c0_37] : memref<4x16x128xbf16, #tpu.memory_space<vmem>>, vector<1x16x128xbf16>
    %88 = vector.shape_cast %87 : vector<1x16x128xbf16> to vector<16x128xbf16>
    %89 = vector.shape_cast %53 : vector<16x128xbf16> to vector<1x16x128xbf16>
    tpu.vector_store %arg5[%86, %c0_36, %c0_37], %89 {strides = array<i32>} : memref<4x16x128xbf16, #tpu.memory_space<vmem>>, vector<1x16x128xbf16>,
    %90 = arith.index_cast %7 : i32 to index
    %c0_38 = arith.constant 0 : index
    %c0_39 = arith.constant 0 : index
    %91 = vector.load %arg6[%90, %c0_38, %c0_39] : memref<4x16x128xbf16, #tpu.memory_space<vmem>>, vector<1x16x128xbf16>
    %92 = vector.shape_cast %91 : vector<1x16x128xbf16> to vector<16x128xbf16>
    %93 = vector.shape_cast %85 : vector<16x128xbf16> to vector<1x16x128xbf16>
    tpu.vector_store %arg6[%90, %c0_38, %c0_39], %93 {strides = array<i32>} : memref<4x16x128xbf16, #tpu.memory_space<vmem>>, vector<1x16x128xbf16>,
    %c1_i32 = arith.constant 1 : i32
    %c3_i32_40 = arith.constant 3 : i32
    %94 = arith.subi %c3_i32_40, %c1_i32 : i32
    %95 = arith.index_cast %c1_i32 : i32 to index
    %c0_41 = arith.constant 0 : index
    %c0_42 = arith.constant 0 : index
    %96 = vector.load %arg1[%95, %c0_41, %c0_42] : memref<4x16x512xbf16, #tpu.memory_space<vmem>>, vector<1x16x512xbf16>
    %97 = vector.shape_cast %96 : vector<1x16x512xbf16> to vector<16x512xbf16>
    %98 = arith.extf %97 : vector<16x512xbf16> to vector<16x512xf32>
    %c0_43 = arith.constant 0 : index
    %c0_44 = arith.constant 0 : index
    %99 = vector.load %arg3[%c0_43, %c0_44] : memref<128x512xbf16, #tpu.memory_space<vmem>>, vector<128x512xbf16>
    %cst_45 = arith.constant dense<0.000000e+00> : vector<16x512xf32>
    %100 = tpu.matmul %53, %99, %cst_45 {dimension_numbers = #tpu.dot_dimension_numbers<[1], [0], [0], [1], [0, 0, 1, 1], [], []>} : vector<16x128xbf16>, vector<128x512xbf16>, vector<16x512xf32> -> vector<16x512xf32>
    %101 = arith.addf %98, %100 : vector<16x512xf32>
    %102 = arith.index_cast %94 : i32 to index
    %c0_46 = arith.constant 0 : index
    %c0_47 = arith.constant 0 : index
    %103 = vector.load %arg2[%102, %c0_46, %c0_47] : memref<4x16x512xbf16, #tpu.memory_space<vmem>>, vector<1x16x512xbf16>
    %104 = vector.shape_cast %103 : vector<1x16x512xbf16> to vector<16x512xbf16>
    %105 = arith.extf %104 : vector<16x512xbf16> to vector<16x512xf32>
    %c0_48 = arith.constant 0 : index
    %c0_49 = arith.constant 0 : index
    %106 = vector.load %arg4[%c0_48, %c0_49] : memref<128x512xbf16, #tpu.memory_space<vmem>>, vector<128x512xbf16>
    %cst_50 = arith.constant dense<0.000000e+00> : vector<16x512xf32>
    %107 = tpu.matmul %85, %106, %cst_50 {dimension_numbers = #tpu.dot_dimension_numbers<[1], [0], [0], [1], [0, 0, 1, 1], [], []>} : vector<16x128xbf16>, vector<128x512xbf16>, vector<16x512xf32> -> vector<16x512xf32>
    %108 = arith.addf %105, %107 : vector<16x512xf32>
    %109 = vector.extract_strided_slice %101 {offsets = [0, 0], sizes = [16, 128], strides = [1, 1]} : vector<16x512xf32> to vector<16x128xf32>
    %cst_51 = arith.constant 5.000000e-01 : f32
    %110 = vector.broadcast %cst_51 : f32 to vector<16x128xf32>
    %111 = arith.mulf %110, %109 : vector<16x128xf32>
    %112 = math.tanh %111 : vector<16x128xf32>
    %cst_52 = arith.constant 5.000000e-01 : f32
    %113 = vector.broadcast %cst_52 : f32 to vector<16x128xf32>
    %114 = arith.mulf %113, %112 : vector<16x128xf32>
    %cst_53 = arith.constant 5.000000e-01 : f32
    %115 = vector.broadcast %cst_53 : f32 to vector<16x128xf32>
    %116 = arith.addf %114, %115 : vector<16x128xf32>
    %117 = vector.extract_strided_slice %101 {offsets = [0, 128], sizes = [16, 128], strides = [1, 1]} : vector<16x512xf32> to vector<16x128xf32>
    %cst_54 = arith.constant 5.000000e-01 : f32
    %118 = vector.broadcast %cst_54 : f32 to vector<16x128xf32>
    %119 = arith.mulf %118, %117 : vector<16x128xf32>
    %120 = math.tanh %119 : vector<16x128xf32>
    %cst_55 = arith.constant 5.000000e-01 : f32
    %121 = vector.broadcast %cst_55 : f32 to vector<16x128xf32>
    %122 = arith.mulf %121, %120 : vector<16x128xf32>
    %cst_56 = arith.constant 5.000000e-01 : f32
    %123 = vector.broadcast %cst_56 : f32 to vector<16x128xf32>
    %124 = arith.addf %122, %123 : vector<16x128xf32>
    %125 = vector.extract_strided_slice %101 {offsets = [0, 256], sizes = [16, 128], strides = [1, 1]} : vector<16x512xf32> to vector<16x128xf32>
    %126 = math.tanh %125 : vector<16x128xf32>
    %127 = vector.extract_strided_slice %101 {offsets = [0, 384], sizes = [16, 128], strides = [1, 1]} : vector<16x512xf32> to vector<16x128xf32>
    %cst_57 = arith.constant 5.000000e-01 : f32
    %128 = vector.broadcast %cst_57 : f32 to vector<16x128xf32>
    %129 = arith.mulf %128, %127 : vector<16x128xf32>
    %130 = math.tanh %129 : vector<16x128xf32>
    %cst_58 = arith.constant 5.000000e-01 : f32
    %131 = vector.broadcast %cst_58 : f32 to vector<16x128xf32>
    %132 = arith.mulf %131, %130 : vector<16x128xf32>
    %cst_59 = arith.constant 5.000000e-01 : f32
    %133 = vector.broadcast %cst_59 : f32 to vector<16x128xf32>
    %134 = arith.addf %132, %133 : vector<16x128xf32>
    %135 = arith.mulf %124, %50 : vector<16x128xf32>
    %136 = arith.mulf %116, %126 : vector<16x128xf32>
    %137 = arith.addf %135, %136 : vector<16x128xf32>
    %138 = math.tanh %137 : vector<16x128xf32>
    %139 = arith.mulf %134, %138 : vector<16x128xf32>
    %140 = arith.truncf %139 : vector<16x128xf32> to vector<16x128xbf16>
    %141 = vector.extract_strided_slice %108 {offsets = [0, 0], sizes = [16, 128], strides = [1, 1]} : vector<16x512xf32> to vector<16x128xf32>
    %cst_60 = arith.constant 5.000000e-01 : f32
    %142 = vector.broadcast %cst_60 : f32 to vector<16x128xf32>
    %143 = arith.mulf %142, %141 : vector<16x128xf32>
    %144 = math.tanh %143 : vector<16x128xf32>
    %cst_61 = arith.constant 5.000000e-01 : f32
    %145 = vector.broadcast %cst_61 : f32 to vector<16x128xf32>
    %146 = arith.mulf %145, %144 : vector<16x128xf32>
    %cst_62 = arith.constant 5.000000e-01 : f32
    %147 = vector.broadcast %cst_62 : f32 to vector<16x128xf32>
    %148 = arith.addf %146, %147 : vector<16x128xf32>
    %149 = vector.extract_strided_slice %108 {offsets = [0, 128], sizes = [16, 128], strides = [1, 1]} : vector<16x512xf32> to vector<16x128xf32>
    %cst_63 = arith.constant 5.000000e-01 : f32
    %150 = vector.broadcast %cst_63 : f32 to vector<16x128xf32>
    %151 = arith.mulf %150, %149 : vector<16x128xf32>
    %152 = math.tanh %151 : vector<16x128xf32>
    %cst_64 = arith.constant 5.000000e-01 : f32
    %153 = vector.broadcast %cst_64 : f32 to vector<16x128xf32>
    %154 = arith.mulf %153, %152 : vector<16x128xf32>
    %cst_65 = arith.constant 5.000000e-01 : f32
    %155 = vector.broadcast %cst_65 : f32 to vector<16x128xf32>
    %156 = arith.addf %154, %155 : vector<16x128xf32>
    %157 = vector.extract_strided_slice %108 {offsets = [0, 256], sizes = [16, 128], strides = [1, 1]} : vector<16x512xf32> to vector<16x128xf32>
    %158 = math.tanh %157 : vector<16x128xf32>
    %159 = vector.extract_strided_slice %108 {offsets = [0, 384], sizes = [16, 128], strides = [1, 1]} : vector<16x512xf32> to vector<16x128xf32>
    %cst_66 = arith.constant 5.000000e-01 : f32
    %160 = vector.broadcast %cst_66 : f32 to vector<16x128xf32>
    %161 = arith.mulf %160, %159 : vector<16x128xf32>
    %162 = math.tanh %161 : vector<16x128xf32>
    %cst_67 = arith.constant 5.000000e-01 : f32
    %163 = vector.broadcast %cst_67 : f32 to vector<16x128xf32>
    %164 = arith.mulf %163, %162 : vector<16x128xf32>
    %cst_68 = arith.constant 5.000000e-01 : f32
    %165 = vector.broadcast %cst_68 : f32 to vector<16x128xf32>
    %166 = arith.addf %164, %165 : vector<16x128xf32>
    %167 = arith.mulf %156, %82 : vector<16x128xf32>
    %168 = arith.mulf %148, %158 : vector<16x128xf32>
    %169 = arith.addf %167, %168 : vector<16x128xf32>
    %170 = math.tanh %169 : vector<16x128xf32>
    %171 = arith.mulf %166, %170 : vector<16x128xf32>
    %172 = arith.truncf %171 : vector<16x128xf32> to vector<16x128xbf16>
    %173 = arith.index_cast %c1_i32 : i32 to index
    %c0_69 = arith.constant 0 : index
    %c0_70 = arith.constant 0 : index
    %174 = vector.load %arg5[%173, %c0_69, %c0_70] : memref<4x16x128xbf16, #tpu.memory_space<vmem>>, vector<1x16x128xbf16>
    %175 = vector.shape_cast %174 : vector<1x16x128xbf16> to vector<16x128xbf16>
    %176 = vector.shape_cast %140 : vector<16x128xbf16> to vector<1x16x128xbf16>
    tpu.vector_store %arg5[%173, %c0_69, %c0_70], %176 {strides = array<i32>} : memref<4x16x128xbf16, #tpu.memory_space<vmem>>, vector<1x16x128xbf16>,
    %177 = arith.index_cast %94 : i32 to index
    %c0_71 = arith.constant 0 : index
    %c0_72 = arith.constant 0 : index
    %178 = vector.load %arg6[%177, %c0_71, %c0_72] : memref<4x16x128xbf16, #tpu.memory_space<vmem>>, vector<1x16x128xbf16>
    %179 = vector.shape_cast %178 : vector<1x16x128xbf16> to vector<16x128xbf16>
    %180 = vector.shape_cast %172 : vector<16x128xbf16> to vector<1x16x128xbf16>
    tpu.vector_store %arg6[%177, %c0_71, %c0_72], %180 {strides = array<i32>} : memref<4x16x128xbf16, #tpu.memory_space<vmem>>, vector<1x16x128xbf16>,
    %c2_i32 = arith.constant 2 : i32
    %c3_i32_73 = arith.constant 3 : i32
    %181 = arith.subi %c3_i32_73, %c2_i32 : i32
    %182 = arith.index_cast %c2_i32 : i32 to index
    %c0_74 = arith.constant 0 : index
    %c0_75 = arith.constant 0 : index
    %183 = vector.load %arg1[%182, %c0_74, %c0_75] : memref<4x16x512xbf16, #tpu.memory_space<vmem>>, vector<1x16x512xbf16>
    %184 = vector.shape_cast %183 : vector<1x16x512xbf16> to vector<16x512xbf16>
    %185 = arith.extf %184 : vector<16x512xbf16> to vector<16x512xf32>
    %c0_76 = arith.constant 0 : index
    %c0_77 = arith.constant 0 : index
    %186 = vector.load %arg3[%c0_76, %c0_77] : memref<128x512xbf16, #tpu.memory_space<vmem>>, vector<128x512xbf16>
    %cst_78 = arith.constant dense<0.000000e+00> : vector<16x512xf32>
    %187 = tpu.matmul %140, %186, %cst_78 {dimension_numbers = #tpu.dot_dimension_numbers<[1], [0], [0], [1], [0, 0, 1, 1], [], []>} : vector<16x128xbf16>, vector<128x512xbf16>, vector<16x512xf32> -> vector<16x512xf32>
    %188 = arith.addf %185, %187 : vector<16x512xf32>
    %189 = arith.index_cast %181 : i32 to index
    %c0_79 = arith.constant 0 : index
    %c0_80 = arith.constant 0 : index
    %190 = vector.load %arg2[%189, %c0_79, %c0_80] : memref<4x16x512xbf16, #tpu.memory_space<vmem>>, vector<1x16x512xbf16>
    %191 = vector.shape_cast %190 : vector<1x16x512xbf16> to vector<16x512xbf16>
    %192 = arith.extf %191 : vector<16x512xbf16> to vector<16x512xf32>
    %c0_81 = arith.constant 0 : index
    %c0_82 = arith.constant 0 : index
    %193 = vector.load %arg4[%c0_81, %c0_82] : memref<128x512xbf16, #tpu.memory_space<vmem>>, vector<128x512xbf16>
    %cst_83 = arith.constant dense<0.000000e+00> : vector<16x512xf32>
    %194 = tpu.matmul %172, %193, %cst_83 {dimension_numbers = #tpu.dot_dimension_numbers<[1], [0], [0], [1], [0, 0, 1, 1], [], []>} : vector<16x128xbf16>, vector<128x512xbf16>, vector<16x512xf32> -> vector<16x512xf32>
    %195 = arith.addf %192, %194 : vector<16x512xf32>
    %196 = vector.extract_strided_slice %188 {offsets = [0, 0], sizes = [16, 128], strides = [1, 1]} : vector<16x512xf32> to vector<16x128xf32>
    %cst_84 = arith.constant 5.000000e-01 : f32
    %197 = vector.broadcast %cst_84 : f32 to vector<16x128xf32>
    %198 = arith.mulf %197, %196 : vector<16x128xf32>
    %199 = math.tanh %198 : vector<16x128xf32>
    %cst_85 = arith.constant 5.000000e-01 : f32
    %200 = vector.broadcast %cst_85 : f32 to vector<16x128xf32>
    %201 = arith.mulf %200, %199 : vector<16x128xf32>
    %cst_86 = arith.constant 5.000000e-01 : f32
    %202 = vector.broadcast %cst_86 : f32 to vector<16x128xf32>
    %203 = arith.addf %201, %202 : vector<16x128xf32>
    %204 = vector.extract_strided_slice %188 {offsets = [0, 128], sizes = [16, 128], strides = [1, 1]} : vector<16x512xf32> to vector<16x128xf32>
    %cst_87 = arith.constant 5.000000e-01 : f32
    %205 = vector.broadcast %cst_87 : f32 to vector<16x128xf32>
    %206 = arith.mulf %205, %204 : vector<16x128xf32>
    %207 = math.tanh %206 : vector<16x128xf32>
    %cst_88 = arith.constant 5.000000e-01 : f32
    %208 = vector.broadcast %cst_88 : f32 to vector<16x128xf32>
    %209 = arith.mulf %208, %207 : vector<16x128xf32>
    %cst_89 = arith.constant 5.000000e-01 : f32
    %210 = vector.broadcast %cst_89 : f32 to vector<16x128xf32>
    %211 = arith.addf %209, %210 : vector<16x128xf32>
    %212 = vector.extract_strided_slice %188 {offsets = [0, 256], sizes = [16, 128], strides = [1, 1]} : vector<16x512xf32> to vector<16x128xf32>
    %213 = math.tanh %212 : vector<16x128xf32>
    %214 = vector.extract_strided_slice %188 {offsets = [0, 384], sizes = [16, 128], strides = [1, 1]} : vector<16x512xf32> to vector<16x128xf32>
    %cst_90 = arith.constant 5.000000e-01 : f32
    %215 = vector.broadcast %cst_90 : f32 to vector<16x128xf32>
    %216 = arith.mulf %215, %214 : vector<16x128xf32>
    %217 = math.tanh %216 : vector<16x128xf32>
    %cst_91 = arith.constant 5.000000e-01 : f32
    %218 = vector.broadcast %cst_91 : f32 to vector<16x128xf32>
    %219 = arith.mulf %218, %217 : vector<16x128xf32>
    %cst_92 = arith.constant 5.000000e-01 : f32
    %220 = vector.broadcast %cst_92 : f32 to vector<16x128xf32>
    %221 = arith.addf %219, %220 : vector<16x128xf32>
    %222 = arith.mulf %211, %137 : vector<16x128xf32>
    %223 = arith.mulf %203, %213 : vector<16x128xf32>
    %224 = arith.addf %222, %223 : vector<16x128xf32>
    %225 = math.tanh %224 : vector<16x128xf32>
    %226 = arith.mulf %221, %225 : vector<16x128xf32>
    %227 = arith.truncf %226 : vector<16x128xf32> to vector<16x128xbf16>
    %228 = vector.extract_strided_slice %195 {offsets = [0, 0], sizes = [16, 128], strides = [1, 1]} : vector<16x512xf32> to vector<16x128xf32>
    %cst_93 = arith.constant 5.000000e-01 : f32
    %229 = vector.broadcast %cst_93 : f32 to vector<16x128xf32>
    %230 = arith.mulf %229, %228 : vector<16x128xf32>
    %231 = math.tanh %230 : vector<16x128xf32>
    %cst_94 = arith.constant 5.000000e-01 : f32
    %232 = vector.broadcast %cst_94 : f32 to vector<16x128xf32>
    %233 = arith.mulf %232, %231 : vector<16x128xf32>
    %cst_95 = arith.constant 5.000000e-01 : f32
    %234 = vector.broadcast %cst_95 : f32 to vector<16x128xf32>
    %235 = arith.addf %233, %234 : vector<16x128xf32>
    %236 = vector.extract_strided_slice %195 {offsets = [0, 128], sizes = [16, 128], strides = [1, 1]} : vector<16x512xf32> to vector<16x128xf32>
    %cst_96 = arith.constant 5.000000e-01 : f32
    %237 = vector.broadcast %cst_96 : f32 to vector<16x128xf32>
    %238 = arith.mulf %237, %236 : vector<16x128xf32>
    %239 = math.tanh %238 : vector<16x128xf32>
    %cst_97 = arith.constant 5.000000e-01 : f32
    %240 = vector.broadcast %cst_97 : f32 to vector<16x128xf32>
    %241 = arith.mulf %240, %239 : vector<16x128xf32>
    %cst_98 = arith.constant 5.000000e-01 : f32
    %242 = vector.broadcast %cst_98 : f32 to vector<16x128xf32>
    %243 = arith.addf %241, %242 : vector<16x128xf32>
    %244 = vector.extract_strided_slice %195 {offsets = [0, 256], sizes = [16, 128], strides = [1, 1]} : vector<16x512xf32> to vector<16x128xf32>
    %245 = math.tanh %244 : vector<16x128xf32>
    %246 = vector.extract_strided_slice %195 {offsets = [0, 384], sizes = [16, 128], strides = [1, 1]} : vector<16x512xf32> to vector<16x128xf32>
    %cst_99 = arith.constant 5.000000e-01 : f32
    %247 = vector.broadcast %cst_99 : f32 to vector<16x128xf32>
    %248 = arith.mulf %247, %246 : vector<16x128xf32>
    %249 = math.tanh %248 : vector<16x128xf32>
    %cst_100 = arith.constant 5.000000e-01 : f32
    %250 = vector.broadcast %cst_100 : f32 to vector<16x128xf32>
    %251 = arith.mulf %250, %249 : vector<16x128xf32>
    %cst_101 = arith.constant 5.000000e-01 : f32
    %252 = vector.broadcast %cst_101 : f32 to vector<16x128xf32>
    %253 = arith.addf %251, %252 : vector<16x128xf32>
    %254 = arith.mulf %243, %169 : vector<16x128xf32>
    %255 = arith.mulf %235, %245 : vector<16x128xf32>
    %256 = arith.addf %254, %255 : vector<16x128xf32>
    %257 = math.tanh %256 : vector<16x128xf32>
    %258 = arith.mulf %253, %257 : vector<16x128xf32>
    %259 = arith.truncf %258 : vector<16x128xf32> to vector<16x128xbf16>
    %260 = arith.index_cast %c2_i32 : i32 to index
    %c0_102 = arith.constant 0 : index
    %c0_103 = arith.constant 0 : index
    %261 = vector.load %arg5[%260, %c0_102, %c0_103] : memref<4x16x128xbf16, #tpu.memory_space<vmem>>, vector<1x16x128xbf16>
    %262 = vector.shape_cast %261 : vector<1x16x128xbf16> to vector<16x128xbf16>
    %263 = vector.shape_cast %227 : vector<16x128xbf16> to vector<1x16x128xbf16>
    tpu.vector_store %arg5[%260, %c0_102, %c0_103], %263 {strides = array<i32>} : memref<4x16x128xbf16, #tpu.memory_space<vmem>>, vector<1x16x128xbf16>,
    %264 = arith.index_cast %181 : i32 to index
    %c0_104 = arith.constant 0 : index
    %c0_105 = arith.constant 0 : index
    %265 = vector.load %arg6[%264, %c0_104, %c0_105] : memref<4x16x128xbf16, #tpu.memory_space<vmem>>, vector<1x16x128xbf16>
    %266 = vector.shape_cast %265 : vector<1x16x128xbf16> to vector<16x128xbf16>
    %267 = vector.shape_cast %259 : vector<16x128xbf16> to vector<1x16x128xbf16>
    tpu.vector_store %arg6[%264, %c0_104, %c0_105], %267 {strides = array<i32>} : memref<4x16x128xbf16, #tpu.memory_space<vmem>>, vector<1x16x128xbf16>,
    %c3_i32_106 = arith.constant 3 : i32
    %c3_i32_107 = arith.constant 3 : i32
    %268 = arith.subi %c3_i32_107, %c3_i32_106 : i32
    %269 = arith.index_cast %c3_i32_106 : i32 to index
    %c0_108 = arith.constant 0 : index
    %c0_109 = arith.constant 0 : index
    %270 = vector.load %arg1[%269, %c0_108, %c0_109] : memref<4x16x512xbf16, #tpu.memory_space<vmem>>, vector<1x16x512xbf16>
    %271 = vector.shape_cast %270 : vector<1x16x512xbf16> to vector<16x512xbf16>
    %272 = arith.extf %271 : vector<16x512xbf16> to vector<16x512xf32>
    %c0_110 = arith.constant 0 : index
    %c0_111 = arith.constant 0 : index
    %273 = vector.load %arg3[%c0_110, %c0_111] : memref<128x512xbf16, #tpu.memory_space<vmem>>, vector<128x512xbf16>
    %cst_112 = arith.constant dense<0.000000e+00> : vector<16x512xf32>
    %274 = tpu.matmul %227, %273, %cst_112 {dimension_numbers = #tpu.dot_dimension_numbers<[1], [0], [0], [1], [0, 0, 1, 1], [], []>} : vector<16x128xbf16>, vector<128x512xbf16>, vector<16x512xf32> -> vector<16x512xf32>
    %275 = arith.addf %272, %274 : vector<16x512xf32>
    %276 = arith.index_cast %268 : i32 to index
    %c0_113 = arith.constant 0 : index
    %c0_114 = arith.constant 0 : index
    %277 = vector.load %arg2[%276, %c0_113, %c0_114] : memref<4x16x512xbf16, #tpu.memory_space<vmem>>, vector<1x16x512xbf16>
    %278 = vector.shape_cast %277 : vector<1x16x512xbf16> to vector<16x512xbf16>
    %279 = arith.extf %278 : vector<16x512xbf16> to vector<16x512xf32>
    %c0_115 = arith.constant 0 : index
    %c0_116 = arith.constant 0 : index
    %280 = vector.load %arg4[%c0_115, %c0_116] : memref<128x512xbf16, #tpu.memory_space<vmem>>, vector<128x512xbf16>
    %cst_117 = arith.constant dense<0.000000e+00> : vector<16x512xf32>
    %281 = tpu.matmul %259, %280, %cst_117 {dimension_numbers = #tpu.dot_dimension_numbers<[1], [0], [0], [1], [0, 0, 1, 1], [], []>} : vector<16x128xbf16>, vector<128x512xbf16>, vector<16x512xf32> -> vector<16x512xf32>
    %282 = arith.addf %279, %281 : vector<16x512xf32>
    %283 = vector.extract_strided_slice %275 {offsets = [0, 0], sizes = [16, 128], strides = [1, 1]} : vector<16x512xf32> to vector<16x128xf32>
    %cst_118 = arith.constant 5.000000e-01 : f32
    %284 = vector.broadcast %cst_118 : f32 to vector<16x128xf32>
    %285 = arith.mulf %284, %283 : vector<16x128xf32>
    %286 = math.tanh %285 : vector<16x128xf32>
    %cst_119 = arith.constant 5.000000e-01 : f32
    %287 = vector.broadcast %cst_119 : f32 to vector<16x128xf32>
    %288 = arith.mulf %287, %286 : vector<16x128xf32>
    %cst_120 = arith.constant 5.000000e-01 : f32
    %289 = vector.broadcast %cst_120 : f32 to vector<16x128xf32>
    %290 = arith.addf %288, %289 : vector<16x128xf32>
    %291 = vector.extract_strided_slice %275 {offsets = [0, 128], sizes = [16, 128], strides = [1, 1]} : vector<16x512xf32> to vector<16x128xf32>
    %cst_121 = arith.constant 5.000000e-01 : f32
    %292 = vector.broadcast %cst_121 : f32 to vector<16x128xf32>
    %293 = arith.mulf %292, %291 : vector<16x128xf32>
    %294 = math.tanh %293 : vector<16x128xf32>
    %cst_122 = arith.constant 5.000000e-01 : f32
    %295 = vector.broadcast %cst_122 : f32 to vector<16x128xf32>
    %296 = arith.mulf %295, %294 : vector<16x128xf32>
    %cst_123 = arith.constant 5.000000e-01 : f32
    %297 = vector.broadcast %cst_123 : f32 to vector<16x128xf32>
    %298 = arith.addf %296, %297 : vector<16x128xf32>
    %299 = vector.extract_strided_slice %275 {offsets = [0, 256], sizes = [16, 128], strides = [1, 1]} : vector<16x512xf32> to vector<16x128xf32>
    %300 = math.tanh %299 : vector<16x128xf32>
    %301 = vector.extract_strided_slice %275 {offsets = [0, 384], sizes = [16, 128], strides = [1, 1]} : vector<16x512xf32> to vector<16x128xf32>
    %cst_124 = arith.constant 5.000000e-01 : f32
    %302 = vector.broadcast %cst_124 : f32 to vector<16x128xf32>
    %303 = arith.mulf %302, %301 : vector<16x128xf32>
    %304 = math.tanh %303 : vector<16x128xf32>
    %cst_125 = arith.constant 5.000000e-01 : f32
    %305 = vector.broadcast %cst_125 : f32 to vector<16x128xf32>
    %306 = arith.mulf %305, %304 : vector<16x128xf32>
    %cst_126 = arith.constant 5.000000e-01 : f32
    %307 = vector.broadcast %cst_126 : f32 to vector<16x128xf32>
    %308 = arith.addf %306, %307 : vector<16x128xf32>
    %309 = arith.mulf %298, %224 : vector<16x128xf32>
    %310 = arith.mulf %290, %300 : vector<16x128xf32>
    %311 = arith.addf %309, %310 : vector<16x128xf32>
    %312 = math.tanh %311 : vector<16x128xf32>
    %313 = arith.mulf %308, %312 : vector<16x128xf32>
    %314 = arith.truncf %313 : vector<16x128xf32> to vector<16x128xbf16>
    %315 = vector.extract_strided_slice %282 {offsets = [0, 0], sizes = [16, 128], strides = [1, 1]} : vector<16x512xf32> to vector<16x128xf32>
    %cst_127 = arith.constant 5.000000e-01 : f32
    %316 = vector.broadcast %cst_127 : f32 to vector<16x128xf32>
    %317 = arith.mulf %316, %315 : vector<16x128xf32>
    %318 = math.tanh %317 : vector<16x128xf32>
    %cst_128 = arith.constant 5.000000e-01 : f32
    %319 = vector.broadcast %cst_128 : f32 to vector<16x128xf32>
    %320 = arith.mulf %319, %318 : vector<16x128xf32>
    %cst_129 = arith.constant 5.000000e-01 : f32
    %321 = vector.broadcast %cst_129 : f32 to vector<16x128xf32>
    %322 = arith.addf %320, %321 : vector<16x128xf32>
    %323 = vector.extract_strided_slice %282 {offsets = [0, 128], sizes = [16, 128], strides = [1, 1]} : vector<16x512xf32> to vector<16x128xf32>
    %cst_130 = arith.constant 5.000000e-01 : f32
    %324 = vector.broadcast %cst_130 : f32 to vector<16x128xf32>
    %325 = arith.mulf %324, %323 : vector<16x128xf32>
    %326 = math.tanh %325 : vector<16x128xf32>
    %cst_131 = arith.constant 5.000000e-01 : f32
    %327 = vector.broadcast %cst_131 : f32 to vector<16x128xf32>
    %328 = arith.mulf %327, %326 : vector<16x128xf32>
    %cst_132 = arith.constant 5.000000e-01 : f32
    %329 = vector.broadcast %cst_132 : f32 to vector<16x128xf32>
    %330 = arith.addf %328, %329 : vector<16x128xf32>
    %331 = vector.extract_strided_slice %282 {offsets = [0, 256], sizes = [16, 128], strides = [1, 1]} : vector<16x512xf32> to vector<16x128xf32>
    %332 = math.tanh %331 : vector<16x128xf32>
    %333 = vector.extract_strided_slice %282 {offsets = [0, 384], sizes = [16, 128], strides = [1, 1]} : vector<16x512xf32> to vector<16x128xf32>
    %cst_133 = arith.constant 5.000000e-01 : f32
    %334 = vector.broadcast %cst_133 : f32 to vector<16x128xf32>
    %335 = arith.mulf %334, %333 : vector<16x128xf32>
    %336 = math.tanh %335 : vector<16x128xf32>
    %cst_134 = arith.constant 5.000000e-01 : f32
    %337 = vector.broadcast %cst_134 : f32 to vector<16x128xf32>
    %338 = arith.mulf %337, %336 : vector<16x128xf32>
    %cst_135 = arith.constant 5.000000e-01 : f32
    %339 = vector.broadcast %cst_135 : f32 to vector<16x128xf32>
    %340 = arith.addf %338, %339 : vector<16x128xf32>
    %341 = arith.mulf %330, %256 : vector<16x128xf32>
    %342 = arith.mulf %322, %332 : vector<16x128xf32>
    %343 = arith.addf %341, %342 : vector<16x128xf32>
    %344 = math.tanh %343 : vector<16x128xf32>
    %345 = arith.mulf %340, %344 : vector<16x128xf32>
    %346 = arith.truncf %345 : vector<16x128xf32> to vector<16x128xbf16>
    %347 = arith.index_cast %c3_i32_106 : i32 to index
    %c0_136 = arith.constant 0 : index
    %c0_137 = arith.constant 0 : index
    %348 = vector.load %arg5[%347, %c0_136, %c0_137] : memref<4x16x128xbf16, #tpu.memory_space<vmem>>, vector<1x16x128xbf16>
    %349 = vector.shape_cast %348 : vector<1x16x128xbf16> to vector<16x128xbf16>
    %350 = vector.shape_cast %314 : vector<16x128xbf16> to vector<1x16x128xbf16>
    tpu.vector_store %arg5[%347, %c0_136, %c0_137], %350 {strides = array<i32>} : memref<4x16x128xbf16, #tpu.memory_space<vmem>>, vector<1x16x128xbf16>,
    %351 = arith.index_cast %268 : i32 to index
    %c0_138 = arith.constant 0 : index
    %c0_139 = arith.constant 0 : index
    %352 = vector.load %arg6[%351, %c0_138, %c0_139] : memref<4x16x128xbf16, #tpu.memory_space<vmem>>, vector<1x16x128xbf16>
    %353 = vector.shape_cast %352 : vector<1x16x128xbf16> to vector<16x128xbf16>
    %354 = vector.shape_cast %346 : vector<16x128xbf16> to vector<1x16x128xbf16>
    tpu.vector_store %arg6[%351, %c0_138, %c0_139], %354 {strides = array<i32>} : memref<4x16x128xbf16, #tpu.memory_space<vmem>>, vector<1x16x128xbf16>,
    %c4_i32 = arith.constant 4 : i32
    %c0_140 = arith.constant 0 : index
    %c0_141 = arith.constant 0 : index
    %355 = vector.load %arg7[%c0_140, %c0_141] : memref<16x128xbf16, #tpu.memory_space<vmem>>, vector<16x128xbf16>
    tpu.vector_store %arg7[%c0_140, %c0_141], %314 {strides = array<i32>} : memref<16x128xbf16, #tpu.memory_space<vmem>>, vector<16x128xbf16>,
    %c0_142 = arith.constant 0 : index
    %c0_143 = arith.constant 0 : index
    %356 = vector.load %arg8[%c0_142, %c0_143] : memref<16x128xf32, #tpu.memory_space<vmem>>, vector<16x128xf32>
    tpu.vector_store %arg8[%c0_142, %c0_143], %311 {strides = array<i32>} : memref<16x128xf32, #tpu.memory_space<vmem>>, vector<16x128xf32>,
    %c0_144 = arith.constant 0 : index
    %c0_145 = arith.constant 0 : index
    %357 = vector.load %arg9[%c0_144, %c0_145] : memref<16x128xbf16, #tpu.memory_space<vmem>>, vector<16x128xbf16>
    tpu.vector_store %arg9[%c0_144, %c0_145], %346 {strides = array<i32>} : memref<16x128xbf16, #tpu.memory_space<vmem>>, vector<16x128xbf16>,
    %c0_146 = arith.constant 0 : index
    %c0_147 = arith.constant 0 : index
    %358 = vector.load %arg10[%c0_146, %c0_147] : memref<16x128xf32, #tpu.memory_space<vmem>>, vector<16x128xf32>
    tpu.vector_store %arg10[%c0_146, %c0_147], %343 {strides = array<i32>} : memref<16x128xf32, #tpu.memory_space<vmem>>, vector<16x128xf32>,
    return
  }
  func.func @transform_0(%arg0: i32) -> (i32, i32, i32) {
    %c0_i32 = arith.constant 0 : i32
    %c0_i32_0 = arith.constant 0 : i32
    %c0_i32_1 = arith.constant 0 : i32
    return %arg0, %c0_i32, %c0_i32_0 : i32, i32, i32
  }
  func.func @transform_1(%arg0: i32) -> (i32, i32, i32) {
    %c2_i32 = arith.constant 2 : i32
    %0 = arith.subi %c2_i32, %arg0 : i32
    %c0_i32 = arith.constant 0 : i32
    %c0_i32_0 = arith.constant 0 : i32
    %c0_i32_1 = arith.constant 0 : i32
    return %0, %c0_i32, %c0_i32_0 : i32, i32, i32
  }
  func.func @transform_2(%arg0: i32) -> (i32, i32) {
    %c0_i32 = arith.constant 0 : i32
    %c0_i32_0 = arith.constant 0 : i32
    %c0_i32_1 = arith.constant 0 : i32
    return %c0_i32, %c0_i32_0 : i32, i32
  }
  func.func @transform_3(%arg0: i32) -> (i32, i32) {
    %c0_i32 = arith.constant 0 : i32
    %c0_i32_0 = arith.constant 0 : i32
    %c0_i32_1 = arith.constant 0 : i32
    return %c0_i32, %c0_i32_0 : i32, i32
  }
  func.func @transform_4(%arg0: i32) -> (i32, i32, i32) {
    %c0_i32 = arith.constant 0 : i32
    %c0_i32_0 = arith.constant 0 : i32
    %c0_i32_1 = arith.constant 0 : i32
    return %arg0, %c0_i32, %c0_i32_0 : i32, i32, i32
  }
  func.func @transform_5(%arg0: i32) -> (i32, i32, i32) {
    %c2_i32 = arith.constant 2 : i32
    %0 = arith.subi %c2_i32, %arg0 : i32
    %c0_i32 = arith.constant 0 : i32
    %c0_i32_0 = arith.constant 0 : i32
    %c0_i32_1 = arith.constant 0 : i32
    return %0, %c0_i32, %c0_i32_0 : i32, i32, i32
  }
}

module attributes {stable_mosaic.version = 11 : i64} {
  func.func @_bilstm_layer_kernel(%arg0: i32, %arg1: memref<4x16x512xbf16, #tpu.memory_space<vmem>>, %arg2: memref<4x16x512xbf16, #tpu.memory_space<vmem>>, %arg3: memref<128x512xbf16, #tpu.memory_space<vmem>>, %arg4: memref<128x512xbf16, #tpu.memory_space<vmem>>, %arg5: memref<4x16x128xbf16, #tpu.memory_space<vmem>>, %arg6: memref<4x16x128xbf16, #tpu.memory_space<vmem>>, %arg7: memref<16x128xbf16, #tpu.memory_space<vmem>>, %arg8: memref<16x128xf32, #tpu.memory_space<vmem>>, %arg9: memref<16x128xbf16, #tpu.memory_space<vmem>>, %arg10: memref<16x128xf32, #tpu.memory_space<vmem>>) attributes {dimension_semantics = [#tpu.dimension_semantics<arbitrary>], iteration_bounds = array<i64: 3>, scalar_prefetch = 0 : i64, scratch_operands = 4 : i64, tpu.core_type = #tpu.core_type<tc>, window_params = [{transform_indices = @transform_0, window_bounds = array<i64: 4, 16, 512>}, {transform_indices = @transform_1, window_bounds = array<i64: 4, 16, 512>}, {pipeline_mode = #tpu.pipeline_mode<synchronous>, transform_indices = @transform_2, window_bounds = array<i64: 128, 512>}, {pipeline_mode = #tpu.pipeline_mode<synchronous>, transform_indices = @transform_3, window_bounds = array<i64: 128, 512>}, {transform_indices = @transform_4, window_bounds = array<i64: 4, 16, 128>}, {transform_indices = @transform_5, window_bounds = array<i64: 4, 16, 128>}]} {
    %c0_i32 = arith.constant 0 : i32
    %0 = arith.cmpi eq, %arg0, %c0_i32 : i32
    %1 = arith.extui %0 : i1 to i32
    %c0_i32_0 = arith.constant 0 : i32
    %2 = arith.cmpi ne, %1, %c0_i32_0 : i32
    scf.if %2 {
      %cst_148 = arith.constant 0.000000e+00 : bf16
      %359 = vector.broadcast %cst_148 : bf16 to vector<16x128xbf16>
      %c0_149 = arith.constant 0 : index
      %c0_150 = arith.constant 0 : index
      %360 = vector.load %arg7[%c0_149, %c0_150] : memref<16x128xbf16, #tpu.memory_space<vmem>>, vector<16x128xbf16>
      tpu.vector_store %arg7[%c0_149, %c0_150], %359 {strides = array<i32>} : memref<16x128xbf16, #tpu.memory_space<vmem>>, vector<16x128xbf16>,
      %cst_151 = arith.constant 0.000000e+00 : f32
      %361 = vector.broadcast %cst_151 : f32 to vector<16x128xf32>
      %c0_152 = arith.constant 0 : index
      %c0_153 = arith.constant 0 : index
      %362 = vector.load %arg8[%c0_152, %c0_153] : memref<16x128xf32, #tpu.memory_space<vmem>>, vector<16x128xf32>
      tpu.vector_store %arg8[%c0_152, %c0_153], %361 {strides = array<i32>} : memref<16x128xf32, #tpu.memory_space<vmem>>, vector<16x128xf32>,
      %cst_154 = arith.constant 0.000000e+00 : bf16
      %363 = vector.broadcast %cst_154 : bf16 to vector<16x128xbf16>
      %c0_155 = arith.constant 0 : index
      %c0_156 = arith.constant 0 : index
      %364 = vector.load %arg9[%c0_155, %c0_156] : memref<16x128xbf16, #tpu.memory_space<vmem>>, vector<16x128xbf16>
      tpu.vector_store %arg9[%c0_155, %c0_156], %363 {strides = array<i32>} : memref<16x128xbf16, #tpu.memory_space<vmem>>, vector<16x128xbf16>,
      %cst_157 = arith.constant 0.000000e+00 : f32
      %365 = vector.broadcast %cst_157 : f32 to vector<16x128xf32>
      %c0_158 = arith.constant 0 : index
      %c0_159 = arith.constant 0 : index
      %366 = vector.load %arg10[%c0_158, %c0_159] : memref<16x128xf32, #tpu.memory_space<vmem>>, vector<16x128xf32>
      tpu.vector_store %arg10[%c0_158, %c0_159], %365 {strides = array<i32>} : memref<16x128xf32, #tpu.memory_space<vmem>>, vector<16x128xf32>,
    } else {
    }
    %c0 = arith.constant 0 : index
    %c0_1 = arith.constant 0 : index
    %3 = vector.load %arg7[%c0, %c0_1] : memref<16x128xbf16, #tpu.memory_space<vmem>>, vector<16x128xbf16>
    %c0_2 = arith.constant 0 : index
    %c0_3 = arith.constant 0 : index
    %4 = vector.load %arg8[%c0_2, %c0_3] : memref<16x128xf32, #tpu.memory_space<vmem>>, vector<16x128xf32>
    %c0_4 = arith.constant 0 : index
    %c0_5 = arith.constant 0 : index
    %5 = vector.load %arg9[%c0_4, %c0_5] : memref<16x128xbf16, #tpu.memory_space<vmem>>, vector<16x128xbf16>
    %c0_6 = arith.constant 0 : index
    %c0_7 = arith.constant 0 : index
    %6 = vector.load %arg10[%c0_6, %c0_7] : memref<16x128xf32, #tpu.memory_space<vmem>>, vector<16x128xf32>
    %c0_i32_8 = arith.constant 0 : i32
    %c3_i32 = arith.constant 3 : i32
    %7 = arith.subi %c3_i32, %c0_i32_8 : i32
    %8 = arith.index_cast %c0_i32_8 : i32 to index
    %c0_9 = arith.constant 0 : index
    %c0_10 = arith.constant 0 : index
    %9 = vector.load %arg1[%8, %c0_9, %c0_10] : memref<4x16x512xbf16, #tpu.memory_space<vmem>>, vector<1x16x512xbf16>
    %10 = vector.shape_cast %9 : vector<1x16x512xbf16> to vector<16x512xbf16>
    %11 = arith.extf %10 : vector<16x512xbf16> to vector<16x512xf32>
    %c0_11 = arith.constant 0 : index
    %c0_12 = arith.constant 0 : index
    %12 = vector.load %arg3[%c0_11, %c0_12] : memref<128x512xbf16, #tpu.memory_space<vmem>>, vector<128x512xbf16>
    %cst = arith.constant dense<0.000000e+00> : vector<16x512xf32>
    %13 = tpu.matmul %3, %12, %cst {dimension_numbers = #tpu.dot_dimension_numbers<[1], [0], [0], [1], [0, 0, 1, 1], [], []>} : vector<16x128xbf16>, vector<128x512xbf16>, vector<16x512xf32> -> vector<16x512xf32>
    %14 = arith.addf %11, %13 : vector<16x512xf32>
    %15 = arith.index_cast %7 : i32 to index
    %c0_13 = arith.constant 0 : index
    %c0_14 = arith.constant 0 : index
    %16 = vector.load %arg2[%15, %c0_13, %c0_14] : memref<4x16x512xbf16, #tpu.memory_space<vmem>>, vector<1x16x512xbf16>
    %17 = vector.shape_cast %16 : vector<1x16x512xbf16> to vector<16x512xbf16>
    %18 = arith.extf %17 : vector<16x512xbf16> to vector<16x512xf32>
    %c0_15 = arith.constant 0 : index
    %c0_16 = arith.constant 0 : index
    %19 = vector.load %arg4[%c0_15, %c0_16] : memref<128x512xbf16, #tpu.memory_space<vmem>>, vector<128x512xbf16>
    %cst_17 = arith.constant dense<0.000000e+00> : vector<16x512xf32>
    %20 = tpu.matmul %5, %19, %cst_17 {dimension_numbers = #tpu.dot_dimension_numbers<[1], [0], [0], [1], [0, 0, 1, 1], [], []>} : vector<16x128xbf16>, vector<128x512xbf16>, vector<16x512xf32> -> vector<16x512xf32>
    %21 = arith.addf %18, %20 : vector<16x512xf32>
    %22 = vector.extract_strided_slice %14 {offsets = [0, 0], sizes = [16, 128], strides = [1, 1]} : vector<16x512xf32> to vector<16x128xf32>
    %cst_18 = arith.constant 5.000000e-01 : f32
    %23 = vector.broadcast %cst_18 : f32 to vector<16x128xf32>
    %24 = arith.mulf %23, %22 : vector<16x128xf32>
    %25 = math.tanh %24 : vector<16x128xf32>
    %cst_19 = arith.constant 5.000000e-01 : f32
    %26 = vector.broadcast %cst_19 : f32 to vector<16x128xf32>
    %27 = arith.mulf %26, %25 : vector<16x128xf32>
    %cst_20 = arith.constant 5.000000e-01 : f32
    %28 = vector.broadcast %cst_20 : f32 to vector<16x128xf32>
    %29 = arith.addf %27, %28 : vector<16x128xf32>
    %30 = vector.extract_strided_slice %14 {offsets = [0, 128], sizes = [16, 128], strides = [1, 1]} : vector<16x512xf32> to vector<16x128xf32>
    %cst_21 = arith.constant 5.000000e-01 : f32
    %31 = vector.broadcast %cst_21 : f32 to vector<16x128xf32>
    %32 = arith.mulf %31, %30 : vector<16x128xf32>
    %33 = math.tanh %32 : vector<16x128xf32>
    %cst_22 = arith.constant 5.000000e-01 : f32
    %34 = vector.broadcast %cst_22 : f32 to vector<16x128xf32>
    %35 = arith.mulf %34, %33 : vector<16x128xf32>
    %cst_23 = arith.constant 5.000000e-01 : f32
    %36 = vector.broadcast %cst_23 : f32 to vector<16x128xf32>
    %37 = arith.addf %35, %36 : vector<16x128xf32>
    %38 = vector.extract_strided_slice %14 {offsets = [0, 256], sizes = [16, 128], strides = [1, 1]} : vector<16x512xf32> to vector<16x128xf32>
    %39 = math.tanh %38 : vector<16x128xf32>
    %40 = vector.extract_strided_slice %14 {offsets = [0, 384], sizes = [16, 128], strides = [1, 1]} : vector<16x512xf32> to vector<16x128xf32>
    %cst_24 = arith.constant 5.000000e-01 : f32
    %41 = vector.broadcast %cst_24 : f32 to vector<16x128xf32>
    %42 = arith.mulf %41, %40 : vector<16x128xf32>
    %43 = math.tanh %42 : vector<16x128xf32>
    %cst_25 = arith.constant 5.000000e-01 : f32
    %44 = vector.broadcast %cst_25 : f32 to vector<16x128xf32>
    %45 = arith.mulf %44, %43 : vector<16x128xf32>
    %cst_26 = arith.constant 5.000000e-01 : f32
    %46 = vector.broadcast %cst_26 : f32 to vector<16x128xf32>
    %47 = arith.addf %45, %46 : vector<16x128xf32>
    %48 = arith.mulf %37, %4 : vector<16x128xf32>
    %49 = arith.mulf %29, %39 : vector<16x128xf32>
    %50 = arith.addf %48, %49 : vector<16x128xf32>
    %51 = math.tanh %50 : vector<16x128xf32>
    %52 = arith.mulf %47, %51 : vector<16x128xf32>
    %53 = arith.truncf %52 : vector<16x128xf32> to vector<16x128xbf16>
    %54 = vector.extract_strided_slice %21 {offsets = [0, 0], sizes = [16, 128], strides = [1, 1]} : vector<16x512xf32> to vector<16x128xf32>
    %cst_27 = arith.constant 5.000000e-01 : f32
    %55 = vector.broadcast %cst_27 : f32 to vector<16x128xf32>
    %56 = arith.mulf %55, %54 : vector<16x128xf32>
    %57 = math.tanh %56 : vector<16x128xf32>
    %cst_28 = arith.constant 5.000000e-01 : f32
    %58 = vector.broadcast %cst_28 : f32 to vector<16x128xf32>
    %59 = arith.mulf %58, %57 : vector<16x128xf32>
    %cst_29 = arith.constant 5.000000e-01 : f32
    %60 = vector.broadcast %cst_29 : f32 to vector<16x128xf32>
    %61 = arith.addf %59, %60 : vector<16x128xf32>
    %62 = vector.extract_strided_slice %21 {offsets = [0, 128], sizes = [16, 128], strides = [1, 1]} : vector<16x512xf32> to vector<16x128xf32>
    %cst_30 = arith.constant 5.000000e-01 : f32
    %63 = vector.broadcast %cst_30 : f32 to vector<16x128xf32>
    %64 = arith.mulf %63, %62 : vector<16x128xf32>
    %65 = math.tanh %64 : vector<16x128xf32>
    %cst_31 = arith.constant 5.000000e-01 : f32
    %66 = vector.broadcast %cst_31 : f32 to vector<16x128xf32>
    %67 = arith.mulf %66, %65 : vector<16x128xf32>
    %cst_32 = arith.constant 5.000000e-01 : f32
    %68 = vector.broadcast %cst_32 : f32 to vector<16x128xf32>
    %69 = arith.addf %67, %68 : vector<16x128xf32>
    %70 = vector.extract_strided_slice %21 {offsets = [0, 256], sizes = [16, 128], strides = [1, 1]} : vector<16x512xf32> to vector<16x128xf32>
    %71 = math.tanh %70 : vector<16x128xf32>
    %72 = vector.extract_strided_slice %21 {offsets = [0, 384], sizes = [16, 128], strides = [1, 1]} : vector<16x512xf32> to vector<16x128xf32>
    %cst_33 = arith.constant 5.000000e-01 : f32
    %73 = vector.broadcast %cst_33 : f32 to vector<16x128xf32>
    %74 = arith.mulf %73, %72 : vector<16x128xf32>
    %75 = math.tanh %74 : vector<16x128xf32>
    %cst_34 = arith.constant 5.000000e-01 : f32
    %76 = vector.broadcast %cst_34 : f32 to vector<16x128xf32>
    %77 = arith.mulf %76, %75 : vector<16x128xf32>
    %cst_35 = arith.constant 5.000000e-01 : f32
    %78 = vector.broadcast %cst_35 : f32 to vector<16x128xf32>
    %79 = arith.addf %77, %78 : vector<16x128xf32>
    %80 = arith.mulf %69, %6 : vector<16x128xf32>
    %81 = arith.mulf %61, %71 : vector<16x128xf32>
    %82 = arith.addf %80, %81 : vector<16x128xf32>
    %83 = math.tanh %82 : vector<16x128xf32>
    %84 = arith.mulf %79, %83 : vector<16x128xf32>
    %85 = arith.truncf %84 : vector<16x128xf32> to vector<16x128xbf16>
    %86 = arith.index_cast %c0_i32_8 : i32 to index
    %c0_36 = arith.constant 0 : index
    %c0_37 = arith.constant 0 : index
    %87 = vector.load %arg5[%86, %c0_36, %c0_37] : memref<4x16x128xbf16, #tpu.memory_space<vmem>>, vector<1x16x128xbf16>
    %88 = vector.shape_cast %87 : vector<1x16x128xbf16> to vector<16x128xbf16>
    %89 = vector.shape_cast %53 : vector<16x128xbf16> to vector<1x16x128xbf16>
    tpu.vector_store %arg5[%86, %c0_36, %c0_37], %89 {strides = array<i32>} : memref<4x16x128xbf16, #tpu.memory_space<vmem>>, vector<1x16x128xbf16>,
    %90 = arith.index_cast %7 : i32 to index
    %c0_38 = arith.constant 0 : index
    %c0_39 = arith.constant 0 : index
    %91 = vector.load %arg6[%90, %c0_38, %c0_39] : memref<4x16x128xbf16, #tpu.memory_space<vmem>>, vector<1x16x128xbf16>
    %92 = vector.shape_cast %91 : vector<1x16x128xbf16> to vector<16x128xbf16>
    %93 = vector.shape_cast %85 : vector<16x128xbf16> to vector<1x16x128xbf16>
    tpu.vector_store %arg6[%90, %c0_38, %c0_39], %93 {strides = array<i32>} : memref<4x16x128xbf16, #tpu.memory_space<vmem>>, vector<1x16x128xbf16>,
    %c1_i32 = arith.constant 1 : i32
    %c3_i32_40 = arith.constant 3 : i32
    %94 = arith.subi %c3_i32_40, %c1_i32 : i32
    %95 = arith.index_cast %c1_i32 : i32 to index
    %c0_41 = arith.constant 0 : index
    %c0_42 = arith.constant 0 : index
    %96 = vector.load %arg1[%95, %c0_41, %c0_42] : memref<4x16x512xbf16, #tpu.memory_space<vmem>>, vector<1x16x512xbf16>
    %97 = vector.shape_cast %96 : vector<1x16x512xbf16> to vector<16x512xbf16>
    %98 = arith.extf %97 : vector<16x512xbf16> to vector<16x512xf32>
    %c0_43 = arith.constant 0 : index
    %c0_44 = arith.constant 0 : index
    %99 = vector.load %arg3[%c0_43, %c0_44] : memref<128x512xbf16, #tpu.memory_space<vmem>>, vector<128x512xbf16>
    %cst_45 = arith.constant dense<0.000000e+00> : vector<16x512xf32>
    %100 = tpu.matmul %53, %99, %cst_45 {dimension_numbers = #tpu.dot_dimension_numbers<[1], [0], [0], [1], [0, 0, 1, 1], [], []>} : vector<16x128xbf16>, vector<128x512xbf16>, vector<16x512xf32> -> vector<16x512xf32>
    %101 = arith.addf %98, %100 : vector<16x512xf32>
    %102 = arith.index_cast %94 : i32 to index
    %c0_46 = arith.constant 0 : index
    %c0_47 = arith.constant 0 : index
    %103 = vector.load %arg2[%102, %c0_46, %c0_47] : memref<4x16x512xbf16, #tpu.memory_space<vmem>>, vector<1x16x512xbf16>
    %104 = vector.shape_cast %103 : vector<1x16x512xbf16> to vector<16x512xbf16>
    %105 = arith.extf %104 : vector<16x512xbf16> to vector<16x512xf32>
    %c0_48 = arith.constant 0 : index
    %c0_49 = arith.constant 0 : index
    %106 = vector.load %arg4[%c0_48, %c0_49] : memref<128x512xbf16, #tpu.memory_space<vmem>>, vector<128x512xbf16>
    %cst_50 = arith.constant dense<0.000000e+00> : vector<16x512xf32>
    %107 = tpu.matmul %85, %106, %cst_50 {dimension_numbers = #tpu.dot_dimension_numbers<[1], [0], [0], [1], [0, 0, 1, 1], [], []>} : vector<16x128xbf16>, vector<128x512xbf16>, vector<16x512xf32> -> vector<16x512xf32>
    %108 = arith.addf %105, %107 : vector<16x512xf32>
    %109 = vector.extract_strided_slice %101 {offsets = [0, 0], sizes = [16, 128], strides = [1, 1]} : vector<16x512xf32> to vector<16x128xf32>
    %cst_51 = arith.constant 5.000000e-01 : f32
    %110 = vector.broadcast %cst_51 : f32 to vector<16x128xf32>
    %111 = arith.mulf %110, %109 : vector<16x128xf32>
    %112 = math.tanh %111 : vector<16x128xf32>
    %cst_52 = arith.constant 5.000000e-01 : f32
    %113 = vector.broadcast %cst_52 : f32 to vector<16x128xf32>
    %114 = arith.mulf %113, %112 : vector<16x128xf32>
    %cst_53 = arith.constant 5.000000e-01 : f32
    %115 = vector.broadcast %cst_53 : f32 to vector<16x128xf32>
    %116 = arith.addf %114, %115 : vector<16x128xf32>
    %117 = vector.extract_strided_slice %101 {offsets = [0, 128], sizes = [16, 128], strides = [1, 1]} : vector<16x512xf32> to vector<16x128xf32>
    %cst_54 = arith.constant 5.000000e-01 : f32
    %118 = vector.broadcast %cst_54 : f32 to vector<16x128xf32>
    %119 = arith.mulf %118, %117 : vector<16x128xf32>
    %120 = math.tanh %119 : vector<16x128xf32>
    %cst_55 = arith.constant 5.000000e-01 : f32
    %121 = vector.broadcast %cst_55 : f32 to vector<16x128xf32>
    %122 = arith.mulf %121, %120 : vector<16x128xf32>
    %cst_56 = arith.constant 5.000000e-01 : f32
    %123 = vector.broadcast %cst_56 : f32 to vector<16x128xf32>
    %124 = arith.addf %122, %123 : vector<16x128xf32>
    %125 = vector.extract_strided_slice %101 {offsets = [0, 256], sizes = [16, 128], strides = [1, 1]} : vector<16x512xf32> to vector<16x128xf32>
    %126 = math.tanh %125 : vector<16x128xf32>
    %127 = vector.extract_strided_slice %101 {offsets = [0, 384], sizes = [16, 128], strides = [1, 1]} : vector<16x512xf32> to vector<16x128xf32>
    %cst_57 = arith.constant 5.000000e-01 : f32
    %128 = vector.broadcast %cst_57 : f32 to vector<16x128xf32>
    %129 = arith.mulf %128, %127 : vector<16x128xf32>
    %130 = math.tanh %129 : vector<16x128xf32>
    %cst_58 = arith.constant 5.000000e-01 : f32
    %131 = vector.broadcast %cst_58 : f32 to vector<16x128xf32>
    %132 = arith.mulf %131, %130 : vector<16x128xf32>
    %cst_59 = arith.constant 5.000000e-01 : f32
    %133 = vector.broadcast %cst_59 : f32 to vector<16x128xf32>
    %134 = arith.addf %132, %133 : vector<16x128xf32>
    %135 = arith.mulf %124, %50 : vector<16x128xf32>
    %136 = arith.mulf %116, %126 : vector<16x128xf32>
    %137 = arith.addf %135, %136 : vector<16x128xf32>
    %138 = math.tanh %137 : vector<16x128xf32>
    %139 = arith.mulf %134, %138 : vector<16x128xf32>
    %140 = arith.truncf %139 : vector<16x128xf32> to vector<16x128xbf16>
    %141 = vector.extract_strided_slice %108 {offsets = [0, 0], sizes = [16, 128], strides = [1, 1]} : vector<16x512xf32> to vector<16x128xf32>
    %cst_60 = arith.constant 5.000000e-01 : f32
    %142 = vector.broadcast %cst_60 : f32 to vector<16x128xf32>
    %143 = arith.mulf %142, %141 : vector<16x128xf32>
    %144 = math.tanh %143 : vector<16x128xf32>
    %cst_61 = arith.constant 5.000000e-01 : f32
    %145 = vector.broadcast %cst_61 : f32 to vector<16x128xf32>
    %146 = arith.mulf %145, %144 : vector<16x128xf32>
    %cst_62 = arith.constant 5.000000e-01 : f32
    %147 = vector.broadcast %cst_62 : f32 to vector<16x128xf32>
    %148 = arith.addf %146, %147 : vector<16x128xf32>
    %149 = vector.extract_strided_slice %108 {offsets = [0, 128], sizes = [16, 128], strides = [1, 1]} : vector<16x512xf32> to vector<16x128xf32>
    %cst_63 = arith.constant 5.000000e-01 : f32
    %150 = vector.broadcast %cst_63 : f32 to vector<16x128xf32>
    %151 = arith.mulf %150, %149 : vector<16x128xf32>
    %152 = math.tanh %151 : vector<16x128xf32>
    %cst_64 = arith.constant 5.000000e-01 : f32
    %153 = vector.broadcast %cst_64 : f32 to vector<16x128xf32>
    %154 = arith.mulf %153, %152 : vector<16x128xf32>
    %cst_65 = arith.constant 5.000000e-01 : f32
    %155 = vector.broadcast %cst_65 : f32 to vector<16x128xf32>
    %156 = arith.addf %154, %155 : vector<16x128xf32>
    %157 = vector.extract_strided_slice %108 {offsets = [0, 256], sizes = [16, 128], strides = [1, 1]} : vector<16x512xf32> to vector<16x128xf32>
    %158 = math.tanh %157 : vector<16x128xf32>
    %159 = vector.extract_strided_slice %108 {offsets = [0, 384], sizes = [16, 128], strides = [1, 1]} : vector<16x512xf32> to vector<16x128xf32>
    %cst_66 = arith.constant 5.000000e-01 : f32
    %160 = vector.broadcast %cst_66 : f32 to vector<16x128xf32>
    %161 = arith.mulf %160, %159 : vector<16x128xf32>
    %162 = math.tanh %161 : vector<16x128xf32>
    %cst_67 = arith.constant 5.000000e-01 : f32
    %163 = vector.broadcast %cst_67 : f32 to vector<16x128xf32>
    %164 = arith.mulf %163, %162 : vector<16x128xf32>
    %cst_68 = arith.constant 5.000000e-01 : f32
    %165 = vector.broadcast %cst_68 : f32 to vector<16x128xf32>
    %166 = arith.addf %164, %165 : vector<16x128xf32>
    %167 = arith.mulf %156, %82 : vector<16x128xf32>
    %168 = arith.mulf %148, %158 : vector<16x128xf32>
    %169 = arith.addf %167, %168 : vector<16x128xf32>
    %170 = math.tanh %169 : vector<16x128xf32>
    %171 = arith.mulf %166, %170 : vector<16x128xf32>
    %172 = arith.truncf %171 : vector<16x128xf32> to vector<16x128xbf16>
    %173 = arith.index_cast %c1_i32 : i32 to index
    %c0_69 = arith.constant 0 : index
    %c0_70 = arith.constant 0 : index
    %174 = vector.load %arg5[%173, %c0_69, %c0_70] : memref<4x16x128xbf16, #tpu.memory_space<vmem>>, vector<1x16x128xbf16>
    %175 = vector.shape_cast %174 : vector<1x16x128xbf16> to vector<16x128xbf16>
    %176 = vector.shape_cast %140 : vector<16x128xbf16> to vector<1x16x128xbf16>
    tpu.vector_store %arg5[%173, %c0_69, %c0_70], %176 {strides = array<i32>} : memref<4x16x128xbf16, #tpu.memory_space<vmem>>, vector<1x16x128xbf16>,
    %177 = arith.index_cast %94 : i32 to index
    %c0_71 = arith.constant 0 : index
    %c0_72 = arith.constant 0 : index
    %178 = vector.load %arg6[%177, %c0_71, %c0_72] : memref<4x16x128xbf16, #tpu.memory_space<vmem>>, vector<1x16x128xbf16>
    %179 = vector.shape_cast %178 : vector<1x16x128xbf16> to vector<16x128xbf16>
    %180 = vector.shape_cast %172 : vector<16x128xbf16> to vector<1x16x128xbf16>
    tpu.vector_store %arg6[%177, %c0_71, %c0_72], %180 {strides = array<i32>} : memref<4x16x128xbf16, #tpu.memory_space<vmem>>, vector<1x16x128xbf16>,
    %c2_i32 = arith.constant 2 : i32
    %c3_i32_73 = arith.constant 3 : i32
    %181 = arith.subi %c3_i32_73, %c2_i32 : i32
    %182 = arith.index_cast %c2_i32 : i32 to index
    %c0_74 = arith.constant 0 : index
    %c0_75 = arith.constant 0 : index
    %183 = vector.load %arg1[%182, %c0_74, %c0_75] : memref<4x16x512xbf16, #tpu.memory_space<vmem>>, vector<1x16x512xbf16>
    %184 = vector.shape_cast %183 : vector<1x16x512xbf16> to vector<16x512xbf16>
    %185 = arith.extf %184 : vector<16x512xbf16> to vector<16x512xf32>
    %c0_76 = arith.constant 0 : index
    %c0_77 = arith.constant 0 : index
    %186 = vector.load %arg3[%c0_76, %c0_77] : memref<128x512xbf16, #tpu.memory_space<vmem>>, vector<128x512xbf16>
    %cst_78 = arith.constant dense<0.000000e+00> : vector<16x512xf32>
    %187 = tpu.matmul %140, %186, %cst_78 {dimension_numbers = #tpu.dot_dimension_numbers<[1], [0], [0], [1], [0, 0, 1, 1], [], []>} : vector<16x128xbf16>, vector<128x512xbf16>, vector<16x512xf32> -> vector<16x512xf32>
    %188 = arith.addf %185, %187 : vector<16x512xf32>
    %189 = arith.index_cast %181 : i32 to index
    %c0_79 = arith.constant 0 : index
    %c0_80 = arith.constant 0 : index
    %190 = vector.load %arg2[%189, %c0_79, %c0_80] : memref<4x16x512xbf16, #tpu.memory_space<vmem>>, vector<1x16x512xbf16>
    %191 = vector.shape_cast %190 : vector<1x16x512xbf16> to vector<16x512xbf16>
    %192 = arith.extf %191 : vector<16x512xbf16> to vector<16x512xf32>
    %c0_81 = arith.constant 0 : index
    %c0_82 = arith.constant 0 : index
    %193 = vector.load %arg4[%c0_81, %c0_82] : memref<128x512xbf16, #tpu.memory_space<vmem>>, vector<128x512xbf16>
    %cst_83 = arith.constant dense<0.000000e+00> : vector<16x512xf32>
    %194 = tpu.matmul %172, %193, %cst_83 {dimension_numbers = #tpu.dot_dimension_numbers<[1], [0], [0], [1], [0, 0, 1, 1], [], []>} : vector<16x128xbf16>, vector<128x512xbf16>, vector<16x512xf32> -> vector<16x512xf32>
    %195 = arith.addf %192, %194 : vector<16x512xf32>
    %196 = vector.extract_strided_slice %188 {offsets = [0, 0], sizes = [16, 128], strides = [1, 1]} : vector<16x512xf32> to vector<16x128xf32>
    %cst_84 = arith.constant 5.000000e-01 : f32
    %197 = vector.broadcast %cst_84 : f32 to vector<16x128xf32>
    %198 = arith.mulf %197, %196 : vector<16x128xf32>
    %199 = math.tanh %198 : vector<16x128xf32>
    %cst_85 = arith.constant 5.000000e-01 : f32
    %200 = vector.broadcast %cst_85 : f32 to vector<16x128xf32>
    %201 = arith.mulf %200, %199 : vector<16x128xf32>
    %cst_86 = arith.constant 5.000000e-01 : f32
    %202 = vector.broadcast %cst_86 : f32 to vector<16x128xf32>
    %203 = arith.addf %201, %202 : vector<16x128xf32>
    %204 = vector.extract_strided_slice %188 {offsets = [0, 128], sizes = [16, 128], strides = [1, 1]} : vector<16x512xf32> to vector<16x128xf32>
    %cst_87 = arith.constant 5.000000e-01 : f32
    %205 = vector.broadcast %cst_87 : f32 to vector<16x128xf32>
    %206 = arith.mulf %205, %204 : vector<16x128xf32>
    %207 = math.tanh %206 : vector<16x128xf32>
    %cst_88 = arith.constant 5.000000e-01 : f32
    %208 = vector.broadcast %cst_88 : f32 to vector<16x128xf32>
    %209 = arith.mulf %208, %207 : vector<16x128xf32>
    %cst_89 = arith.constant 5.000000e-01 : f32
    %210 = vector.broadcast %cst_89 : f32 to vector<16x128xf32>
    %211 = arith.addf %209, %210 : vector<16x128xf32>
    %212 = vector.extract_strided_slice %188 {offsets = [0, 256], sizes = [16, 128], strides = [1, 1]} : vector<16x512xf32> to vector<16x128xf32>
    %213 = math.tanh %212 : vector<16x128xf32>
    %214 = vector.extract_strided_slice %188 {offsets = [0, 384], sizes = [16, 128], strides = [1, 1]} : vector<16x512xf32> to vector<16x128xf32>
    %cst_90 = arith.constant 5.000000e-01 : f32
    %215 = vector.broadcast %cst_90 : f32 to vector<16x128xf32>
    %216 = arith.mulf %215, %214 : vector<16x128xf32>
    %217 = math.tanh %216 : vector<16x128xf32>
    %cst_91 = arith.constant 5.000000e-01 : f32
    %218 = vector.broadcast %cst_91 : f32 to vector<16x128xf32>
    %219 = arith.mulf %218, %217 : vector<16x128xf32>
    %cst_92 = arith.constant 5.000000e-01 : f32
    %220 = vector.broadcast %cst_92 : f32 to vector<16x128xf32>
    %221 = arith.addf %219, %220 : vector<16x128xf32>
    %222 = arith.mulf %211, %137 : vector<16x128xf32>
    %223 = arith.mulf %203, %213 : vector<16x128xf32>
    %224 = arith.addf %222, %223 : vector<16x128xf32>
    %225 = math.tanh %224 : vector<16x128xf32>
    %226 = arith.mulf %221, %225 : vector<16x128xf32>
    %227 = arith.truncf %226 : vector<16x128xf32> to vector<16x128xbf16>
    %228 = vector.extract_strided_slice %195 {offsets = [0, 0], sizes = [16, 128], strides = [1, 1]} : vector<16x512xf32> to vector<16x128xf32>
    %cst_93 = arith.constant 5.000000e-01 : f32
    %229 = vector.broadcast %cst_93 : f32 to vector<16x128xf32>
    %230 = arith.mulf %229, %228 : vector<16x128xf32>
    %231 = math.tanh %230 : vector<16x128xf32>
    %cst_94 = arith.constant 5.000000e-01 : f32
    %232 = vector.broadcast %cst_94 : f32 to vector<16x128xf32>
    %233 = arith.mulf %232, %231 : vector<16x128xf32>
    %cst_95 = arith.constant 5.000000e-01 : f32
    %234 = vector.broadcast %cst_95 : f32 to vector<16x128xf32>
    %235 = arith.addf %233, %234 : vector<16x128xf32>
    %236 = vector.extract_strided_slice %195 {offsets = [0, 128], sizes = [16, 128], strides = [1, 1]} : vector<16x512xf32> to vector<16x128xf32>
    %cst_96 = arith.constant 5.000000e-01 : f32
    %237 = vector.broadcast %cst_96 : f32 to vector<16x128xf32>
    %238 = arith.mulf %237, %236 : vector<16x128xf32>
    %239 = math.tanh %238 : vector<16x128xf32>
    %cst_97 = arith.constant 5.000000e-01 : f32
    %240 = vector.broadcast %cst_97 : f32 to vector<16x128xf32>
    %241 = arith.mulf %240, %239 : vector<16x128xf32>
    %cst_98 = arith.constant 5.000000e-01 : f32
    %242 = vector.broadcast %cst_98 : f32 to vector<16x128xf32>
    %243 = arith.addf %241, %242 : vector<16x128xf32>
    %244 = vector.extract_strided_slice %195 {offsets = [0, 256], sizes = [16, 128], strides = [1, 1]} : vector<16x512xf32> to vector<16x128xf32>
    %245 = math.tanh %244 : vector<16x128xf32>
    %246 = vector.extract_strided_slice %195 {offsets = [0, 384], sizes = [16, 128], strides = [1, 1]} : vector<16x512xf32> to vector<16x128xf32>
    %cst_99 = arith.constant 5.000000e-01 : f32
    %247 = vector.broadcast %cst_99 : f32 to vector<16x128xf32>
    %248 = arith.mulf %247, %246 : vector<16x128xf32>
    %249 = math.tanh %248 : vector<16x128xf32>
    %cst_100 = arith.constant 5.000000e-01 : f32
    %250 = vector.broadcast %cst_100 : f32 to vector<16x128xf32>
    %251 = arith.mulf %250, %249 : vector<16x128xf32>
    %cst_101 = arith.constant 5.000000e-01 : f32
    %252 = vector.broadcast %cst_101 : f32 to vector<16x128xf32>
    %253 = arith.addf %251, %252 : vector<16x128xf32>
    %254 = arith.mulf %243, %169 : vector<16x128xf32>
    %255 = arith.mulf %235, %245 : vector<16x128xf32>
    %256 = arith.addf %254, %255 : vector<16x128xf32>
    %257 = math.tanh %256 : vector<16x128xf32>
    %258 = arith.mulf %253, %257 : vector<16x128xf32>
    %259 = arith.truncf %258 : vector<16x128xf32> to vector<16x128xbf16>
    %260 = arith.index_cast %c2_i32 : i32 to index
    %c0_102 = arith.constant 0 : index
    %c0_103 = arith.constant 0 : index
    %261 = vector.load %arg5[%260, %c0_102, %c0_103] : memref<4x16x128xbf16, #tpu.memory_space<vmem>>, vector<1x16x128xbf16>
    %262 = vector.shape_cast %261 : vector<1x16x128xbf16> to vector<16x128xbf16>
    %263 = vector.shape_cast %227 : vector<16x128xbf16> to vector<1x16x128xbf16>
    tpu.vector_store %arg5[%260, %c0_102, %c0_103], %263 {strides = array<i32>} : memref<4x16x128xbf16, #tpu.memory_space<vmem>>, vector<1x16x128xbf16>,
    %264 = arith.index_cast %181 : i32 to index
    %c0_104 = arith.constant 0 : index
    %c0_105 = arith.constant 0 : index
    %265 = vector.load %arg6[%264, %c0_104, %c0_105] : memref<4x16x128xbf16, #tpu.memory_space<vmem>>, vector<1x16x128xbf16>
    %266 = vector.shape_cast %265 : vector<1x16x128xbf16> to vector<16x128xbf16>
    %267 = vector.shape_cast %259 : vector<16x128xbf16> to vector<1x16x128xbf16>
    tpu.vector_store %arg6[%264, %c0_104, %c0_105], %267 {strides = array<i32>} : memref<4x16x128xbf16, #tpu.memory_space<vmem>>, vector<1x16x128xbf16>,
    %c3_i32_106 = arith.constant 3 : i32
    %c3_i32_107 = arith.constant 3 : i32
    %268 = arith.subi %c3_i32_107, %c3_i32_106 : i32
    %269 = arith.index_cast %c3_i32_106 : i32 to index
    %c0_108 = arith.constant 0 : index
    %c0_109 = arith.constant 0 : index
    %270 = vector.load %arg1[%269, %c0_108, %c0_109] : memref<4x16x512xbf16, #tpu.memory_space<vmem>>, vector<1x16x512xbf16>
    %271 = vector.shape_cast %270 : vector<1x16x512xbf16> to vector<16x512xbf16>
    %272 = arith.extf %271 : vector<16x512xbf16> to vector<16x512xf32>
    %c0_110 = arith.constant 0 : index
    %c0_111 = arith.constant 0 : index
    %273 = vector.load %arg3[%c0_110, %c0_111] : memref<128x512xbf16, #tpu.memory_space<vmem>>, vector<128x512xbf16>
    %cst_112 = arith.constant dense<0.000000e+00> : vector<16x512xf32>
    %274 = tpu.matmul %227, %273, %cst_112 {dimension_numbers = #tpu.dot_dimension_numbers<[1], [0], [0], [1], [0, 0, 1, 1], [], []>} : vector<16x128xbf16>, vector<128x512xbf16>, vector<16x512xf32> -> vector<16x512xf32>
    %275 = arith.addf %272, %274 : vector<16x512xf32>
    %276 = arith.index_cast %268 : i32 to index
    %c0_113 = arith.constant 0 : index
    %c0_114 = arith.constant 0 : index
    %277 = vector.load %arg2[%276, %c0_113, %c0_114] : memref<4x16x512xbf16, #tpu.memory_space<vmem>>, vector<1x16x512xbf16>
    %278 = vector.shape_cast %277 : vector<1x16x512xbf16> to vector<16x512xbf16>
    %279 = arith.extf %278 : vector<16x512xbf16> to vector<16x512xf32>
    %c0_115 = arith.constant 0 : index
    %c0_116 = arith.constant 0 : index
    %280 = vector.load %arg4[%c0_115, %c0_116] : memref<128x512xbf16, #tpu.memory_space<vmem>>, vector<128x512xbf16>
    %cst_117 = arith.constant dense<0.000000e+00> : vector<16x512xf32>
    %281 = tpu.matmul %259, %280, %cst_117 {dimension_numbers = #tpu.dot_dimension_numbers<[1], [0], [0], [1], [0, 0, 1, 1], [], []>} : vector<16x128xbf16>, vector<128x512xbf16>, vector<16x512xf32> -> vector<16x512xf32>
    %282 = arith.addf %279, %281 : vector<16x512xf32>
    %283 = vector.extract_strided_slice %275 {offsets = [0, 0], sizes = [16, 128], strides = [1, 1]} : vector<16x512xf32> to vector<16x128xf32>
    %cst_118 = arith.constant 5.000000e-01 : f32
    %284 = vector.broadcast %cst_118 : f32 to vector<16x128xf32>
    %285 = arith.mulf %284, %283 : vector<16x128xf32>
    %286 = math.tanh %285 : vector<16x128xf32>
    %cst_119 = arith.constant 5.000000e-01 : f32
    %287 = vector.broadcast %cst_119 : f32 to vector<16x128xf32>
    %288 = arith.mulf %287, %286 : vector<16x128xf32>
    %cst_120 = arith.constant 5.000000e-01 : f32
    %289 = vector.broadcast %cst_120 : f32 to vector<16x128xf32>
    %290 = arith.addf %288, %289 : vector<16x128xf32>
    %291 = vector.extract_strided_slice %275 {offsets = [0, 128], sizes = [16, 128], strides = [1, 1]} : vector<16x512xf32> to vector<16x128xf32>
    %cst_121 = arith.constant 5.000000e-01 : f32
    %292 = vector.broadcast %cst_121 : f32 to vector<16x128xf32>
    %293 = arith.mulf %292, %291 : vector<16x128xf32>
    %294 = math.tanh %293 : vector<16x128xf32>
    %cst_122 = arith.constant 5.000000e-01 : f32
    %295 = vector.broadcast %cst_122 : f32 to vector<16x128xf32>
    %296 = arith.mulf %295, %294 : vector<16x128xf32>
    %cst_123 = arith.constant 5.000000e-01 : f32
    %297 = vector.broadcast %cst_123 : f32 to vector<16x128xf32>
    %298 = arith.addf %296, %297 : vector<16x128xf32>
    %299 = vector.extract_strided_slice %275 {offsets = [0, 256], sizes = [16, 128], strides = [1, 1]} : vector<16x512xf32> to vector<16x128xf32>
    %300 = math.tanh %299 : vector<16x128xf32>
    %301 = vector.extract_strided_slice %275 {offsets = [0, 384], sizes = [16, 128], strides = [1, 1]} : vector<16x512xf32> to vector<16x128xf32>
    %cst_124 = arith.constant 5.000000e-01 : f32
    %302 = vector.broadcast %cst_124 : f32 to vector<16x128xf32>
    %303 = arith.mulf %302, %301 : vector<16x128xf32>
    %304 = math.tanh %303 : vector<16x128xf32>
    %cst_125 = arith.constant 5.000000e-01 : f32
    %305 = vector.broadcast %cst_125 : f32 to vector<16x128xf32>
    %306 = arith.mulf %305, %304 : vector<16x128xf32>
    %cst_126 = arith.constant 5.000000e-01 : f32
    %307 = vector.broadcast %cst_126 : f32 to vector<16x128xf32>
    %308 = arith.addf %306, %307 : vector<16x128xf32>
    %309 = arith.mulf %298, %224 : vector<16x128xf32>
    %310 = arith.mulf %290, %300 : vector<16x128xf32>
    %311 = arith.addf %309, %310 : vector<16x128xf32>
    %312 = math.tanh %311 : vector<16x128xf32>
    %313 = arith.mulf %308, %312 : vector<16x128xf32>
    %314 = arith.truncf %313 : vector<16x128xf32> to vector<16x128xbf16>
    %315 = vector.extract_strided_slice %282 {offsets = [0, 0], sizes = [16, 128], strides = [1, 1]} : vector<16x512xf32> to vector<16x128xf32>
    %cst_127 = arith.constant 5.000000e-01 : f32
    %316 = vector.broadcast %cst_127 : f32 to vector<16x128xf32>
    %317 = arith.mulf %316, %315 : vector<16x128xf32>
    %318 = math.tanh %317 : vector<16x128xf32>
    %cst_128 = arith.constant 5.000000e-01 : f32
    %319 = vector.broadcast %cst_128 : f32 to vector<16x128xf32>
    %320 = arith.mulf %319, %318 : vector<16x128xf32>
    %cst_129 = arith.constant 5.000000e-01 : f32
    %321 = vector.broadcast %cst_129 : f32 to vector<16x128xf32>
    %322 = arith.addf %320, %321 : vector<16x128xf32>
    %323 = vector.extract_strided_slice %282 {offsets = [0, 128], sizes = [16, 128], strides = [1, 1]} : vector<16x512xf32> to vector<16x128xf32>
    %cst_130 = arith.constant 5.000000e-01 : f32
    %324 = vector.broadcast %cst_130 : f32 to vector<16x128xf32>
    %325 = arith.mulf %324, %323 : vector<16x128xf32>
    %326 = math.tanh %325 : vector<16x128xf32>
    %cst_131 = arith.constant 5.000000e-01 : f32
    %327 = vector.broadcast %cst_131 : f32 to vector<16x128xf32>
    %328 = arith.mulf %327, %326 : vector<16x128xf32>
    %cst_132 = arith.constant 5.000000e-01 : f32
    %329 = vector.broadcast %cst_132 : f32 to vector<16x128xf32>
    %330 = arith.addf %328, %329 : vector<16x128xf32>
    %331 = vector.extract_strided_slice %282 {offsets = [0, 256], sizes = [16, 128], strides = [1, 1]} : vector<16x512xf32> to vector<16x128xf32>
    %332 = math.tanh %331 : vector<16x128xf32>
    %333 = vector.extract_strided_slice %282 {offsets = [0, 384], sizes = [16, 128], strides = [1, 1]} : vector<16x512xf32> to vector<16x128xf32>
    %cst_133 = arith.constant 5.000000e-01 : f32
    %334 = vector.broadcast %cst_133 : f32 to vector<16x128xf32>
    %335 = arith.mulf %334, %333 : vector<16x128xf32>
    %336 = math.tanh %335 : vector<16x128xf32>
    %cst_134 = arith.constant 5.000000e-01 : f32
    %337 = vector.broadcast %cst_134 : f32 to vector<16x128xf32>
    %338 = arith.mulf %337, %336 : vector<16x128xf32>
    %cst_135 = arith.constant 5.000000e-01 : f32
    %339 = vector.broadcast %cst_135 : f32 to vector<16x128xf32>
    %340 = arith.addf %338, %339 : vector<16x128xf32>
    %341 = arith.mulf %330, %256 : vector<16x128xf32>
    %342 = arith.mulf %322, %332 : vector<16x128xf32>
    %343 = arith.addf %341, %342 : vector<16x128xf32>
    %344 = math.tanh %343 : vector<16x128xf32>
    %345 = arith.mulf %340, %344 : vector<16x128xf32>
    %346 = arith.truncf %345 : vector<16x128xf32> to vector<16x128xbf16>
    %347 = arith.index_cast %c3_i32_106 : i32 to index
    %c0_136 = arith.constant 0 : index
    %c0_137 = arith.constant 0 : index
    %348 = vector.load %arg5[%347, %c0_136, %c0_137] : memref<4x16x128xbf16, #tpu.memory_space<vmem>>, vector<1x16x128xbf16>
    %349 = vector.shape_cast %348 : vector<1x16x128xbf16> to vector<16x128xbf16>
    %350 = vector.shape_cast %314 : vector<16x128xbf16> to vector<1x16x128xbf16>
    tpu.vector_store %arg5[%347, %c0_136, %c0_137], %350 {strides = array<i32>} : memref<4x16x128xbf16, #tpu.memory_space<vmem>>, vector<1x16x128xbf16>,
    %351 = arith.index_cast %268 : i32 to index
    %c0_138 = arith.constant 0 : index
    %c0_139 = arith.constant 0 : index
    %352 = vector.load %arg6[%351, %c0_138, %c0_139] : memref<4x16x128xbf16, #tpu.memory_space<vmem>>, vector<1x16x128xbf16>
    %353 = vector.shape_cast %352 : vector<1x16x128xbf16> to vector<16x128xbf16>
    %354 = vector.shape_cast %346 : vector<16x128xbf16> to vector<1x16x128xbf16>
    tpu.vector_store %arg6[%351, %c0_138, %c0_139], %354 {strides = array<i32>} : memref<4x16x128xbf16, #tpu.memory_space<vmem>>, vector<1x16x128xbf16>,
    %c4_i32 = arith.constant 4 : i32
    %c0_140 = arith.constant 0 : index
    %c0_141 = arith.constant 0 : index
    %355 = vector.load %arg7[%c0_140, %c0_141] : memref<16x128xbf16, #tpu.memory_space<vmem>>, vector<16x128xbf16>
    tpu.vector_store %arg7[%c0_140, %c0_141], %314 {strides = array<i32>} : memref<16x128xbf16, #tpu.memory_space<vmem>>, vector<16x128xbf16>,
    %c0_142 = arith.constant 0 : index
    %c0_143 = arith.constant 0 : index
    %356 = vector.load %arg8[%c0_142, %c0_143] : memref<16x128xf32, #tpu.memory_space<vmem>>, vector<16x128xf32>
    tpu.vector_store %arg8[%c0_142, %c0_143], %311 {strides = array<i32>} : memref<16x128xf32, #tpu.memory_space<vmem>>, vector<16x128xf32>,
    %c0_144 = arith.constant 0 : index
    %c0_145 = arith.constant 0 : index
    %357 = vector.load %arg9[%c0_144, %c0_145] : memref<16x128xbf16, #tpu.memory_space<vmem>>, vector<16x128xbf16>
    tpu.vector_store %arg9[%c0_144, %c0_145], %346 {strides = array<i32>} : memref<16x128xbf16, #tpu.memory_space<vmem>>, vector<16x128xbf16>,
    %c0_146 = arith.constant 0 : index
    %c0_147 = arith.constant 0 : index
    %358 = vector.load %arg10[%c0_146, %c0_147] : memref<16x128xf32, #tpu.memory_space<vmem>>, vector<16x128xf32>
    tpu.vector_store %arg10[%c0_146, %c0_147], %343 {strides = array<i32>} : memref<16x128xf32, #tpu.memory_space<vmem>>, vector<16x128xf32>,
    return
  }
  func.func @transform_0(%arg0: i32) -> (i32, i32, i32) {
    %c0_i32 = arith.constant 0 : i32
    %c0_i32_0 = arith.constant 0 : i32
    %c0_i32_1 = arith.constant 0 : i32
    return %arg0, %c0_i32, %c0_i32_0 : i32, i32, i32
  }
  func.func @transform_1(%arg0: i32) -> (i32, i32, i32) {
    %c2_i32 = arith.constant 2 : i32
    %0 = arith.subi %c2_i32, %arg0 : i32
    %c0_i32 = arith.constant 0 : i32
    %c0_i32_0 = arith.constant 0 : i32
    %c0_i32_1 = arith.constant 0 : i32
    return %0, %c0_i32, %c0_i32_0 : i32, i32, i32
  }
  func.func @transform_2(%arg0: i32) -> (i32, i32) {
    %c0_i32 = arith.constant 0 : i32
    %c0_i32_0 = arith.constant 0 : i32
    %c0_i32_1 = arith.constant 0 : i32
    return %c0_i32, %c0_i32_0 : i32, i32
  }
  func.func @transform_3(%arg0: i32) -> (i32, i32) {
    %c0_i32 = arith.constant 0 : i32
    %c0_i32_0 = arith.constant 0 : i32
    %c0_i32_1 = arith.constant 0 : i32
    return %c0_i32, %c0_i32_0 : i32, i32
  }
  func.func @transform_4(%arg0: i32) -> (i32, i32, i32) {
    %c0_i32 = arith.constant 0 : i32
    %c0_i32_0 = arith.constant 0 : i32
    %c0_i32_1 = arith.constant 0 : i32
    return %arg0, %c0_i32, %c0_i32_0 : i32, i32, i32
  }
  func.func @transform_5(%arg0: i32) -> (i32, i32, i32) {
    %c2_i32 = arith.constant 2 : i32
    %0 = arith.subi %c2_i32, %arg0 : i32
    %c0_i32 = arith.constant 0 : i32
    %c0_i32_0 = arith.constant 0 : i32
    %c0_i32_1 = arith.constant 0 : i32
    return %0, %c0_i32, %c0_i32_0 : i32, i32, i32
  }
}

</mosaic_0001>

<bundles_post_ra>
// kernel: blstm_forward.2
= control target key start
LH: loop header
LB: loop body
LE: loop exit
PB: predicated region body
PF: predicated region fallthrough
CT: control target
= control target key end

     0   :  { %s3820_s18 = smov 0   ;;  %s4851_s0 = inlined_call_operand.vmem [shape: bf16[12,16,512], index: 0, kind: input, shape index: {}]   ;;  %s4852_s1 = inlined_call_operand.vmem [shape: bf16[12,16,512], index: 1, kind: input, shape index: {}]   ;;  %s4853_s2 = inlined_call_operand.vmem [shape: bf16[128,512], index: 2, kind: input, shape index: {}]   ;;  %s4854_s3 = inlined_call_operand.vmem [shape: bf16[128,512], index: 3, kind: input, shape index: {}]   ;;  %s4855_s4 = inlined_call_operand.vmem [shape: bf16[12,16,128], index: 4, kind: output, shape index: {0}]   ;;  %s4856_s5 = inlined_call_operand.vmem [shape: bf16[12,16,128], index: 5, kind: output, shape index: {1}]  }
   0x1 LB: > { %s3110_s19 = sadd.s32 4294967295, %s3785_s18   ;;  %p3114_p0 = scmp.ge.s32.totalorder %s3785_s18, 1  ;;  %s3785_s18 = sphi %s3820_s18, %s16_s18  }
   0x2   : > { %p210_p1 = scmp.lt.s32.totalorder %s3785_s18, 4 }
   0x4   : > { %p211_p2 = pnand %p3114_p0, %p210_p1 }
   0x6   : > { %214 = sbr.rel (%p211_p2) target bundleno = 1110 (0x456), region = 36 }
   0xd   : > { %s3115_s20 = sshll.u32 %s3110_s19, 2  ;;  %s259_s21 = ssub.s32 2, %s3110_s19 }
   0xe   : > { %p253_p3 = scmp.lt.s32.totalorder %s3115_s20, 11  ;;  %s3118_s22 = sshll.u32 %s259_s21, 2 }
   0xf   : > { %p261_p4 = scmp.lt.s32.totalorder %s3118_s22, 11  ;;  %p3125_p5 = scmp.ne.s32.totalorder %s3110_s19, 0 }
  0x10   : > { %s4909_s20 = smov (!%p253_p3, %s3115_s20), 11  ;;  %v3787_v0 = vmov (!%p3125_p5), 0   ;;  %v3788_v1 = vmov (!%p3125_p5), 0.0  }
  0x11   : > { %s4911_s22 = smov (!%p261_p4, %s3118_s22), 11  ;;  %s3414_s23 = sshll.u32 %s4909_s20, 5  ;;  %287 = vst [vmem:[#allocation2] sm:$0xff] (!%p3125_p5), %v3787_v0  ;;  %290 = vst [vmem:[#allocation4] sm:$0xff] (!%p3125_p5), %v3787_v0 }
  0x12   : > { %s3122_s24 = sshll.u32 %s4909_s20, 3  ;;  %s3831_s27 = scalar_lea.vmem %s4851_s0, %s3414_s23  ;;  %288 = vst [vmem:[#allocation3] sm:$0xff] (!%p3125_p5), %v3788_v1  ;;  %289 = vst [vmem:[#allocation3 + $0x8] sm:$0xff] (!%p3125_p5), %v3788_v1 }
  0x13   : > { %s3415_s28 = sshll.u32 %s4911_s22, 5  ;;  %s3841_s9 = scalar_lea.vmem %s4855_s4, %s3122_s24  ;;  %291 = vst [vmem:[#allocation5] sm:$0xff] (!%p3125_p5), %v3788_v1  ;;  %292 = vst [vmem:[#allocation5 + $0x8] sm:$0xff] (!%p3125_p5), %v3788_v1 }
  0x14   : > { %s3836_s6 = scalar_lea.vmem %s4852_s1, %s3415_s28  ;;  %s3124_s10 = sshll.u32 %s4911_s22, 3 }
  0x15   : > { %s3846_s13 = scalar_lea.vmem %s4856_s5, %s3124_s10  ;;  %286 = sbr.rel (%p3125_p5) target bundleno = 28 (0x1c), region = 40 }
  0x1c PF: > { %v3851_v2 = vld [vmem:[%s4853_s2 + $0x4] ss:$16 sps:$4 sm:$0xff]   ;;  %v3856_v3 = vld [vmem:[%s4853_s2] ss:$16 sps:$4 sm:$0xff]   ;;  %v4857_v4 = vmov 0  }
  0x1d   : > { %535 = vmatprep.mubr.bf16.mxu0 %v4857_v4  ;;  %578 = vmatprep.mubr.bf16.mxu1 %v4857_v4  ;;  %v3864_v5 = vld [vmem:[%s4853_s2 + $0x24] ss:$16 sps:$4 sm:$0xff]   ;;  %v3870_v6 = vld [vmem:[%s4853_s2 + $0xc] ss:$16 sps:$4 sm:$0xff]   ;;  %v3875_v7 = vld [vmem:[%s4853_s2 + $0x20] ss:$16 sps:$4 sm:$0xff]  }
  0x1e   : > { %503 = vmatprep.subr.bf16.mxu0 %v3851_v2  ;;  %v3880_v8 = vld [vmem:[%s4853_s2 + $0x8] ss:$16 sps:$4 sm:$0xff]   ;;  %v3886_v9 = vld [vmem:[%s4853_s2 + $0x44] ss:$16 sps:$4 sm:$0xff]   ;;  %546 = vmatprep.subr.bf16.mxu1 %v3870_v6  ;;  %v3892_v10 = vld [vmem:[%s4853_s2 + $0x2c] ss:$16 sps:$4 sm:$0xff]  }
  0x1f   : > { %504 = vmatpush1.bf16.msra.mxu0 %v3856_v3  ;;  %547 = vmatpush1.bf16.msra.mxu1 %v3880_v8  ;;  %v3898_v11 = vld [vmem:[%s4853_s2 + $0x28] ss:$16 sps:$4 sm:$0xff]   ;;  %v3905_v12 = vld [vmem:[%s4853_s2 + $0x40] ss:$16 sps:$4 sm:$0xff]   ;;  %v3911_v13 = vld [vmem:[%s4853_s2 + $0x64] ss:$16 sps:$4 sm:$0xff]  }
  0x20   : > { %505 = vmatprep.subr.bf16.mxu0 %v3864_v5  ;;  %548 = vmatprep.subr.bf16.mxu1 %v3892_v10  ;;  %v3916_v14 = vld [vmem:[%s4853_s2 + $0x4c] ss:$16 sps:$4 sm:$0xff]   ;;  %v3922_v15 = vld [vmem:[%s4853_s2 + $0x48] ss:$16 sps:$4 sm:$0xff]   ;;  %v3929_v16 = vld [vmem:[%s4853_s2 + $0x60] ss:$16 sps:$4 sm:$0xff]  }
  0x21   : > { %v3934_v17 = vld [vmem:[%s4853_s2 + $0x6c] ss:$16 sps:$4 sm:$0xff]   ;;  %v3940_v18 = vld [vmem:[%s4853_s2 + $0x84] ss:$16 sps:$4 sm:$0xff]   ;;  %v3946_v19 = vld [vmem:[%s4853_s2 + $0x80] ss:$16 sps:$4 sm:$0xff]  }
  0x22   : > { %v3951_v20 = vld [vmem:[%s4853_s2 + $0x68] ss:$16 sps:$4 sm:$0xff]   ;;  %v3958_v21 = vld [vmem:[%s4853_s2 + $0x8c] ss:$16 sps:$4 sm:$0xff]   ;;  %v3964_v22 = vld [vmem:[%s4853_s2 + $0xa4] ss:$16 sps:$4 sm:$0xff]  }
  0x23   : > { %506 = vmatpush1.bf16.msra.mxu0 %v3875_v7  ;;  %549 = vmatpush1.bf16.msra.mxu1 %v3898_v11  ;;  %v3970_v23 = vld [vmem:[%s4853_s2 + $0x88] ss:$16 sps:$4 sm:$0xff]   ;;  %v3977_v24 = vld [vmem:[%s4853_s2 + $0xa0] ss:$16 sps:$4 sm:$0xff]   ;;  %v3982_v25 = vld [vmem:[%s4853_s2 + $0xac] ss:$16 sps:$4 sm:$0xff]  }
  0x24   : > { %507 = vmatprep.subr.bf16.mxu0 %v3886_v9  ;;  %550 = vmatprep.subr.bf16.mxu1 %v3916_v14  ;;  %v3988_v26 = vld [vmem:[%s4853_s2 + $0xc4] ss:$16 sps:$4 sm:$0xff]   ;;  %v3994_v27 = vld [vmem:[%s4853_s2 + $0xc0] ss:$16 sps:$4 sm:$0xff]   ;;  %v3999_v28 = vld [vmem:[%s4853_s2 + $0xa8] ss:$16 sps:$4 sm:$0xff]  }
  0x25   : > { %v4006_v29 = vld [vmem:[%s4853_s2 + $0xcc] ss:$16 sps:$4 sm:$0xff]   ;;  %v4012_v30 = vld [vmem:[%s4853_s2 + $0xe4] ss:$16 sps:$4 sm:$0xff]   ;;  %v4018_v31 = vld [vmem:[%s4853_s2 + $0xe0] ss:$16 sps:$4 sm:$0xff]  }
  0x26   : > { %v4023_v32 = vld [vmem:[%s4853_s2 + $0xc8] ss:$16 sps:$4 sm:$0xff]   ;;  %v4030_v33 = vld [vmem:[%s4853_s2 + $0xec] ss:$16 sps:$4 sm:$0xff]   ;;  %v4036_v34 = vld [vmem:[%s4854_s3 + $0x4] ss:$16 sps:$4 sm:$0xff]  }
  0x27   : > { %508 = vmatpush1.bf16.msra.mxu0 %v3905_v12  ;;  %551 = vmatpush1.bf16.msra.mxu1 %v3922_v15  ;;  %v293_v35 = vld [vmem:[#allocation2] sm:$0xff]  ;;  %v4047_v37 = vld [vmem:[%s4853_s2 + $0xe8] ss:$16 sps:$4 sm:$0xff]   ;;  %v4054_v38 = vld [vmem:[%s4854_s3 + $0xc] ss:$16 sps:$4 sm:$0xff]  }
  0x28   : > { %509 = vmatprep.subr.bf16.mxu0 %v3911_v13  ;;  %552 = vmatprep.subr.bf16.mxu1 %v3934_v17  ;;  %v4042_v36 = vld [vmem:[%s4854_s3] ss:$16 sps:$4 sm:$0xff]   ;;  %v4060_v39 = vld [vmem:[%s4854_s3 + $0x24] ss:$16 sps:$4 sm:$0xff]   ;;  %v4071_v41 = vld [vmem:[%s4854_s3 + $0x8] ss:$16 sps:$4 sm:$0xff]  }
  0x29   : > { %v4066_v40 = vld [vmem:[%s4854_s3 + $0x20] ss:$16 sps:$4 sm:$0xff]   ;;  %v4078_v42 = vld [vmem:[%s4854_s3 + $0x2c] ss:$16 sps:$4 sm:$0xff]   ;;  %v4084_v43 = vld [vmem:[%s4854_s3 + $0x44] ss:$16 sps:$4 sm:$0xff]  }
  0x2a   : > { %v4091_v44 = vld [vmem:[%s4854_s3 + $0x40] ss:$16 sps:$4 sm:$0xff]   ;;  %v4096_v45 = vld [vmem:[%s4854_s3 + $0x28] ss:$16 sps:$4 sm:$0xff]   ;;  %v4104_v46 = vld [vmem:[%s4854_s3 + $0x4c] ss:$16 sps:$4 sm:$0xff]  }
  0x2b   : > { %510 = vmatpush1.bf16.msra.mxu0 %v3929_v16  ;;  %553 = vmatpush1.bf16.msra.mxu1 %v3951_v20  ;;  %v4110_v47 = vld [vmem:[%s4854_s3 + $0x64] ss:$16 sps:$4 sm:$0xff]   ;;  %v4115_v48 = vld [vmem:[%s4854_s3 + $0x60] ss:$16 sps:$4 sm:$0xff]   ;;  %v4121_v49 = vld [vmem:[%s4854_s3 + $0x48] ss:$16 sps:$4 sm:$0xff]  }
  0x2c   : > { %511 = vmatprep.subr.bf16.mxu0 %v3940_v18  ;;  %554 = vmatprep.subr.bf16.mxu1 %v3958_v21  ;;  %v4128_v50 = vld [vmem:[%s4854_s3 + $0x84] ss:$16 sps:$4 sm:$0xff]   ;;  %v4133_v51 = vld [vmem:[%s4854_s3 + $0x6c] ss:$16 sps:$4 sm:$0xff]   ;;  %v4139_v52 = vld [vmem:[%s4854_s3 + $0x68] ss:$16 sps:$4 sm:$0xff]  }
  0x2d   : > { %v4144_v53 = vld [vmem:[%s4854_s3 + $0x80] ss:$16 sps:$4 sm:$0xff]   ;;  %v4149_v54 = vld [vmem:[%s4854_s3 + $0x8c] ss:$16 sps:$4 sm:$0xff]   ;;  %v4155_v55 = vld [vmem:[%s4854_s3 + $0xa4] ss:$16 sps:$4 sm:$0xff]  }
  0x2e   : > { %v4163_v56 = vld [vmem:[%s4854_s3 + $0x88] ss:$16 sps:$4 sm:$0xff]   ;;  %v4168_v57 = vld [vmem:[%s4854_s3 + $0xa0] ss:$16 sps:$4 sm:$0xff]   ;;  %v4173_v58 = vld [vmem:[%s4854_s3 + $0xac] ss:$16 sps:$4 sm:$0xff]  }
  0x2f   : > { %512 = vmatpush1.bf16.msra.mxu0 %v3946_v19  ;;  %555 = vmatpush1.bf16.msra.mxu1 %v3970_v23  ;;  %v4179_v59 = vld [vmem:[%s4854_s3 + $0xc4] ss:$16 sps:$4 sm:$0xff]   ;;  %v4187_v60 = vld [vmem:[%s4854_s3 + $0xa8] ss:$16 sps:$4 sm:$0xff]   ;;  %v4192_v61 = vld [vmem:[%s4854_s3 + $0xc0] ss:$16 sps:$4 sm:$0xff]  }
  0x30   : > { %513 = vmatprep.subr.bf16.mxu0 %v3964_v22  ;;  %556 = vmatprep.subr.bf16.mxu1 %v3982_v25  ;;  %4875 = vst [vmem:[#allocation6_spill] sm:$0xff] %v4179_v59  ;;  %v4197_v62 = vld [vmem:[%s4854_s3 + $0xcc] ss:$16 sps:$4 sm:$0xff]   ;;  %v4203_v63 = vld [vmem:[%s4854_s3 + $0xe4] ss:$16 sps:$4 sm:$0xff]  }
  0x31   : > { %4876 = vst [vmem:[#allocation7_spill] sm:$0xff] %v4203_v63  ;;  %v4211_v0 = vld [vmem:[%s4854_s3 + $0xc8] ss:$16 sps:$4 sm:$0xff]   ;;  %v4216_v1 = vld [vmem:[%s4854_s3 + $0xe0] ss:$16 sps:$4 sm:$0xff]  }
  0x33   : > { %514 = vmatpush1.bf16.msra.mxu0 %v3977_v24  ;;  %557 = vmatpush1.bf16.msra.mxu1 %v3999_v28 }
  0x34   : > { %515 = vmatprep.subr.bf16.mxu0 %v3988_v26  ;;  %558 = vmatprep.subr.bf16.mxu1 %v4006_v29 }
  0x37   : > { %516 = vmatpush1.bf16.msra.mxu0 %v3994_v27  ;;  %559 = vmatpush1.bf16.msra.mxu1 %v4023_v32 }
  0x38   : > { %517 = vmatprep.subr.bf16.mxu0 %v4012_v30  ;;  %560 = vmatprep.subr.bf16.mxu1 %v4030_v33 }
  0x3b   : > { %518 = vmatpush1.bf16.msra.mxu0 %v4018_v31  ;;  %561 = vmatpush1.bf16.msra.mxu1 %v4047_v37 }
  0x3c   : > { %802 = vmatprep.subr.bf16.mxu0 %v4036_v34  ;;  %845 = vmatprep.subr.bf16.mxu1 %v4054_v38 }
  0x3e   : > { %536 = vmatmul.mubr.bf16.vlgmr.msra.gmra.mrb[0].mxu0 %v293_v35  ;;  %579 = vmatmul.mubr.bf16.vlgmr.msra.gmra.mrb[0].mxu1 %v293_v35  ;;  %v4221_v35 = vld [vmem:[%s4854_s3 + $0xec] ss:$16 sps:$4 sm:$0xff]  }
  0x3f   : > { %803 = vmatpush1.bf16.msra.mxu0 %v4042_v36  ;;  %834 = vmatprep.mubr.bf16.mxu0 %v4857_v4 }
  0x40   : > { %804 = vmatprep.subr.bf16.mxu0 %v4060_v39  ;;  %846 = vmatpush1.bf16.msra.mxu1 %v4071_v41 }
  0x41   : > { %877 = vmatprep.mubr.bf16.mxu1 %v4857_v4  ;;  %847 = vmatprep.subr.bf16.mxu1 %v4078_v42  ;;  %v4230_v4 = vld [vmem:[%s4854_s3 + $0xe8] ss:$16 sps:$4 sm:$0xff]  }
  0x43   : > { %805 = vmatpush1.bf16.msra.mxu0 %v4066_v40 }
  0x44   : > { %806 = vmatprep.subr.bf16.mxu0 %v4084_v43  ;;  %848 = vmatpush1.bf16.msra.mxu1 %v4096_v45 }
  0x45   : > { %849 = vmatprep.subr.bf16.mxu1 %v4104_v46 }
  0x47   : > { %807 = vmatpush1.bf16.msra.mxu0 %v4091_v44 }
  0x48   : > { %808 = vmatprep.subr.bf16.mxu0 %v4110_v47  ;;  %850 = vmatpush1.bf16.msra.mxu1 %v4121_v49 }
  0x49   : > { %851 = vmatprep.subr.bf16.mxu1 %v4133_v51 }
  0x4b   : > { %809 = vmatpush1.bf16.msra.mxu0 %v4115_v48 }
  0x4c   : > { %810 = vmatprep.subr.bf16.mxu0 %v4128_v50  ;;  %852 = vmatpush1.bf16.msra.mxu1 %v4139_v52 }
  0x4d   : > { %853 = vmatprep.subr.bf16.mxu1 %v4149_v54 }
  0x4f   : > { %811 = vmatpush1.bf16.msra.mxu0 %v4144_v53 }
  0x50   : > { %812 = vmatprep.subr.bf16.mxu0 %v4155_v55  ;;  %854 = vmatpush1.bf16.msra.mxu1 %v4163_v56 }
  0x51   : > { %855 = vmatprep.subr.bf16.mxu1 %v4173_v58 }
  0x53   : > { %813 = vmatpush1.bf16.msra.mxu0 %v4168_v57 }
  0x54   : > { %814 = vmatprep.subr.bf16.mxu0 %v4179_v59  ;;  %856 = vmatpush1.bf16.msra.mxu1 %v4187_v60  ;;  %v296_v59 = vld [vmem:[#allocation4] sm:$0xff] }
  0x55   : > { %857 = vmatprep.subr.bf16.mxu1 %v4197_v62 }
  0x57   : > { %815 = vmatpush1.bf16.msra.mxu0 %v4192_v61 }
  0x58   : > { %816 = vmatprep.subr.bf16.mxu0 %v4203_v63  ;;  %858 = vmatpush1.bf16.msra.mxu1 %v4211_v0  ;;  %v4877_v63 = vmov 0  }
  0x59   : > { %859 = vmatprep.subr.bf16.mxu1 %v4221_v35 }
  0x5b   : > { %817 = vmatpush1.bf16.msra.mxu0 %v4216_v1 }
  0x5c   : > { %1178 = vmatprep.subr.bf16.mxu0 %v3851_v2  ;;  %860 = vmatpush1.bf16.msra.mxu1 %v4230_v4  ;;  %v299_v2 = vld [vmem:[%s3831_s27] sm:$0xff] }
  0x5d   : > { %1221 = vmatprep.subr.bf16.mxu1 %v3870_v6  ;;  %v304_v6 = vunpack.c.h.bf16 %v299_v2 }
  0x5e   : > { %835 = vmatmul.mubr.bf16.vlgmr.msra.gmra.mrb[4].mxu0 %v296_v59 }
  0x5f   : > { %1179 = vmatpush1.bf16.msra.mxu0 %v3856_v3  ;;  %1210 = vmatprep.mubr.bf16.mxu0 %v4877_v63  ;;  %v301_v3 = vld [vmem:[%s3831_s27 + $0x10] sm:$0xff] }
  0x60   : > { %1180 = vmatprep.subr.bf16.mxu0 %v3864_v5  ;;  %878 = vmatmul.mubr.bf16.vlgmr.msra.gmra.mrb[4].mxu1 %v296_v59  ;;  %v303_v5 = vunpack.c.l.bf16 %v299_v2 }
  0x61   : > { %1222 = vmatpush1.bf16.msra.mxu1 %v3880_v8  ;;  %1253 = vmatprep.mubr.bf16.mxu1 %v4877_v63  ;;  %v307_v8 = vunpack.c.l.bf16 %v301_v3 }
  0x62   : > { %1223 = vmatprep.subr.bf16.mxu1 %v3892_v10  ;;  %v308_v10 = vunpack.c.h.bf16 %v301_v3 }
  0x63   : > { %1181 = vmatpush1.bf16.msra.mxu0 %v3875_v7  ;;  %v300_v7 = vld [vmem:[%s3831_s27 + $0x8] sm:$0xff] }
  0x64   : > { %1182 = vmatprep.subr.bf16.mxu0 %v3886_v9 }
  0x65   : > { %1224 = vmatpush1.bf16.msra.mxu1 %v3898_v11  ;;  %v302_v11 = vld [vmem:[%s3831_s27 + $0x18] sm:$0xff] }
  0x66   : > { %1225 = vmatprep.subr.bf16.mxu1 %v3916_v14  ;;  %v305_v14 = vunpack.c.l.bf16 %v300_v7 }
  0x67   : > { %1183 = vmatpush1.bf16.msra.mxu0 %v3905_v12 }
  0x68   : > { %1184 = vmatprep.subr.bf16.mxu0 %v3911_v13 }
  0x69   : > { %1226 = vmatpush1.bf16.msra.mxu1 %v3922_v15 }
  0x6a   : > { %1227 = vmatprep.subr.bf16.mxu1 %v3934_v17 }
  0x6b   : > { %1185 = vmatpush1.bf16.msra.mxu0 %v3929_v16 }
  0x6c   : > { %1186 = vmatprep.subr.bf16.mxu0 %v3940_v18 }
  0x6d   : > { %1228 = vmatpush1.bf16.msra.mxu1 %v3951_v20 }
  0x6e   : > { %1229 = vmatprep.subr.bf16.mxu1 %v3958_v21  ;;  %v309_v21 = vunpack.c.l.bf16 %v302_v11 }
  0x6f   : > { %1187 = vmatpush1.bf16.msra.mxu0 %v3946_v19 }
  0x70   : > { %1188 = vmatprep.subr.bf16.mxu0 %v3964_v22 }
  0x71   : > { %1230 = vmatpush1.bf16.msra.mxu1 %v3970_v23 }
  0x72   : > { %1231 = vmatprep.subr.bf16.mxu1 %v3982_v25 }
  0x73   : > { %1189 = vmatpush1.bf16.msra.mxu0 %v3977_v24 }
  0x74   : > { %1190 = vmatprep.subr.bf16.mxu0 %v3988_v26 }
  0x75   : > { %1232 = vmatpush1.bf16.msra.mxu1 %v3999_v28 }
  0x76   : > { %1233 = vmatprep.subr.bf16.mxu1 %v4006_v29  ;;  %v306_v29 = vunpack.c.h.bf16 %v300_v7 }
  0x77   : > { %1191 = vmatpush1.bf16.msra.mxu0 %v3994_v27 }
  0x78   : > { %1192 = vmatprep.subr.bf16.mxu0 %v4012_v30 }
  0x79   : > { %1234 = vmatpush1.bf16.msra.mxu1 %v4023_v32  ;;  %v310_v32 = vunpack.c.h.bf16 %v302_v11 }
  0x7a   : > { %1235 = vmatprep.subr.bf16.mxu1 %v4030_v33 }
  0x7b   : > { %1193 = vmatpush1.bf16.msra.mxu0 %v4018_v31 }
  0x7c   : > { %1477 = vmatprep.subr.bf16.mxu0 %v4036_v34 }
  0x7d   : > { %1236 = vmatpush1.bf16.msra.mxu1 %v4047_v37 }
  0x7e   : > { %1520 = vmatprep.subr.bf16.mxu1 %v4054_v38 }
 0x111   : > { %v537_v9 = vpop.f32.mrb[0].mxu0  ;;  %v580_v20 = vpop.f32.mrb[0].mxu1 }
 0x112   : > { %v589_v12 = vadd.f32 %v537_v9, %v303_v5  ;;  %v539_v13 = vpop.f32.mrb[1].mxu0  ;;  %v582_v24 = vpop.f32.mrb[1].mxu1  ;;  %v591_v26 = vadd.f32 %v580_v20, %v305_v14 }
 0x113   : > { %v590_v15 = vadd.f32 %v539_v13, %v304_v6  ;;  %v541_v16 = vpop.f32.mrb[2].mxu0  ;;  %v584_v27 = vpop.f32.mrb[2].mxu1  ;;  %v592_v33 = vadd.f32 %v582_v24, %v306_v29  ;;  %v3158_v24 = vld [vmem:[%s3836_s6 + $0x60] sm:$0xff] }
 0x114   : > { %v896_v17 = vmul.f32 0.5, %v589_v12  ;;  %v593_v18 = vadd.f32 %v541_v16, %v307_v8  ;;  %v543_v19 = vpop.f32.mrb[3].mxu0  ;;  %v586_v30 = vpop.f32.mrb[3].mxu1  ;;  %v595_v31 = vadd.f32 %v584_v27, %v309_v21  ;;  %v603_v29 = vunpack.c.h.bf16 %v3158_v24 }
 0x115   : > { %v904_v22 = vmul.f32 0.5, %v590_v15  ;;  %v594_v23 = vadd.f32 %v543_v19, %v308_v10  ;;  %v596_v34 = vadd.f32 %v586_v30, %v310_v32  ;;  %v914_v37 = vmul.f32 0.5, %v592_v33  ;;  %v294_v10 = vld [vmem:[#allocation3] sm:$0xff]  ;;  %v295_v15 = vld [vmem:[#allocation3 + $0x8] sm:$0xff] }
 0x116   : > { %3619 = vtanh.f32 %v896_v17  ;;  %v897_v25 = vmul.f32 0.5, %v593_v18  ;;  %v3159_v30 = vld [vmem:[%s3836_s6 + $0x68] sm:$0xff] }
 0x117   : > { %3621 = vtanh.f32 %v904_v22  ;;  %v905_v28 = vmul.f32 0.5, %v594_v23  ;;  %v915_v59 = vmul.f32 0.5, %v596_v34 }
 0x118   : > { %3623 = vtanh.f32 %v897_v25 }
 0x119   : > { %3625 = vtanh.f32 %v905_v28  ;;  %v602_v28 = vunpack.c.l.bf16 %v3158_v24 }
 0x11a   : > { %3627 = vtanh.f32 %v591_v26  ;;  %v3160_v26 = vld [vmem:[%s3836_s6 + $0x70] sm:$0xff] }
 0x11b   : > { %3629 = vtanh.f32 %v595_v31  ;;  %v606_v31 = vunpack.c.l.bf16 %v3160_v26 }
 0x11c   : > { %3631 = vtanh.f32 %v914_v37  ;;  %v607_v37 = vunpack.c.h.bf16 %v3160_v26 }
 0x11d   : > { %3633 = vtanh.f32 %v915_v59 }
 0x120   : > { %v3620_v38 = vpop.eup %3619 }
 0x121   : > { %v3622_v2 = vpop.eup %3621  ;;  %v900_v3 = vmul.f32 0.5, %v3620_v38  ;;  %v3161_v38 = vld [vmem:[%s3836_s6 + $0x78] sm:$0xff] }
 0x122   : > { %v3624_v5 = vpop.eup %3623  ;;  %v908_v6 = vmul.f32 0.5, %v3622_v2 }
 0x123   : > { %v3626_v8 = vpop.eup %3625  ;;  %v902_v9 = vadd.f32 0.5, %v900_v3  ;;  %v901_v7 = vmul.f32 0.5, %v3624_v5  ;;  %v604_v3 = vunpack.c.l.bf16 %v3159_v30 }
 0x124   : > { %v3628_v12 = vpop.eup %3627  ;;  %v910_v11 = vadd.f32 0.5, %v908_v6  ;;  %v909_v13 = vmul.f32 0.5, %v3626_v8 }
 0x125   : > { %v903_v14 = vadd.f32 0.5, %v901_v7  ;;  %v924_v16 = vmul.f32 %v3628_v12, %v902_v9  ;;  %v3630_v17 = vpop.eup %3629 }
 0x126   : > { %v922_v18 = vmul.f32 %v910_v11, %v294_v10  ;;  %v911_v19 = vadd.f32 0.5, %v909_v13  ;;  %v3632_v25 = vpop.eup %3631  ;;  %v608_v11 = vunpack.c.l.bf16 %v3161_v38 }
 0x127   : > { %v925_v20 = vmul.f32 %v3630_v17, %v903_v14  ;;  %v3634_v27 = vpop.eup %3633  ;;  %v918_v32 = vmul.f32 0.5, %v3632_v25 }
 0x128   : > { %v923_v21 = vmul.f32 %v911_v19, %v295_v15  ;;  %v4276_v22 = vadd.f32 %v924_v16, %v922_v18  ;;  %v919_v33 = vmul.f32 0.5, %v3634_v27 }
 0x129   : > { %v920_v13 = vadd.f32 0.5, %v918_v32 }
 0x12a   : > { %3635 = vtanh.f32 %v4276_v22  ;;  %v4279_v23 = vadd.f32 %v925_v20, %v923_v21  ;;  %v921_v14 = vadd.f32 0.5, %v919_v33  ;;  %v605_v21 = vunpack.c.h.bf16 %v3159_v30 }
 0x12c   : > { %3637 = vtanh.f32 %v4279_v23 }
 0x131   : > { %v836_v34 = vpop.f32.mrb[4].mxu0 }
 0x132   : > { %v888_v59 = vadd.f32 %v836_v34, %v602_v28  ;;  %v838_v2 = vpop.f32.mrb[5].mxu0 }
 0x133   : > { %v889_v5 = vadd.f32 %v838_v2, %v603_v29  ;;  %v840_v6 = vpop.f32.mrb[6].mxu0  ;;  %v879_v12 = vpop.f32.mrb[4].mxu1 }
 0x134   : > { %v3636_v8 = vpop.eup %3635  ;;  %v933_v9 = vmul.f32 0.5, %v888_v59  ;;  %v892_v10 = vadd.f32 %v840_v6, %v606_v31  ;;  %v842_v7 = vpop.f32.mrb[7].mxu0  ;;  %v890_v20 = vadd.f32 %v879_v12, %v604_v3  ;;  %v609_v31 = vunpack.c.h.bf16 %v3161_v38  ;;  %v297_v3 = vld [vmem:[#allocation5] sm:$0xff] }
 0x135   : > { %v941_v15 = vmul.f32 0.5, %v889_v5  ;;  %v893_v16 = vadd.f32 %v842_v7, %v607_v37  ;;  %v881_v17 = vpop.f32.mrb[5].mxu1  ;;  %v930_v25 = vmul.f32 %v3636_v8, %v920_v13 }
 0x136   : > { %v3638_v18 = vpop.eup %3637  ;;  %3639 = vtanh.f32 %v933_v9  ;;  %v934_v19 = vmul.f32 0.5, %v892_v10  ;;  %v883_v24 = vpop.f32.mrb[6].mxu1  ;;  %v891_v33 = vadd.f32 %v881_v17, %v605_v21  ;;  %v4384_v17 = vld [vmem:[%s4853_s2 + $0x4c] ss:$16 sps:$4 sm:$0xff]  }
 0x137   : > { %v931_v26 = vmul.f32 %v3638_v18, %v921_v14  ;;  %3641 = vtanh.f32 %v941_v15  ;;  %v942_v27 = vmul.f32 0.5, %v893_v16  ;;  %v885_v28 = vpop.f32.mrb[7].mxu1  ;;  %v894_v29 = vadd.f32 %v883_v24, %v608_v11  ;;  %v4365_v14 = vld [vmem:[%s4853_s2 + $0x20] ss:$16 sps:$4 sm:$0xff]   ;;  %v4370_v15 = vld [vmem:[%s4853_s2 + $0x28] ss:$16 sps:$4 sm:$0xff]  }
 0x138   : > { %3643 = vtanh.f32 %v934_v19  ;;  %v895_v34 = vadd.f32 %v885_v28, %v609_v31  ;;  %v951_v30 = vmul.f32 0.5, %v891_v33  ;;  %v4379_v16 = vld [vmem:[%s4853_s2 + $0x44] ss:$16 sps:$4 sm:$0xff]   ;;  %v4389_v18 = vld [vmem:[%s4853_s2 + $0x40] ss:$16 sps:$4 sm:$0xff]  }
 0x139   : > { %3645 = vtanh.f32 %v942_v27  ;;  %v932_v32 = vpack.c.bf16 %v931_v26, %v930_v25  ;;  %v4394_v19 = vld [vmem:[%s4853_s2 + $0x48] ss:$16 sps:$4 sm:$0xff]   ;;  %v4408_v21 = vld [vmem:[%s4853_s2 + $0x6c] ss:$16 sps:$4 sm:$0xff]   ;;  %v4413_v24 = vld [vmem:[%s4853_s2 + $0x60] ss:$16 sps:$4 sm:$0xff]  }
 0x13a   : > { %3647 = vtanh.f32 %v890_v20  ;;  %v952_v38 = vmul.f32 0.5, %v895_v34  ;;  %v4403_v20 = vld [vmem:[%s4853_s2 + $0x64] ss:$16 sps:$4 sm:$0xff]   ;;  %v4418_v25 = vld [vmem:[%s4853_s2 + $0x68] ss:$16 sps:$4 sm:$0xff]  }
 0x13b   : > { %970 = vst [vmem:[%s3841_s9] sm:$0xff] %v932_v32  ;;  %1211 = vmatmul.mubr.bf16.vlgmr.msra.gmra.mrb[8].mxu0 %v932_v32  ;;  %1254 = vmatmul.mubr.bf16.vlgmr.msra.gmra.mrb[8].mxu1 %v932_v32  ;;  %3649 = vtanh.f32 %v894_v29  ;;  %v4427_v26 = vld [vmem:[%s4853_s2 + $0x84] ss:$16 sps:$4 sm:$0xff]   ;;  %v4432_v27 = vld [vmem:[%s4853_s2 + $0x8c] ss:$16 sps:$4 sm:$0xff]   ;;  %v4437_v28 = vld [vmem:[%s4853_s2 + $0x80] ss:$16 sps:$4 sm:$0xff]  }
 0x13c   : > { %1478 = vmatpush1.bf16.msra.mxu0 %v4042_v36  ;;  %1521 = vmatpush1.bf16.msra.mxu1 %v4071_v41  ;;  %3651 = vtanh.f32 %v951_v30  ;;  %v4442_v29 = vld [vmem:[%s4853_s2 + $0x88] ss:$16 sps:$4 sm:$0xff]   ;;  %v4451_v31 = vld [vmem:[%s4853_s2 + $0xa4] ss:$16 sps:$4 sm:$0xff]   ;;  %v4456_v32 = vld [vmem:[%s4853_s2 + $0xac] ss:$16 sps:$4 sm:$0xff]  }
 0x13d   : > { %1479 = vmatprep.subr.bf16.mxu0 %v4060_v39  ;;  %1522 = vmatprep.subr.bf16.mxu1 %v4078_v42  ;;  %3653 = vtanh.f32 %v952_v38  ;;  %v4461_v33 = vld [vmem:[%s4853_s2 + $0xa0] ss:$16 sps:$4 sm:$0xff]   ;;  %v4466_v34 = vld [vmem:[%s4853_s2 + $0xa8] ss:$16 sps:$4 sm:$0xff]   ;;  %v4475_v30 = vld [vmem:[%s4853_s2 + $0xc4] ss:$16 sps:$4 sm:$0xff]  }
 0x13e   : > { %1509 = vmatprep.mubr.bf16.mxu0 %v4877_v63  ;;  %1552 = vmatprep.mubr.bf16.mxu1 %v4877_v63  ;;  %v4485_v38 = vld [vmem:[%s4853_s2 + $0xc8] ss:$16 sps:$4 sm:$0xff]  }
 0x140   : > { %v3640_v37 = vpop.eup %3639  ;;  %1480 = vmatpush1.bf16.msra.mxu0 %v4066_v40  ;;  %1523 = vmatpush1.bf16.msra.mxu1 %v4096_v45  ;;  %v298_v45 = vld [vmem:[#allocation5 + $0x8] sm:$0xff] }
 0x141   : > { %v3642_v59 = vpop.eup %3641  ;;  %v937_v2 = vmul.f32 0.5, %v3640_v37  ;;  %1481 = vmatprep.subr.bf16.mxu0 %v4084_v43  ;;  %1524 = vmatprep.subr.bf16.mxu1 %v4104_v46  ;;  %v4480_v37 = vld [vmem:[%s4853_s2 + $0xc0] ss:$16 sps:$4 sm:$0xff]  }
 0x142   : > { %v3644_v36 = vpop.eup %3643  ;;  %v945_v39 = vmul.f32 0.5, %v3642_v59  ;;  %v4490_v59 = vld [vmem:[%s4853_s2 + $0xcc] ss:$16 sps:$4 sm:$0xff]  }
 0x143   : > { %v3646_v41 = vpop.eup %3645  ;;  %v939_v42 = vadd.f32 0.5, %v937_v2  ;;  %v938_v5 = vmul.f32 0.5, %v3644_v36  ;;  %v4499_v2 = vld [vmem:[%s4853_s2 + $0xe4] ss:$16 sps:$4 sm:$0xff]   ;;  %v4504_v36 = vld [vmem:[%s4853_s2 + $0xec] ss:$16 sps:$4 sm:$0xff]  }
 0x144   : > { %v3648_v6 = vpop.eup %3647  ;;  %v947_v8 = vadd.f32 0.5, %v945_v39  ;;  %v946_v9 = vmul.f32 0.5, %v3646_v41  ;;  %1482 = vmatpush1.bf16.msra.mxu0 %v4091_v44  ;;  %1525 = vmatpush1.bf16.msra.mxu1 %v4121_v49  ;;  %v4509_v39 = vld [vmem:[%s4853_s2 + $0xe0] ss:$16 sps:$4 sm:$0xff]   ;;  %v4514_v41 = vld [vmem:[%s4853_s2 + $0xe8] ss:$16 sps:$4 sm:$0xff]  }
 0x145   : > { %v940_v40 = vadd.f32 0.5, %v938_v5  ;;  %v961_v43 = vmul.f32 %v3648_v6, %v939_v42  ;;  %1483 = vmatprep.subr.bf16.mxu0 %v4110_v47  ;;  %1526 = vmatprep.subr.bf16.mxu1 %v4133_v51  ;;  %v3650_v46 = vpop.eup %3649  ;;  %v4878_v51 = vld [vmem:[#allocation6_spill] sm:$0xff]  ;;  %v3195_v5 = vld [vmem:[%s3831_s27 + $0x20] sm:$0xff] }
 0x146   : > { %v959_v10 = vmul.f32 %v947_v8, %v297_v3  ;;  %v948_v7 = vadd.f32 0.5, %v946_v9  ;;  %v3652_v47 = vpop.eup %3651  ;;  %4880 = vst [vmem:[#allocation6_spill] sm:$0xff] %v4514_v41  ;;  %v4523_v42 = vld [vmem:[%s4854_s3 + $0x4] ss:$16 sps:$4 sm:$0xff]   ;;  %v4528_v3 = vld [vmem:[%s4854_s3 + $0xc] ss:$16 sps:$4 sm:$0xff]   ;;  %v978_v8 = vunpack.c.l.bf16 %v3195_v5 }
 0x147   : > { %v962_v12 = vmul.f32 %v3650_v46, %v940_v40  ;;  %v955_v49 = vmul.f32 0.5, %v3652_v47  ;;  %4882 = vst [vmem:[#allocation8_spill] sm:$0xff] %v4528_v3  ;;  %v3197_v6 = vld [vmem:[%s3831_s27 + $0x30] sm:$0xff]  ;;  %v3196_v9 = vld [vmem:[%s3831_s27 + $0x28] sm:$0xff]  ;;  %v979_v40 = vunpack.c.h.bf16 %v3195_v5 }
 0x148   : > { %v960_v11 = vmul.f32 %v948_v7, %v298_v45  ;;  %v4301_v13 = vadd.f32 %v961_v43, %v959_v10  ;;  %1484 = vmatpush1.bf16.msra.mxu0 %v4115_v48  ;;  %1527 = vmatpush1.bf16.msra.mxu1 %v4139_v52  ;;  %v3654_v48 = vpop.eup %3653  ;;  %v982_v45 = vunpack.c.l.bf16 %v3197_v6  ;;  %v983_v10 = vunpack.c.h.bf16 %v3197_v6 }
 0x149   : > { %1485 = vmatprep.subr.bf16.mxu0 %v4128_v50  ;;  %1528 = vmatprep.subr.bf16.mxu1 %v4149_v54  ;;  %v956_v50 = vmul.f32 0.5, %v3654_v48  ;;  %v3198_v48 = vld [vmem:[%s3831_s27 + $0x38] sm:$0xff] }
 0x14a   : > { %3655 = vtanh.f32 %v4301_v13  ;;  %v4308_v44 = vadd.f32 %v962_v12, %v960_v11  ;;  %v980_v12 = vunpack.c.l.bf16 %v3196_v9 }
 0x14b   : > { %v958_v54 = vadd.f32 0.5, %v956_v50 }
 0x14c   : > { %3657 = vtanh.f32 %v4308_v44  ;;  %1486 = vmatpush1.bf16.msra.mxu0 %v4144_v53  ;;  %1529 = vmatpush1.bf16.msra.mxu1 %v4163_v56  ;;  %v957_v53 = vadd.f32 0.5, %v955_v49 }
 0x14d   : > { %1487 = vmatprep.subr.bf16.mxu0 %v4155_v55  ;;  %1530 = vmatprep.subr.bf16.mxu1 %v4173_v58  ;;  %v4879_v55 = vld [vmem:[#allocation7_spill] sm:$0xff] }
 0x14e   : > { %4881 = vst [vmem:[#allocation7_spill] sm:$0xff] %v4523_v42 }
 0x150   : > { %1488 = vmatpush1.bf16.msra.mxu0 %v4168_v57  ;;  %1531 = vmatpush1.bf16.msra.mxu1 %v4187_v60 }
 0x151   : > { %1489 = vmatprep.subr.bf16.mxu0 %v4878_v51  ;;  %1532 = vmatprep.subr.bf16.mxu1 %v4197_v62  ;;  %v4336_v62 = vld [vmem:[%s4853_s2 + $0xc] ss:$16 sps:$4 sm:$0xff]  }
 0x154   : > { %v3656_v52 = vpop.eup %3655  ;;  %1490 = vmatpush1.bf16.msra.mxu0 %v4192_v61  ;;  %1533 = vmatpush1.bf16.msra.mxu1 %v4211_v0  ;;  %v4331_v61 = vld [vmem:[%s4853_s2 + $0x4] ss:$16 sps:$4 sm:$0xff]   ;;  %v4346_v0 = vld [vmem:[%s4853_s2 + $0x8] ss:$16 sps:$4 sm:$0xff]  }
 0x155   : > { %1491 = vmatprep.subr.bf16.mxu0 %v4879_v55  ;;  %1534 = vmatprep.subr.bf16.mxu1 %v4221_v35  ;;  %v967_v57 = vmul.f32 %v3656_v52, %v957_v53  ;;  %v4360_v35 = vld [vmem:[%s4853_s2 + $0x2c] ss:$16 sps:$4 sm:$0xff]  }
 0x156   : > { %v3658_v56 = vpop.eup %3657 }
 0x157   : > { %v968_v58 = vmul.f32 %v3658_v56, %v958_v54 }
 0x158   : > { %1492 = vmatpush1.bf16.msra.mxu0 %v4216_v1  ;;  %1535 = vmatpush1.bf16.msra.mxu1 %v4230_v4  ;;  %v4341_v4 = vld [vmem:[%s4853_s2] ss:$16 sps:$4 sm:$0xff]   ;;  %v4355_v1 = vld [vmem:[%s4853_s2 + $0x24] ss:$16 sps:$4 sm:$0xff]  }
 0x159   : > { %v969_v60 = vpack.c.bf16 %v968_v58, %v967_v57  ;;  %1854 = vmatprep.subr.bf16.mxu0 %v4331_v61  ;;  %1897 = vmatprep.subr.bf16.mxu1 %v4336_v62  ;;  %v984_v57 = vunpack.c.l.bf16 %v3198_v48 }
 0x15b   : > { %3194 = vst [vmem:[%s3846_s13 + $0x18] sm:$0xff] %v969_v60  ;;  %1510 = vmatmul.mubr.bf16.vlgmr.msra.gmra.mrb[12].mxu0 %v969_v60  ;;  %1553 = vmatmul.mubr.bf16.vlgmr.msra.gmra.mrb[12].mxu1 %v969_v60 }
 0x15c   : > { %1886 = vmatprep.mubr.bf16.mxu0 %v4877_v63  ;;  %1929 = vmatprep.mubr.bf16.mxu1 %v4877_v63 }
 0x15d   : > { %1855 = vmatpush1.bf16.msra.mxu0 %v4341_v4  ;;  %1898 = vmatpush1.bf16.msra.mxu1 %v4346_v0 }
 0x15e   : > { %1856 = vmatprep.subr.bf16.mxu0 %v4355_v1  ;;  %1899 = vmatprep.subr.bf16.mxu1 %v4360_v35 }
 0x161   : > { %1857 = vmatpush1.bf16.msra.mxu0 %v4365_v14  ;;  %1900 = vmatpush1.bf16.msra.mxu1 %v4370_v15 }
 0x162   : > { %1858 = vmatprep.subr.bf16.mxu0 %v4379_v16  ;;  %1901 = vmatprep.subr.bf16.mxu1 %v4384_v17 }
 0x165   : > { %1859 = vmatpush1.bf16.msra.mxu0 %v4389_v18  ;;  %1902 = vmatpush1.bf16.msra.mxu1 %v4394_v19 }
 0x166   : > { %1860 = vmatprep.subr.bf16.mxu0 %v4403_v20  ;;  %1903 = vmatprep.subr.bf16.mxu1 %v4408_v21 }
 0x169   : > { %1861 = vmatpush1.bf16.msra.mxu0 %v4413_v24  ;;  %1904 = vmatpush1.bf16.msra.mxu1 %v4418_v25 }
 0x16a   : > { %1862 = vmatprep.subr.bf16.mxu0 %v4427_v26  ;;  %1905 = vmatprep.subr.bf16.mxu1 %v4432_v27 }
 0x16d   : > { %1863 = vmatpush1.bf16.msra.mxu0 %v4437_v28  ;;  %1906 = vmatpush1.bf16.msra.mxu1 %v4442_v29 }
 0x16e   : > { %1864 = vmatprep.subr.bf16.mxu0 %v4451_v31  ;;  %1907 = vmatprep.subr.bf16.mxu1 %v4456_v32 }
 0x171   : > { %1865 = vmatpush1.bf16.msra.mxu0 %v4461_v33  ;;  %1908 = vmatpush1.bf16.msra.mxu1 %v4466_v34 }
 0x172   : > { %1866 = vmatprep.subr.bf16.mxu0 %v4475_v30  ;;  %1909 = vmatprep.subr.bf16.mxu1 %v4490_v59 }
 0x175   : > { %1867 = vmatpush1.bf16.msra.mxu0 %v4480_v37  ;;  %1910 = vmatpush1.bf16.msra.mxu1 %v4485_v38 }
 0x176   : > { %1868 = vmatprep.subr.bf16.mxu0 %v4499_v2  ;;  %1911 = vmatprep.subr.bf16.mxu1 %v4504_v36 }
 0x179   : > { %1869 = vmatpush1.bf16.msra.mxu0 %v4509_v39  ;;  %1912 = vmatpush1.bf16.msra.mxu1 %v4514_v41 }
 0x17a   : > { %2153 = vmatprep.subr.bf16.mxu0 %v4523_v42  ;;  %2196 = vmatprep.subr.bf16.mxu1 %v4528_v3  ;;  %v985_v3 = vunpack.c.h.bf16 %v3198_v48 }
 0x20e   : > { %v1212_v43 = vpop.f32.mrb[8].mxu0  ;;  %v1255_v46 = vpop.f32.mrb[8].mxu1 }
 0x20f   : > { %v1264_v7 = vadd.f32 %v1212_v43, %v978_v8  ;;  %v1214_v11 = vpop.f32.mrb[9].mxu0  ;;  %v1257_v47 = vpop.f32.mrb[9].mxu1  ;;  %v1266_v60 = vadd.f32 %v1255_v46, %v980_v12  ;;  %v981_v8 = vunpack.c.h.bf16 %v3196_v9 }
 0x210   : > { %v1265_v49 = vadd.f32 %v1214_v11, %v979_v40  ;;  %v1216_v50 = vpop.f32.mrb[10].mxu0  ;;  %v1259_v51 = vpop.f32.mrb[10].mxu1 }
 0x211   : > { %v1571_v52 = vmul.f32 0.5, %v1264_v7  ;;  %v1268_v53 = vadd.f32 %v1216_v50, %v982_v45  ;;  %v1218_v54 = vpop.f32.mrb[11].mxu0  ;;  %v1261_v55 = vpop.f32.mrb[11].mxu1  ;;  %v1270_v43 = vadd.f32 %v1259_v51, %v984_v57  ;;  %v1267_v40 = vadd.f32 %v1257_v47, %v981_v8 }
 0x212   : > { %v1579_v56 = vmul.f32 0.5, %v1265_v49  ;;  %v1269_v58 = vadd.f32 %v1218_v54, %v983_v10  ;;  %v1271_v7 = vadd.f32 %v1261_v55, %v985_v3 }
 0x213   : > { %3659 = vtanh.f32 %v1571_v52  ;;  %v1572_v5 = vmul.f32 0.5, %v1268_v53  ;;  %v1589_v49 = vmul.f32 0.5, %v1267_v40 }
 0x214   : > { %3661 = vtanh.f32 %v1579_v56  ;;  %v1580_v6 = vmul.f32 0.5, %v1269_v58  ;;  %v1590_v10 = vmul.f32 0.5, %v1271_v7 }
 0x215   : > { %3663 = vtanh.f32 %v1572_v5  ;;  %v3231_v5 = vld [vmem:[%s3836_s6 + $0x40] sm:$0xff] }
 0x216   : > { %3665 = vtanh.f32 %v1266_v60  ;;  %v1278_v40 = vunpack.c.h.bf16 %v3231_v5 }
 0x217   : > { %3667 = vtanh.f32 %v1580_v6  ;;  %v3233_v6 = vld [vmem:[%s3836_s6 + $0x50] sm:$0xff] }
 0x218   : > { %3669 = vtanh.f32 %v1270_v43  ;;  %v3232_v43 = vld [vmem:[%s3836_s6 + $0x48] sm:$0xff] }
 0x219   : > { %3671 = vtanh.f32 %v1589_v49  ;;  %v1282_v49 = vunpack.c.h.bf16 %v3233_v6 }
 0x21a   : > { %3673 = vtanh.f32 %v1590_v10 }
 0x21d   : > { %v3660_v45 = vpop.eup %3659 }
 0x21e   : > { %v3662_v11 = vpop.eup %3661  ;;  %v1575_v50 = vmul.f32 0.5, %v3660_v45  ;;  %v1281_v45 = vunpack.c.l.bf16 %v3233_v6 }
 0x21f   : > { %v1583_v42 = vmul.f32 0.5, %v3662_v11  ;;  %v3664_v52 = vpop.eup %3663 }
 0x220   : > { %v1577_v46 = vadd.f32 0.5, %v1575_v50  ;;  %v3666_v12 = vpop.eup %3665  ;;  %v1576_v9 = vmul.f32 0.5, %v3664_v52 }
 0x221   : > { %v1585_v53 = vadd.f32 0.5, %v1583_v42  ;;  %v3668_v51 = vpop.eup %3667 }
 0x222   : > { %v1599_v54 = vmul.f32 %v3666_v12, %v1577_v46  ;;  %v1578_v3 = vadd.f32 0.5, %v1576_v9  ;;  %v1584_v48 = vmul.f32 0.5, %v3668_v51  ;;  %v3670_v55 = vpop.eup %3669  ;;  %v3234_v12 = vld [vmem:[%s3836_s6 + $0x58] sm:$0xff] }
 0x223   : > { %v1597_v47 = vmul.f32 %v1585_v53, %v4276_v22  ;;  %v1277_v22 = vunpack.c.l.bf16 %v3231_v5  ;;  %v3672_v8 = vpop.eup %3671 }
 0x224   : > { %v1586_v57 = vadd.f32 0.5, %v1584_v48  ;;  %v1600_v58 = vmul.f32 %v3670_v55, %v1578_v3  ;;  %v3674_v7 = vpop.eup %3673  ;;  %v1593_v53 = vmul.f32 0.5, %v3672_v8 }
 0x225   : > { %v4537_v56 = vadd.f32 %v1599_v54, %v1597_v47  ;;  %v1594_v9 = vmul.f32 0.5, %v3674_v7 }
 0x226   : > { %v1598_v60 = vmul.f32 %v1586_v57, %v4279_v23  ;;  %v1279_v23 = vunpack.c.l.bf16 %v3232_v43 }
 0x227   : > { %4883 = vst [vmem:[#allocation9_spill] sm:$0xff] %v4537_v56  ;;  %3675 = vtanh.f32 %v4537_v56  ;;  %v1596_v56 = vadd.f32 0.5, %v1594_v9  ;;  %v4591_v9 = vld [vmem:[%s4854_s3 + $0x4c] ss:$16 sps:$4 sm:$0xff]  }
 0x228   : > { %v4542_v42 = vadd.f32 %v1600_v58, %v1598_v60  ;;  %v1283_v60 = vunpack.c.l.bf16 %v3234_v12 }
 0x22a   : > { %4884 = vst [vmem:[#allocation10_spill] sm:$0xff] %v4542_v42  ;;  %3677 = vtanh.f32 %v4542_v42 }
 0x22e   : > { %v1511_v11 = vpop.f32.mrb[12].mxu0  ;;  %v1554_v50 = vpop.f32.mrb[12].mxu1 }
 0x22f   : > { %v1563_v10 = vadd.f32 %v1511_v11, %v1277_v22  ;;  %v1513_v52 = vpop.f32.mrb[13].mxu0  ;;  %v1556_v46 = vpop.f32.mrb[13].mxu1  ;;  %v1565_v6 = vadd.f32 %v1554_v50, %v1279_v23  ;;  %v1595_v11 = vadd.f32 0.5, %v1593_v53  ;;  %v4556_v50 = vld [vmem:[%s4854_s3 + $0x8] ss:$16 sps:$4 sm:$0xff]  }
 0x230   : > { %v1564_v51 = vadd.f32 %v1513_v52, %v1278_v40  ;;  %v1515_v54 = vpop.f32.mrb[14].mxu0  ;;  %v1558_v47 = vpop.f32.mrb[14].mxu1  ;;  %v1280_v40 = vunpack.c.h.bf16 %v3232_v43  ;;  %v4579_v53 = vld [vmem:[%s4854_s3 + $0x28] ss:$16 sps:$4 sm:$0xff]  }
 0x231   : > { %v1608_v3 = vmul.f32 0.5, %v1563_v10  ;;  %v1567_v48 = vadd.f32 %v1515_v54, %v1281_v45  ;;  %v1517_v55 = vpop.f32.mrb[15].mxu0  ;;  %v1560_v57 = vpop.f32.mrb[15].mxu1  ;;  %v1569_v45 = vadd.f32 %v1558_v47, %v1283_v60  ;;  %v1284_v10 = vunpack.c.h.bf16 %v3234_v12 }
 0x232   : > { %v1616_v58 = vmul.f32 0.5, %v1564_v51  ;;  %v1568_v5 = vadd.f32 %v1517_v55, %v1282_v49  ;;  %v3676_v42 = vpop.eup %3675  ;;  %v4551_v49 = vld [vmem:[%s4854_s3] ss:$16 sps:$4 sm:$0xff]   ;;  %v1566_v43 = vadd.f32 %v1556_v46, %v1280_v40  ;;  %v4586_v46 = vld [vmem:[%s4854_s3 + $0x44] ss:$16 sps:$4 sm:$0xff]  }
 0x233   : > { %3679 = vtanh.f32 %v1608_v3  ;;  %v1609_v22 = vmul.f32 0.5, %v1567_v48  ;;  %v1605_v7 = vmul.f32 %v3676_v42, %v1595_v11  ;;  %v4566_v42 = vld [vmem:[%s4854_s3 + $0x2c] ss:$16 sps:$4 sm:$0xff]   ;;  %v1570_v12 = vadd.f32 %v1560_v57, %v1284_v10  ;;  %v4600_v57 = vld [vmem:[%s4854_s3 + $0x40] ss:$16 sps:$4 sm:$0xff]  }
 0x234   : > { %3681 = vtanh.f32 %v1616_v58  ;;  %v1617_v41 = vmul.f32 0.5, %v1568_v5  ;;  %v3678_v8 = vpop.eup %3677  ;;  %v1626_v3 = vmul.f32 0.5, %v1566_v43  ;;  %v4605_v58 = vld [vmem:[%s4854_s3 + $0x48] ss:$16 sps:$4 sm:$0xff]   ;;  %v4625_v43 = vld [vmem:[%s4854_s3 + $0x60] ss:$16 sps:$4 sm:$0xff]  }
 0x235   : > { %v1606_v52 = vmul.f32 %v3678_v8, %v1596_v56  ;;  %3683 = vtanh.f32 %v1609_v22  ;;  %v4561_v56 = vld [vmem:[%s4854_s3 + $0x24] ss:$16 sps:$4 sm:$0xff]   ;;  %v1627_v55 = vmul.f32 0.5, %v1570_v12  ;;  %v4617_v22 = vld [vmem:[%s4854_s3 + $0x6c] ss:$16 sps:$4 sm:$0xff]  }
 0x236   : > { %3685 = vtanh.f32 %v1565_v6  ;;  %v4612_v6 = vld [vmem:[%s4854_s3 + $0x64] ss:$16 sps:$4 sm:$0xff]   ;;  %v4630_v12 = vld [vmem:[%s4854_s3 + $0x68] ss:$16 sps:$4 sm:$0xff]  }
 0x237   : > { %3687 = vtanh.f32 %v1617_v41  ;;  %v1607_v23 = vpack.c.bf16 %v1606_v52, %v1605_v7  ;;  %v4574_v41 = vld [vmem:[%s4854_s3 + $0x20] ss:$16 sps:$4 sm:$0xff]  }
 0x238   : > { %3689 = vtanh.f32 %v1569_v45 }
 0x239   : > { %3267 = vst [vmem:[%s3841_s9 + $0x8] sm:$0xff] %v1607_v23  ;;  %1887 = vmatmul.mubr.bf16.vlgmr.msra.gmra.mrb[16].mxu0 %v1607_v23  ;;  %1930 = vmatmul.mubr.bf16.vlgmr.msra.gmra.mrb[16].mxu1 %v1607_v23  ;;  %3691 = vtanh.f32 %v1626_v3 }
 0x23a   : > { %2154 = vmatpush1.bf16.msra.mxu0 %v4551_v49  ;;  %2197 = vmatpush1.bf16.msra.mxu1 %v4556_v50  ;;  %3693 = vtanh.f32 %v1627_v55 }
 0x23b   : > { %2155 = vmatprep.subr.bf16.mxu0 %v4561_v56  ;;  %2198 = vmatprep.subr.bf16.mxu1 %v4566_v42 }
 0x23c   : > { %2185 = vmatprep.mubr.bf16.mxu0 %v4877_v63  ;;  %2228 = vmatprep.mubr.bf16.mxu1 %v4877_v63 }
 0x23d   : > { %v3680_v51 = vpop.eup %3679 }
 0x23e   : > { %v3682_v54 = vpop.eup %3681  ;;  %v1612_v47 = vmul.f32 0.5, %v3680_v51  ;;  %2156 = vmatpush1.bf16.msra.mxu0 %v4574_v41  ;;  %2199 = vmatpush1.bf16.msra.mxu1 %v4579_v53 }
 0x23f   : > { %v1620_v48 = vmul.f32 0.5, %v3682_v54  ;;  %v3684_v60 = vpop.eup %3683  ;;  %2157 = vmatprep.subr.bf16.mxu0 %v4586_v46  ;;  %2200 = vmatprep.subr.bf16.mxu1 %v4591_v9  ;;  %v4642_v54 = vld [vmem:[%s4854_s3 + $0x8c] ss:$16 sps:$4 sm:$0xff]  }
 0x240   : > { %v1614_v5 = vadd.f32 0.5, %v1612_v47  ;;  %v3686_v11 = vpop.eup %3685  ;;  %v1613_v40 = vmul.f32 0.5, %v3684_v60  ;;  %v4652_v60 = vld [vmem:[%s4854_s3 + $0x80] ss:$16 sps:$4 sm:$0xff]  }
 0x241   : > { %v1622_v8 = vadd.f32 0.5, %v1620_v48  ;;  %v3688_v7 = vpop.eup %3687 }
 0x242   : > { %v1636_v52 = vmul.f32 %v3686_v11, %v1614_v5  ;;  %v1615_v10 = vadd.f32 0.5, %v1613_v40  ;;  %v1621_v23 = vmul.f32 0.5, %v3688_v7  ;;  %2158 = vmatpush1.bf16.msra.mxu0 %v4600_v57  ;;  %2201 = vmatpush1.bf16.msra.mxu1 %v4605_v58  ;;  %v3690_v51 = vpop.eup %3689  ;;  %v4657_v5 = vld [vmem:[%s4854_s3 + $0x88] ss:$16 sps:$4 sm:$0xff]   ;;  %v4669_v11 = vld [vmem:[%s4854_s3 + $0xac] ss:$16 sps:$4 sm:$0xff]  }
 0x243   : > { %v1634_v45 = vmul.f32 %v1622_v8, %v4301_v13  ;;  %2159 = vmatprep.subr.bf16.mxu0 %v4612_v6  ;;  %2202 = vmatprep.subr.bf16.mxu1 %v4617_v22  ;;  %v4637_v13 = vld [vmem:[%s4854_s3 + $0x84] ss:$16 sps:$4 sm:$0xff]   ;;  %4885 = vst [vmem:[#allocation11_spill] sm:$0xff] %v4657_v5  ;;  %4887 = vst [vmem:[#allocation13_spill] sm:$0xff] %v4669_v11  ;;  %v4680_v40 = vld [vmem:[%s4854_s3 + $0xa0] ss:$16 sps:$4 sm:$0xff]  }
 0x244   : > { %v1623_v3 = vadd.f32 0.5, %v1621_v23  ;;  %v1637_v48 = vmul.f32 %v3690_v51, %v1615_v10  ;;  %4888 = vst [vmem:[#allocation14_spill] sm:$0xff] %v4680_v40  ;;  %v4685_v7 = vld [vmem:[%s4854_s3 + $0xa8] ss:$16 sps:$4 sm:$0xff]   ;;  %v4697_v10 = vld [vmem:[%s4854_s3 + $0xcc] ss:$16 sps:$4 sm:$0xff]  }
 0x245   : > { %v4644_v47 = vadd.f32 %v1636_v52, %v1634_v45  ;;  %4889 = vst [vmem:[#allocation15_spill] sm:$0xff] %v4685_v7  ;;  %v3692_v52 = vpop.eup %3691  ;;  %v4692_v45 = vld [vmem:[%s4854_s3 + $0xc4] ss:$16 sps:$4 sm:$0xff]   ;;  %4891 = vst [vmem:[#allocation17_spill] sm:$0xff] %v4697_v10  ;;  %v4704_v51 = vld [vmem:[%s4854_s3 + $0xc0] ss:$16 sps:$4 sm:$0xff]  }
 0x246   : > { %v1635_v55 = vmul.f32 %v1623_v3, %v4308_v44  ;;  %2160 = vmatpush1.bf16.msra.mxu0 %v4625_v43  ;;  %2203 = vmatpush1.bf16.msra.mxu1 %v4630_v12  ;;  %v4664_v44 = vld [vmem:[%s4854_s3 + $0xa4] ss:$16 sps:$4 sm:$0xff]   ;;  %4890 = vst [vmem:[#allocation16_spill] sm:$0xff] %v4692_v45  ;;  %v3694_v23 = vpop.eup %3693  ;;  %4892 = vst [vmem:[#allocation18_spill] sm:$0xff] %v4704_v51  ;;  %v4709_v3 = vld [vmem:[%s4854_s3 + $0xc8] ss:$16 sps:$4 sm:$0xff]  }
 0x247   : > { %2161 = vmatprep.subr.bf16.mxu0 %v4637_v13  ;;  %2204 = vmatprep.subr.bf16.mxu1 %v4642_v54  ;;  %4886 = vst [vmem:[#allocation12_spill] sm:$0xff] %v4664_v44  ;;  %3695 = vtanh.f32 %v4644_v47  ;;  %4893 = vst [vmem:[#allocation19_spill] sm:$0xff] %v4709_v3 }
 0x248   : > { %v4672_v8 = vadd.f32 %v1637_v48, %v1635_v55  ;;  %v1630_v48 = vmul.f32 0.5, %v3692_v52  ;;  %v1631_v55 = vmul.f32 0.5, %v3694_v23  ;;  %v4728_v52 = vld [vmem:[%s4854_s3 + $0xe0] ss:$16 sps:$4 sm:$0xff]   ;;  %v4733_v23 = vld [vmem:[%s4854_s3 + $0xe8] ss:$16 sps:$4 sm:$0xff]  }
 0x24a   : > { %3697 = vtanh.f32 %v4672_v8  ;;  %2162 = vmatpush1.bf16.msra.mxu0 %v4652_v60  ;;  %2205 = vmatpush1.bf16.msra.mxu1 %v4657_v5 }
 0x24b   : > { %2163 = vmatprep.subr.bf16.mxu0 %v4664_v44  ;;  %2206 = vmatprep.subr.bf16.mxu1 %v4669_v11 }
 0x24e   : > { %2164 = vmatpush1.bf16.msra.mxu0 %v4680_v40  ;;  %2207 = vmatpush1.bf16.msra.mxu1 %v4685_v7  ;;  %v4716_v7 = vld [vmem:[%s4854_s3 + $0xe4] ss:$16 sps:$4 sm:$0xff]   ;;  %v4721_v40 = vld [vmem:[%s4854_s3 + $0xec] ss:$16 sps:$4 sm:$0xff]  }
 0x24f   : > { %2165 = vmatprep.subr.bf16.mxu0 %v4692_v45  ;;  %2208 = vmatprep.subr.bf16.mxu1 %v4697_v10  ;;  %v1632_v10 = vadd.f32 0.5, %v1630_v48  ;;  %v1633_v45 = vadd.f32 0.5, %v1631_v55 }
 0x251   : > { %v3696_v11 = vpop.eup %3695 }
 0x252   : > { %2166 = vmatpush1.bf16.msra.mxu0 %v4704_v51  ;;  %2209 = vmatpush1.bf16.msra.mxu1 %v4709_v3  ;;  %v1642_v44 = vmul.f32 %v3696_v11, %v1632_v10 }
 0x253   : > { %2167 = vmatprep.subr.bf16.mxu0 %v4716_v7  ;;  %2210 = vmatprep.subr.bf16.mxu1 %v4721_v40 }
 0x254   : > { %v3698_v51 = vpop.eup %3697 }
 0x255   : > { %v1643_v5 = vmul.f32 %v3698_v51, %v1633_v45 }
 0x256   : > { %2168 = vmatpush1.bf16.msra.mxu0 %v4728_v52  ;;  %2211 = vmatpush1.bf16.msra.mxu1 %v4733_v23 }
 0x257   : > { %v1644_v3 = vpack.c.bf16 %v1643_v5, %v1642_v44  ;;  %2530 = vmatprep.subr.bf16.mxu0 %v4331_v61  ;;  %2573 = vmatprep.subr.bf16.mxu1 %v4336_v62  ;;  %v4894_v61 = vld [vmem:[#allocation6_spill] sm:$0xff]  ;;  %v4895_v62 = vld [vmem:[#allocation7_spill] sm:$0xff] }
 0x259   : > { %3268 = vst [vmem:[%s3846_s13 + $0x10] sm:$0xff] %v1644_v3  ;;  %2186 = vmatmul.mubr.bf16.vlgmr.msra.gmra.mrb[20].mxu0 %v1644_v3  ;;  %2229 = vmatmul.mubr.bf16.vlgmr.msra.gmra.mrb[20].mxu1 %v1644_v3 }
 0x25a   : > { %2531 = vmatpush1.bf16.msra.mxu0 %v4341_v4  ;;  %2574 = vmatpush1.bf16.msra.mxu1 %v4346_v0  ;;  %v4896_v4 = vld [vmem:[#allocation8_spill] sm:$0xff] }
 0x25b   : > { %2532 = vmatprep.subr.bf16.mxu0 %v4355_v1  ;;  %2575 = vmatprep.subr.bf16.mxu1 %v4360_v35  ;;  %v3269_v0 = vld [vmem:[%s3831_s27 + $0x40] sm:$0xff]  ;;  %v3271_v1 = vld [vmem:[%s3831_s27 + $0x50] sm:$0xff] }
 0x25c   : > { %2562 = vmatprep.mubr.bf16.mxu0 %v4877_v63  ;;  %2605 = vmatprep.mubr.bf16.mxu1 %v4877_v63  ;;  %v1654_v35 = vunpack.c.l.bf16 %v3269_v0 }
 0x25e   : > { %2533 = vmatpush1.bf16.msra.mxu0 %v4365_v14  ;;  %2576 = vmatpush1.bf16.msra.mxu1 %v4370_v15  ;;  %v3270_v14 = vld [vmem:[%s3831_s27 + $0x48] sm:$0xff]  ;;  %v1655_v15 = vunpack.c.h.bf16 %v3269_v0 }
 0x25f   : > { %2534 = vmatprep.subr.bf16.mxu0 %v4379_v16  ;;  %2577 = vmatprep.subr.bf16.mxu1 %v4384_v17  ;;  %v1658_v16 = vunpack.c.l.bf16 %v3271_v1 }
 0x262   : > { %2535 = vmatpush1.bf16.msra.mxu0 %v4389_v18  ;;  %2578 = vmatpush1.bf16.msra.mxu1 %v4394_v19  ;;  %v1659_v19 = vunpack.c.h.bf16 %v3271_v1 }
 0x263   : > { %2536 = vmatprep.subr.bf16.mxu0 %v4403_v20  ;;  %2579 = vmatprep.subr.bf16.mxu1 %v4408_v21  ;;  %v1656_v21 = vunpack.c.l.bf16 %v3270_v14 }
 0x266   : > { %2537 = vmatpush1.bf16.msra.mxu0 %v4413_v24  ;;  %2580 = vmatpush1.bf16.msra.mxu1 %v4418_v25 }
 0x267   : > { %2538 = vmatprep.subr.bf16.mxu0 %v4427_v26  ;;  %2581 = vmatprep.subr.bf16.mxu1 %v4432_v27  ;;  %v3272_v26 = vld [vmem:[%s3831_s27 + $0x58] sm:$0xff] }
 0x268   : > { %v1661_v44 = vunpack.c.h.bf16 %v3272_v26 }
 0x26a   : > { %2539 = vmatpush1.bf16.msra.mxu0 %v4437_v28  ;;  %2582 = vmatpush1.bf16.msra.mxu1 %v4442_v29 }
 0x26b   : > { %2540 = vmatprep.subr.bf16.mxu0 %v4451_v31  ;;  %2583 = vmatprep.subr.bf16.mxu1 %v4456_v32 }
 0x26e   : > { %2541 = vmatpush1.bf16.msra.mxu0 %v4461_v33  ;;  %2584 = vmatpush1.bf16.msra.mxu1 %v4466_v34 }
 0x26f   : > { %2542 = vmatprep.subr.bf16.mxu0 %v4475_v30  ;;  %2585 = vmatprep.subr.bf16.mxu1 %v4490_v59 }
 0x272   : > { %2543 = vmatpush1.bf16.msra.mxu0 %v4480_v37  ;;  %2586 = vmatpush1.bf16.msra.mxu1 %v4485_v38  ;;  %v1660_v37 = vunpack.c.l.bf16 %v3272_v26  ;;  %v4898_v26 = vld [vmem:[#allocation10_spill] sm:$0xff] }
 0x273   : > { %2544 = vmatprep.subr.bf16.mxu0 %v4499_v2  ;;  %2587 = vmatprep.subr.bf16.mxu1 %v4504_v36 }
 0x276   : > { %2545 = vmatpush1.bf16.msra.mxu0 %v4509_v39  ;;  %2588 = vmatpush1.bf16.msra.mxu1 %v4894_v61  ;;  %v1657_v39 = vunpack.c.h.bf16 %v3270_v14 }
 0x277   : > { %2828 = vmatprep.subr.bf16.mxu0 %v4895_v62  ;;  %2871 = vmatprep.subr.bf16.mxu1 %v4896_v4 }
 0x30c   : > { %v1888_v17 = vpop.f32.mrb[16].mxu0  ;;  %v1931_v18 = vpop.f32.mrb[16].mxu1 }
 0x30d   : > { %v1940_v20 = vadd.f32 %v1888_v17, %v1654_v35  ;;  %v1890_v24 = vpop.f32.mrb[17].mxu0  ;;  %v1933_v25 = vpop.f32.mrb[17].mxu1  ;;  %v1942_v59 = vadd.f32 %v1931_v18, %v1656_v21 }
 0x30e   : > { %v1941_v27 = vadd.f32 %v1890_v24, %v1655_v15  ;;  %v1892_v28 = vpop.f32.mrb[18].mxu0  ;;  %v1935_v29 = vpop.f32.mrb[18].mxu1  ;;  %v1943_v11 = vadd.f32 %v1933_v25, %v1657_v39 }
 0x30f   : > { %v2247_v31 = vmul.f32 0.5, %v1940_v20  ;;  %v1944_v32 = vadd.f32 %v1892_v28, %v1658_v16  ;;  %v1894_v33 = vpop.f32.mrb[19].mxu0  ;;  %v1937_v34 = vpop.f32.mrb[19].mxu1  ;;  %v1946_v5 = vadd.f32 %v1935_v29, %v1660_v37  ;;  %v4897_v16 = vld [vmem:[#allocation9_spill] sm:$0xff]  ;;  %v3305_v28 = vld [vmem:[%s3836_s6 + $0x20] sm:$0xff] }
 0x310   : > { %v2255_v30 = vmul.f32 0.5, %v1941_v27  ;;  %v1945_v38 = vadd.f32 %v1894_v33, %v1659_v19  ;;  %v1947_v45 = vadd.f32 %v1937_v34, %v1661_v44  ;;  %v2265_v48 = vmul.f32 0.5, %v1943_v11  ;;  %v3306_v34 = vld [vmem:[%s3836_s6 + $0x28] sm:$0xff] }
 0x311   : > { %3699 = vtanh.f32 %v2247_v31  ;;  %v2248_v2 = vmul.f32 0.5, %v1944_v32  ;;  %v3307_v31 = vld [vmem:[%s3836_s6 + $0x30] sm:$0xff]  ;;  %v1953_v32 = vunpack.c.l.bf16 %v3305_v28 }
 0x312   : > { %3701 = vtanh.f32 %v2255_v30  ;;  %v2256_v36 = vmul.f32 0.5, %v1945_v38  ;;  %v2266_v61 = vmul.f32 0.5, %v1947_v45  ;;  %v1954_v30 = vunpack.c.h.bf16 %v3305_v28  ;;  %v3308_v45 = vld [vmem:[%s3836_s6 + $0x38] sm:$0xff] }
 0x313   : > { %3703 = vtanh.f32 %v2248_v2  ;;  %v1957_v38 = vunpack.c.l.bf16 %v3307_v31 }
 0x314   : > { %3705 = vtanh.f32 %v1942_v59 }
 0x315   : > { %3707 = vtanh.f32 %v2256_v36  ;;  %v1958_v36 = vunpack.c.h.bf16 %v3307_v31  ;;  %v1960_v31 = vunpack.c.h.bf16 %v3308_v45 }
 0x316   : > { %3709 = vtanh.f32 %v1946_v5  ;;  %v1955_v5 = vunpack.c.l.bf16 %v3306_v34 }
 0x317   : > { %3711 = vtanh.f32 %v2265_v48 }
 0x318   : > { %3713 = vtanh.f32 %v2266_v61 }
 0x31b   : > { %v3700_v10 = vpop.eup %3699 }
 0x31c   : > { %v3702_v51 = vpop.eup %3701  ;;  %v2251_v3 = vmul.f32 0.5, %v3700_v10 }
 0x31d   : > { %v2259_v55 = vmul.f32 0.5, %v3702_v51  ;;  %v3704_v62 = vpop.eup %3703 }
 0x31e   : > { %v2253_v4 = vadd.f32 0.5, %v2251_v3  ;;  %v3706_v0 = vpop.eup %3705  ;;  %v2252_v35 = vmul.f32 0.5, %v3704_v62 }
 0x31f   : > { %v2261_v1 = vadd.f32 0.5, %v2259_v55  ;;  %v3708_v14 = vpop.eup %3707 }
 0x320   : > { %v2275_v15 = vmul.f32 %v3706_v0, %v2253_v4  ;;  %v2254_v18 = vadd.f32 0.5, %v2252_v35  ;;  %v2260_v19 = vmul.f32 0.5, %v3708_v14  ;;  %v3710_v20 = vpop.eup %3709  ;;  %v1959_v35 = vunpack.c.l.bf16 %v3308_v45 }
 0x321   : > { %v2273_v17 = vmul.f32 %v2261_v1, %v4897_v16  ;;  %v3712_v33 = vpop.eup %3711 }
 0x322   : > { %v2262_v24 = vadd.f32 0.5, %v2260_v19  ;;  %v2276_v25 = vmul.f32 %v3710_v20, %v2254_v18  ;;  %v3714_v37 = vpop.eup %3713  ;;  %v2269_v10 = vmul.f32 0.5, %v3712_v33 }
 0x323   : > { %v4781_v21 = vadd.f32 %v2275_v15, %v2273_v17  ;;  %v2270_v51 = vmul.f32 0.5, %v3714_v37 }
 0x324   : > { %v2274_v27 = vmul.f32 %v2262_v24, %v4898_v26  ;;  %v2271_v18 = vadd.f32 0.5, %v2269_v10 }
 0x325   : > { %3715 = vtanh.f32 %v4781_v21  ;;  %v2272_v19 = vadd.f32 0.5, %v2270_v51  ;;  %v4904_v51 = vld [vmem:[#allocation16_spill] sm:$0xff] }
 0x326   : > { %v4786_v29 = vadd.f32 %v2276_v25, %v2274_v27  ;;  %v1956_v25 = vunpack.c.h.bf16 %v3306_v34 }
 0x328   : > { %3717 = vtanh.f32 %v4786_v29 }
 0x32c   : > { %v2187_v59 = vpop.f32.mrb[20].mxu0  ;;  %v2230_v2 = vpop.f32.mrb[20].mxu1 }
 0x32d   : > { %v2239_v39 = vadd.f32 %v2187_v59, %v1953_v32  ;;  %v2189_v44 = vpop.f32.mrb[21].mxu0  ;;  %v2232_v11 = vpop.f32.mrb[21].mxu1  ;;  %v2241_v16 = vadd.f32 %v2230_v2, %v1955_v5 }
 0x32e   : > { %v2240_v3 = vadd.f32 %v2189_v44, %v1954_v30  ;;  %v2191_v48 = vpop.f32.mrb[22].mxu0  ;;  %v2234_v55 = vpop.f32.mrb[22].mxu1  ;;  %v2242_v33 = vadd.f32 %v2232_v11, %v1956_v25 }
 0x32f   : > { %v2284_v61 = vmul.f32 0.5, %v2239_v39  ;;  %v2243_v62 = vadd.f32 %v2191_v48, %v1957_v38  ;;  %v2193_v4 = vpop.f32.mrb[23].mxu0  ;;  %v2236_v0 = vpop.f32.mrb[23].mxu1  ;;  %v2245_v28 = vadd.f32 %v2234_v55, %v1959_v35  ;;  %v4906_v48 = vld [vmem:[#allocation18_spill] sm:$0xff]  ;;  %v4907_v55 = vld [vmem:[#allocation19_spill] sm:$0xff] }
 0x330   : > { %v2292_v1 = vmul.f32 0.5, %v2240_v3  ;;  %v2244_v14 = vadd.f32 %v2193_v4, %v1958_v36  ;;  %v3716_v15 = vpop.eup %3715  ;;  %v2246_v30 = vadd.f32 %v2236_v0, %v1960_v31  ;;  %v2302_v59 = vmul.f32 0.5, %v2242_v33  ;;  %v4905_v3 = vld [vmem:[#allocation17_spill] sm:$0xff] }
 0x331   : > { %3719 = vtanh.f32 %v2284_v61  ;;  %v2285_v17 = vmul.f32 0.5, %v2243_v62  ;;  %v2281_v26 = vmul.f32 %v3716_v15, %v2271_v18  ;;  %v3345_v15 = vld [vmem:[%s3831_s27 + $0x70] sm:$0xff] }
 0x332   : > { %3721 = vtanh.f32 %v2292_v1  ;;  %v2293_v20 = vmul.f32 0.5, %v2244_v14  ;;  %v3718_v24 = vpop.eup %3717  ;;  %v2303_v36 = vmul.f32 0.5, %v2246_v30  ;;  %v3343_v14 = vld [vmem:[%s3831_s27 + $0x60] sm:$0xff] }
 0x333   : > { %v2282_v27 = vmul.f32 %v3718_v24, %v2272_v19  ;;  %3723 = vtanh.f32 %v2285_v17  ;;  %v3344_v17 = vld [vmem:[%s3831_s27 + $0x68] sm:$0xff]  ;;  %v2331_v18 = vunpack.c.h.bf16 %v3343_v14 }
 0x334   : > { %3725 = vtanh.f32 %v2241_v16  ;;  %v2330_v16 = vunpack.c.l.bf16 %v3343_v14  ;;  %v2332_v25 = vunpack.c.l.bf16 %v3344_v17 }
 0x335   : > { %3727 = vtanh.f32 %v2293_v20  ;;  %v2283_v32 = vpack.c.bf16 %v2282_v27, %v2281_v26  ;;  %v2335_v20 = vunpack.c.h.bf16 %v3345_v15  ;;  %v3346_v27 = vld [vmem:[%s3831_s27 + $0x78] sm:$0xff] }
 0x336   : > { %3729 = vtanh.f32 %v2245_v28 }
 0x337   : > { %3341 = vst [vmem:[%s3841_s9 + $0x10] sm:$0xff] %v2283_v32  ;;  %2563 = vmatmul.mubr.bf16.vlgmr.msra.gmra.mrb[24].mxu0 %v2283_v32  ;;  %2606 = vmatmul.mubr.bf16.vlgmr.msra.gmra.mrb[24].mxu1 %v2283_v32  ;;  %3731 = vtanh.f32 %v2302_v59 }
 0x338   : > { %2829 = vmatpush1.bf16.msra.mxu0 %v4551_v49  ;;  %2872 = vmatpush1.bf16.msra.mxu1 %v4556_v50  ;;  %3733 = vtanh.f32 %v2303_v36  ;;  %v2333_v36 = vunpack.c.h.bf16 %v3344_v17 }
 0x339   : > { %2830 = vmatprep.subr.bf16.mxu0 %v4561_v56  ;;  %2873 = vmatprep.subr.bf16.mxu1 %v4566_v42 }
 0x33a   : > { %2860 = vmatprep.mubr.bf16.mxu0 %v4877_v63  ;;  %2903 = vmatprep.mubr.bf16.mxu1 %v4877_v63 }
 0x33b   : > { %v3720_v34 = vpop.eup %3719 }
 0x33c   : > { %v3722_v37 = vpop.eup %3721  ;;  %v2288_v38 = vmul.f32 0.5, %v3720_v34  ;;  %2831 = vmatpush1.bf16.msra.mxu0 %v4574_v41  ;;  %2874 = vmatpush1.bf16.msra.mxu1 %v4579_v53 }
 0x33d   : > { %v2296_v2 = vmul.f32 0.5, %v3722_v37  ;;  %v3724_v49 = vpop.eup %3723  ;;  %2832 = vmatprep.subr.bf16.mxu0 %v4586_v46  ;;  %2875 = vmatprep.subr.bf16.mxu1 %v4591_v9 }
 0x33e   : > { %v2290_v50 = vadd.f32 0.5, %v2288_v38  ;;  %v3726_v56 = vpop.eup %3725  ;;  %v2289_v39 = vmul.f32 0.5, %v3724_v49  ;;  %v2336_v38 = vunpack.c.l.bf16 %v3346_v27 }
 0x33f   : > { %v2298_v42 = vadd.f32 0.5, %v2296_v2  ;;  %v3728_v5 = vpop.eup %3727 }
 0x340   : > { %v2312_v63 = vmul.f32 %v3726_v56, %v2290_v50  ;;  %v2291_v11 = vadd.f32 0.5, %v2289_v39  ;;  %v2297_v45 = vmul.f32 0.5, %v3728_v5  ;;  %2833 = vmatpush1.bf16.msra.mxu0 %v4600_v57  ;;  %2876 = vmatpush1.bf16.msra.mxu1 %v4605_v58  ;;  %v3730_v41 = vpop.eup %3729  ;;  %v4899_v58 = vld [vmem:[#allocation11_spill] sm:$0xff]  ;;  %v2337_v39 = vunpack.c.h.bf16 %v3346_v27 }
 0x341   : > { %v2310_v44 = vmul.f32 %v2298_v42, %v4644_v47  ;;  %2834 = vmatprep.subr.bf16.mxu0 %v4612_v6  ;;  %2877 = vmatprep.subr.bf16.mxu1 %v4617_v22  ;;  %v3732_v6 = vpop.eup %3731  ;;  %v4900_v22 = vld [vmem:[#allocation12_spill] sm:$0xff]  ;;  %v4902_v47 = vld [vmem:[#allocation14_spill] sm:$0xff] }
 0x342   : > { %v2299_v46 = vadd.f32 0.5, %v2297_v45  ;;  %v2313_v9 = vmul.f32 %v3730_v41, %v2291_v11 }
 0x343   : > { %v4808_v53 = vadd.f32 %v2312_v63, %v2310_v44 }
 0x344   : > { %v2311_v10 = vmul.f32 %v2299_v46, %v4672_v8  ;;  %2835 = vmatpush1.bf16.msra.mxu0 %v4625_v43  ;;  %2878 = vmatpush1.bf16.msra.mxu1 %v4630_v12  ;;  %v4901_v43 = vld [vmem:[#allocation13_spill] sm:$0xff]  ;;  %v3734_v12 = vpop.eup %3733 }
 0x345   : > { %2836 = vmatprep.subr.bf16.mxu0 %v4637_v13  ;;  %2879 = vmatprep.subr.bf16.mxu1 %v4642_v54  ;;  %3735 = vtanh.f32 %v4808_v53  ;;  %v4903_v13 = vld [vmem:[#allocation15_spill] sm:$0xff]  ;;  %v2306_v54 = vmul.f32 0.5, %v3732_v6  ;;  %v2307_v8 = vmul.f32 0.5, %v3734_v12 }
 0x346   : > { %v4816_v57 = vadd.f32 %v2313_v9, %v2311_v10 }
 0x347   : > { %v2308_v61 = vadd.f32 0.5, %v2306_v54  ;;  %v2309_v62 = vadd.f32 0.5, %v2307_v8 }
 0x348   : > { %3737 = vtanh.f32 %v4816_v57  ;;  %2837 = vmatpush1.bf16.msra.mxu0 %v4652_v60  ;;  %2880 = vmatpush1.bf16.msra.mxu1 %v4899_v58 }
 0x349   : > { %2838 = vmatprep.subr.bf16.mxu0 %v4900_v22  ;;  %2881 = vmatprep.subr.bf16.mxu1 %v4901_v43 }
 0x34c   : > { %2839 = vmatpush1.bf16.msra.mxu0 %v4902_v47  ;;  %2882 = vmatpush1.bf16.msra.mxu1 %v4903_v13 }
 0x34d   : > { %2840 = vmatprep.subr.bf16.mxu0 %v4904_v51  ;;  %2883 = vmatprep.subr.bf16.mxu1 %v4905_v3 }
 0x34f   : > { %v3736_v60 = vpop.eup %3735 }
 0x350   : > { %2841 = vmatpush1.bf16.msra.mxu0 %v4906_v48  ;;  %2884 = vmatpush1.bf16.msra.mxu1 %v4907_v55  ;;  %v2318_v0 = vmul.f32 %v3736_v60, %v2308_v61  ;;  %v2624_v55 = vld [vmem:[%s3836_s6] sm:$0xff] }
 0x351   : > { %2842 = vmatprep.subr.bf16.mxu0 %v4716_v7  ;;  %2885 = vmatprep.subr.bf16.mxu1 %v4721_v40  ;;  %v2334_v7 = vunpack.c.l.bf16 %v3345_v15 }
 0x352   : > { %v3738_v4 = vpop.eup %3737 }
 0x353   : > { %v2319_v1 = vmul.f32 %v3738_v4, %v2309_v62  ;;  %v2626_v4 = vld [vmem:[%s3836_s6 + $0x10] sm:$0xff] }
 0x354   : > { %2843 = vmatpush1.bf16.msra.mxu0 %v4728_v52  ;;  %2886 = vmatpush1.bf16.msra.mxu1 %v4733_v23  ;;  %v2632_v15 = vunpack.c.l.bf16 %v2626_v4 }
 0x355   : > { %v2320_v35 = vpack.c.bf16 %v2319_v1, %v2318_v0  ;;  %v2625_v1 = vld [vmem:[%s3836_s6 + $0x8] sm:$0xff] }
 0x357   : > { %3342 = vst [vmem:[%s3846_s13 + $0x8] sm:$0xff] %v2320_v35  ;;  %2861 = vmatmul.mubr.bf16.vlgmr.msra.gmra.mrb[28].mxu0 %v2320_v35  ;;  %2904 = vmatmul.mubr.bf16.vlgmr.msra.gmra.mrb[28].mxu1 %v2320_v35  ;;  %v2629_v35 = vunpack.c.h.bf16 %v2624_v55 }
 0x40a   : > { %v2564_v19 = vpop.f32.mrb[24].mxu0  ;;  %v2607_v40 = vpop.f32.mrb[24].mxu1 }
 0x40b   : > { %v2616_v24 = vadd.f32 %v2564_v19, %v2330_v16  ;;  %v2566_v26 = vpop.f32.mrb[25].mxu0  ;;  %v2609_v52 = vpop.f32.mrb[25].mxu1  ;;  %v2618_v2 = vadd.f32 %v2607_v40, %v2332_v25  ;;  %v2630_v19 = vunpack.c.l.bf16 %v2625_v1 }
 0x40c   : > { %v2617_v23 = vadd.f32 %v2566_v26, %v2331_v18  ;;  %v2568_v28 = vpop.f32.mrb[26].mxu0  ;;  %v2611_v31 = vpop.f32.mrb[26].mxu1  ;;  %v2619_v42 = vadd.f32 %v2609_v52, %v2333_v36  ;;  %v2633_v18 = vunpack.c.h.bf16 %v2626_v4 }
 0x40d   : > { %v2922_v32 = vmul.f32 0.5, %v2616_v24  ;;  %v2620_v33 = vadd.f32 %v2568_v28, %v2334_v7  ;;  %v2570_v30 = vpop.f32.mrb[27].mxu0  ;;  %v2613_v34 = vpop.f32.mrb[27].mxu1  ;;  %v2622_v56 = vadd.f32 %v2611_v31, %v2336_v38 }
 0x40e   : > { %v2930_v37 = vmul.f32 0.5, %v2617_v23  ;;  %v2621_v59 = vadd.f32 %v2570_v30, %v2335_v20  ;;  %v2940_v5 = vmul.f32 0.5, %v2619_v42  ;;  %v2623_v63 = vadd.f32 %v2613_v34, %v2337_v39  ;;  %v2627_v20 = vld [vmem:[%s3836_s6 + $0x18] sm:$0xff] }
 0x40f   : > { %3739 = vtanh.f32 %v2922_v32  ;;  %v2923_v49 = vmul.f32 0.5, %v2620_v33 }
 0x410   : > { %3741 = vtanh.f32 %v2930_v37  ;;  %v2931_v50 = vmul.f32 0.5, %v2621_v59  ;;  %v2941_v46 = vmul.f32 0.5, %v2623_v63  ;;  %v2634_v37 = vunpack.c.l.bf16 %v2627_v20 }
 0x411   : > { %3743 = vtanh.f32 %v2923_v49  ;;  %v2635_v63 = vunpack.c.h.bf16 %v2627_v20 }
 0x412   : > { %3745 = vtanh.f32 %v2618_v2  ;;  %v2631_v2 = vunpack.c.h.bf16 %v2625_v1 }
 0x413   : > { %3747 = vtanh.f32 %v2931_v50 }
 0x414   : > { %3749 = vtanh.f32 %v2622_v56 }
 0x415   : > { %3751 = vtanh.f32 %v2940_v5 }
 0x416   : > { %3753 = vtanh.f32 %v2941_v46 }
 0x419   : > { %v3740_v44 = vpop.eup %3739 }
 0x41a   : > { %v3742_v11 = vpop.eup %3741  ;;  %v2926_v45 = vmul.f32 0.5, %v3740_v44 }
 0x41b   : > { %v2934_v41 = vmul.f32 0.5, %v3742_v11  ;;  %v3744_v9 = vpop.eup %3743 }
 0x41c   : > { %v2928_v10 = vadd.f32 0.5, %v2926_v45  ;;  %v3746_v58 = vpop.eup %3745  ;;  %v2927_v22 = vmul.f32 0.5, %v3744_v9 }
 0x41d   : > { %v2936_v6 = vadd.f32 0.5, %v2934_v41  ;;  %v3748_v43 = vpop.eup %3747 }
 0x41e   : > { %v2950_v12 = vmul.f32 %v3746_v58, %v2928_v10  ;;  %v2929_v13 = vadd.f32 0.5, %v2927_v22  ;;  %v2935_v54 = vmul.f32 0.5, %v3748_v43  ;;  %v3750_v8 = vpop.eup %3749 }
 0x41f   : > { %v2948_v47 = vmul.f32 %v2936_v6, %v4781_v21  ;;  %v3752_v61 = vpop.eup %3751  ;;  %v2628_v21 = vunpack.c.l.bf16 %v2624_v55 }
 0x420   : > { %v2937_v3 = vadd.f32 0.5, %v2935_v54  ;;  %v2951_v60 = vmul.f32 %v3750_v8, %v2929_v13  ;;  %v2944_v0 = vmul.f32 0.5, %v3752_v61  ;;  %v3754_v14 = vpop.eup %3753 }
 0x421   : > { %v2952_v51 = vadd.f32 %v2950_v12, %v2948_v47  ;;  %v2945_v25 = vmul.f32 0.5, %v3754_v14 }
 0x422   : > { %v2949_v48 = vmul.f32 %v2937_v3, %v4786_v29  ;;  %v2946_v24 = vadd.f32 0.5, %v2944_v0 }
 0x423   : > { %3755 = vtanh.f32 %v2952_v51  ;;  %3000 = vst [vmem:[#allocation3] sm:$0xff] %v2952_v51  ;;  %v2947_v49 = vadd.f32 0.5, %v2945_v25 }
 0x424   : > { %v2953_v62 = vadd.f32 %v2951_v60, %v2949_v48 }
 0x426   : > { %3757 = vtanh.f32 %v2953_v62  ;;  %3001 = vst [vmem:[#allocation3 + $0x8] sm:$0xff] %v2953_v62 }
 0x42a   : > { %v2862_v16 = vpop.f32.mrb[28].mxu0  ;;  %v2905_v17 = vpop.f32.mrb[28].mxu1 }
 0x42b   : > { %v2914_v7 = vadd.f32 %v2862_v16, %v2628_v21  ;;  %v2864_v40 = vpop.f32.mrb[29].mxu0  ;;  %v2907_v29 = vpop.f32.mrb[29].mxu1  ;;  %v2916_v59 = vadd.f32 %v2905_v17, %v2630_v19 }
 0x42c   : > { %v2915_v26 = vadd.f32 %v2864_v40, %v2629_v35  ;;  %v2866_v52 = vpop.f32.mrb[30].mxu0  ;;  %v2909_v27 = vpop.f32.mrb[30].mxu1  ;;  %v2917_v5 = vadd.f32 %v2907_v29, %v2631_v2 }
 0x42d   : > { %v3756_v23 = vpop.eup %3755  ;;  %v2959_v28 = vmul.f32 0.5, %v2914_v7  ;;  %v2918_v31 = vadd.f32 %v2866_v52, %v2632_v15  ;;  %v2868_v32 = vpop.f32.mrb[31].mxu0  ;;  %v2920_v39 = vadd.f32 %v2909_v27, %v2634_v37 }
 0x42e   : > { %v2911_v33 = vpop.f32.mrb[31].mxu1  ;;  %v2956_v30 = vmul.f32 %v3756_v23, %v2946_v24  ;;  %v2967_v34 = vmul.f32 0.5, %v2915_v26  ;;  %v2919_v38 = vadd.f32 %v2868_v32, %v2633_v18  ;;  %v2977_v11 = vmul.f32 0.5, %v2917_v5 }
 0x42f   : > { %3759 = vtanh.f32 %v2959_v28  ;;  %v2960_v36 = vmul.f32 0.5, %v2918_v31  ;;  %v2921_v45 = vadd.f32 %v2911_v33, %v2635_v63 }
 0x430   : > { %3761 = vtanh.f32 %v2967_v34  ;;  %v2968_v50 = vmul.f32 0.5, %v2919_v38  ;;  %v3758_v56 = vpop.eup %3757 }
 0x431   : > { %v2957_v42 = vmul.f32 %v3758_v56, %v2947_v49  ;;  %3763 = vtanh.f32 %v2960_v36  ;;  %v2978_v58 = vmul.f32 0.5, %v2921_v45 }
 0x432   : > { %3765 = vtanh.f32 %v2916_v59 }
 0x433   : > { %v2958_v44 = vpack.c.bf16 %v2957_v42, %v2956_v30  ;;  %3767 = vtanh.f32 %v2968_v50 }
 0x434   : > { %3769 = vtanh.f32 %v2920_v39 }
 0x435   : > { %3411 = vst [vmem:[%s3841_s9 + $0x18] sm:$0xff] %v2958_v44  ;;  %2999 = vst [vmem:[#allocation2] sm:$0xff] %v2958_v44  ;;  %3771 = vtanh.f32 %v2977_v11 }
 0x436   : > { %3773 = vtanh.f32 %v2978_v58 }
 0x439   : > { %v3760_v41 = vpop.eup %3759 }
 0x43a   : > { %v3762_v46 = vpop.eup %3761  ;;  %v2963_v9 = vmul.f32 0.5, %v3760_v41 }
 0x43b   : > { %v2971_v10 = vmul.f32 0.5, %v3762_v46  ;;  %v3764_v6 = vpop.eup %3763 }
 0x43c   : > { %v2965_v22 = vadd.f32 0.5, %v2963_v9  ;;  %v3766_v43 = vpop.eup %3765  ;;  %v2964_v47 = vmul.f32 0.5, %v3764_v6 }
 0x43d   : > { %v2973_v12 = vadd.f32 0.5, %v2971_v10  ;;  %v3768_v13 = vpop.eup %3767 }
 0x43e   : > { %v2987_v54 = vmul.f32 %v3766_v43, %v2965_v22  ;;  %v2966_v51 = vadd.f32 0.5, %v2964_v47  ;;  %v2972_v3 = vmul.f32 0.5, %v3768_v13  ;;  %v3770_v60 = vpop.eup %3769 }
 0x43f   : > { %v2985_v8 = vmul.f32 %v2973_v12, %v4808_v53  ;;  %v3772_v4 = vpop.eup %3771 }
 0x440   : > { %v2974_v55 = vadd.f32 0.5, %v2972_v3  ;;  %v2988_v61 = vmul.f32 %v3770_v60, %v2966_v51  ;;  %v2981_v0 = vmul.f32 0.5, %v3772_v4  ;;  %v3774_v1 = vpop.eup %3773 }
 0x441   : > { %v2989_v48 = vadd.f32 %v2987_v54, %v2985_v8  ;;  %v2982_v53 = vmul.f32 0.5, %v3774_v1 }
 0x442   : > { %v2986_v62 = vmul.f32 %v2974_v55, %v4816_v57  ;;  %v2983_v35 = vadd.f32 0.5, %v2981_v0 }
 0x443   : > { %3775 = vtanh.f32 %v2989_v48  ;;  %3003 = vst [vmem:[#allocation5] sm:$0xff] %v2989_v48  ;;  %v2984_v16 = vadd.f32 0.5, %v2982_v53 }
 0x444   : > { %v2990_v21 = vadd.f32 %v2988_v61, %v2986_v62 }
 0x446   : > { %3777 = vtanh.f32 %v2990_v21  ;;  %3004 = vst [vmem:[#allocation5 + $0x8] sm:$0xff] %v2990_v21 }
 0x44d   : > { %v3776_v14 = vpop.eup %3775 }
 0x44e   : > { %v2993_v15 = vmul.f32 %v3776_v14, %v2983_v35 }
 0x450   : > { %v3778_v17 = vpop.eup %3777 }
 0x451   : > { %v2994_v18 = vmul.f32 %v3778_v17, %v2984_v16 }
 0x453   : > { %v2995_v7 = vpack.c.bf16 %v2994_v18, %v2993_v15 }
 0x455   : > { %2998 = vst [vmem:[%s3846_s13] sm:$0xff] %v2995_v7  ;;  %3002 = vst [vmem:[#allocation4] sm:$0xff] %v2995_v7 }
 0x456 PF: > { %s16_s18 = sadd.s32 1, %s3785_s18  }
 0x457   : > { %p13_p6 = scmp.ge.s32.totalorder %s16_s18, 5  }
 0x459   :  { %15 = sbr.rel (!%p13_p6) target bundleno = 1 (0x1), region = 97 }

// kernel: blstm_forward.3
= control target key start
LH: loop header
LB: loop body
LE: loop exit
PB: predicated region body
PF: predicated region fallthrough
CT: control target
= control target key end

     0   :  { %s3980_s18 = smov 0   ;;  %s5011_s0 = inlined_call_operand.vmem [shape: bf16[12,16,512], index: 0, kind: input, shape index: {}]   ;;  %s5012_s1 = inlined_call_operand.vmem [shape: bf16[12,16,512], index: 1, kind: input, shape index: {}]   ;;  %s5013_s2 = inlined_call_operand.vmem [shape: bf16[128,512], index: 2, kind: input, shape index: {}]   ;;  %s5014_s3 = inlined_call_operand.vmem [shape: bf16[128,512], index: 3, kind: input, shape index: {}]   ;;  %s5015_s4 = inlined_call_operand.vmem [shape: bf16[12,16,128], index: 4, kind: output, shape index: {0}]   ;;  %s5016_s5 = inlined_call_operand.vmem [shape: bf16[12,16,128], index: 5, kind: output, shape index: {1}]  }
   0x1 LB: > { %s3182_s19 = sadd.s32 4294967295, %s3945_s18   ;;  %p3186_p0 = scmp.ge.s32.totalorder %s3945_s18, 1  ;;  %s3945_s18 = sphi %s3980_s18, %s16_s18  }
   0x2   : > { %p210_p1 = scmp.lt.s32.totalorder %s3945_s18, 4 }
   0x4   : > { %p211_p2 = pnand %p3186_p0, %p210_p1 }
   0x6   : > { %214 = sbr.rel (%p211_p2) target bundleno = 1110 (0x456), region = 36 }
   0xd   : > { %s3187_s20 = sshll.u32 %s3182_s19, 2  ;;  %s261_s21 = ssub.s32 2, %s3182_s19 }
   0xe   : > { %p255_p3 = scmp.lt.s32.totalorder %s3187_s20, 11  ;;  %s3190_s22 = sshll.u32 %s261_s21, 2 }
   0xf   : > { %p263_p4 = scmp.lt.s32.totalorder %s3190_s22, 11  ;;  %p3199_p5 = scmp.ne.s32.totalorder %s3182_s19, 0 }
  0x10   : > { %s5069_s20 = smov (!%p255_p3, %s3187_s20), 11  ;;  %v3947_v0 = vmov (!%p3199_p5), 0   ;;  %v3948_v1 = vmov (!%p3199_p5), 0.0  }
  0x11   : > { %s5071_s22 = smov (!%p263_p4, %s3190_s22), 11  ;;  %s3510_s23 = sshll.u32 %s5069_s20, 5  ;;  %291 = vst [vmem:[#allocation2] sm:$0xff] (!%p3199_p5), %v3947_v0  ;;  %294 = vst [vmem:[#allocation4] sm:$0xff] (!%p3199_p5), %v3947_v0 }
  0x12   : > { %s3512_s24 = sshll.u32 %s5069_s20, 3  ;;  %s3991_s27 = scalar_lea.vmem %s5011_s0, %s3510_s23  ;;  %292 = vst [vmem:[#allocation3] sm:$0xff] (!%p3199_p5), %v3948_v1  ;;  %293 = vst [vmem:[#allocation3 + $0x8] sm:$0xff] (!%p3199_p5), %v3948_v1 }
  0x13   : > { %s3511_s28 = sshll.u32 %s5071_s22, 5  ;;  %s4001_s9 = scalar_lea.vmem %s5015_s4, %s3512_s24  ;;  %295 = vst [vmem:[#allocation5] sm:$0xff] (!%p3199_p5), %v3948_v1  ;;  %296 = vst [vmem:[#allocation5 + $0x8] sm:$0xff] (!%p3199_p5), %v3948_v1 }
  0x14   : > { %s3996_s6 = scalar_lea.vmem %s5012_s1, %s3511_s28  ;;  %s3513_s10 = sshll.u32 %s5071_s22, 3 }
  0x15   : > { %s4006_s13 = scalar_lea.vmem %s5016_s5, %s3513_s10  ;;  %290 = sbr.rel (%p3199_p5) target bundleno = 28 (0x1c), region = 40 }
  0x1c PF: > { %v4011_v2 = vld [vmem:[%s5013_s2 + $0x4] ss:$16 sps:$4 sm:$0xff]   ;;  %v4016_v3 = vld [vmem:[%s5013_s2] ss:$16 sps:$4 sm:$0xff]   ;;  %v5017_v4 = vmov 0  }
  0x1d   : > { %539 = vmatprep.mubr.bf16.mxu0 %v5017_v4  ;;  %582 = vmatprep.mubr.bf16.mxu1 %v5017_v4  ;;  %v4024_v5 = vld [vmem:[%s5013_s2 + $0x24] ss:$16 sps:$4 sm:$0xff]   ;;  %v4030_v6 = vld [vmem:[%s5013_s2 + $0xc] ss:$16 sps:$4 sm:$0xff]   ;;  %v4035_v7 = vld [vmem:[%s5013_s2 + $0x20] ss:$16 sps:$4 sm:$0xff]  }
  0x1e   : > { %507 = vmatprep.subr.bf16.mxu0 %v4011_v2  ;;  %v4040_v8 = vld [vmem:[%s5013_s2 + $0x8] ss:$16 sps:$4 sm:$0xff]   ;;  %v4046_v9 = vld [vmem:[%s5013_s2 + $0x44] ss:$16 sps:$4 sm:$0xff]   ;;  %550 = vmatprep.subr.bf16.mxu1 %v4030_v6  ;;  %v4052_v10 = vld [vmem:[%s5013_s2 + $0x2c] ss:$16 sps:$4 sm:$0xff]  }
  0x1f   : > { %508 = vmatpush1.bf16.msra.mxu0 %v4016_v3  ;;  %551 = vmatpush1.bf16.msra.mxu1 %v4040_v8  ;;  %v4058_v11 = vld [vmem:[%s5013_s2 + $0x28] ss:$16 sps:$4 sm:$0xff]   ;;  %v4065_v12 = vld [vmem:[%s5013_s2 + $0x40] ss:$16 sps:$4 sm:$0xff]   ;;  %v4071_v13 = vld [vmem:[%s5013_s2 + $0x64] ss:$16 sps:$4 sm:$0xff]  }
  0x20   : > { %509 = vmatprep.subr.bf16.mxu0 %v4024_v5  ;;  %552 = vmatprep.subr.bf16.mxu1 %v4052_v10  ;;  %v4076_v14 = vld [vmem:[%s5013_s2 + $0x4c] ss:$16 sps:$4 sm:$0xff]   ;;  %v4082_v15 = vld [vmem:[%s5013_s2 + $0x48] ss:$16 sps:$4 sm:$0xff]   ;;  %v4089_v16 = vld [vmem:[%s5013_s2 + $0x60] ss:$16 sps:$4 sm:$0xff]  }
  0x21   : > { %v4094_v17 = vld [vmem:[%s5013_s2 + $0x6c] ss:$16 sps:$4 sm:$0xff]   ;;  %v4100_v18 = vld [vmem:[%s5013_s2 + $0x84] ss:$16 sps:$4 sm:$0xff]   ;;  %v4106_v19 = vld [vmem:[%s5013_s2 + $0x80] ss:$16 sps:$4 sm:$0xff]  }
  0x22   : > { %v4111_v20 = vld [vmem:[%s5013_s2 + $0x68] ss:$16 sps:$4 sm:$0xff]   ;;  %v4118_v21 = vld [vmem:[%s5013_s2 + $0x8c] ss:$16 sps:$4 sm:$0xff]   ;;  %v4124_v22 = vld [vmem:[%s5013_s2 + $0xa4] ss:$16 sps:$4 sm:$0xff]  }
  0x23   : > { %510 = vmatpush1.bf16.msra.mxu0 %v4035_v7  ;;  %553 = vmatpush1.bf16.msra.mxu1 %v4058_v11  ;;  %v4130_v23 = vld [vmem:[%s5013_s2 + $0x88] ss:$16 sps:$4 sm:$0xff]   ;;  %v4137_v24 = vld [vmem:[%s5013_s2 + $0xa0] ss:$16 sps:$4 sm:$0xff]   ;;  %v4142_v25 = vld [vmem:[%s5013_s2 + $0xac] ss:$16 sps:$4 sm:$0xff]  }
  0x24   : > { %511 = vmatprep.subr.bf16.mxu0 %v4046_v9  ;;  %554 = vmatprep.subr.bf16.mxu1 %v4076_v14  ;;  %v4148_v26 = vld [vmem:[%s5013_s2 + $0xc4] ss:$16 sps:$4 sm:$0xff]   ;;  %v4154_v27 = vld [vmem:[%s5013_s2 + $0xc0] ss:$16 sps:$4 sm:$0xff]   ;;  %v4159_v28 = vld [vmem:[%s5013_s2 + $0xa8] ss:$16 sps:$4 sm:$0xff]  }
  0x25   : > { %v4166_v29 = vld [vmem:[%s5013_s2 + $0xcc] ss:$16 sps:$4 sm:$0xff]   ;;  %v4172_v30 = vld [vmem:[%s5013_s2 + $0xe4] ss:$16 sps:$4 sm:$0xff]   ;;  %v4178_v31 = vld [vmem:[%s5013_s2 + $0xe0] ss:$16 sps:$4 sm:$0xff]  }
  0x26   : > { %v4183_v32 = vld [vmem:[%s5013_s2 + $0xc8] ss:$16 sps:$4 sm:$0xff]   ;;  %v4190_v33 = vld [vmem:[%s5013_s2 + $0xec] ss:$16 sps:$4 sm:$0xff]   ;;  %v4196_v34 = vld [vmem:[%s5014_s3 + $0x4] ss:$16 sps:$4 sm:$0xff]  }
  0x27   : > { %512 = vmatpush1.bf16.msra.mxu0 %v4065_v12  ;;  %555 = vmatpush1.bf16.msra.mxu1 %v4082_v15  ;;  %v297_v35 = vld [vmem:[#allocation2] sm:$0xff]  ;;  %v4207_v37 = vld [vmem:[%s5013_s2 + $0xe8] ss:$16 sps:$4 sm:$0xff]   ;;  %v4214_v38 = vld [vmem:[%s5014_s3 + $0xc] ss:$16 sps:$4 sm:$0xff]  }
  0x28   : > { %513 = vmatprep.subr.bf16.mxu0 %v4071_v13  ;;  %556 = vmatprep.subr.bf16.mxu1 %v4094_v17  ;;  %v4202_v36 = vld [vmem:[%s5014_s3] ss:$16 sps:$4 sm:$0xff]   ;;  %v4220_v39 = vld [vmem:[%s5014_s3 + $0x24] ss:$16 sps:$4 sm:$0xff]   ;;  %v4231_v41 = vld [vmem:[%s5014_s3 + $0x8] ss:$16 sps:$4 sm:$0xff]  }
  0x29   : > { %v4226_v40 = vld [vmem:[%s5014_s3 + $0x20] ss:$16 sps:$4 sm:$0xff]   ;;  %v4238_v42 = vld [vmem:[%s5014_s3 + $0x2c] ss:$16 sps:$4 sm:$0xff]   ;;  %v4244_v43 = vld [vmem:[%s5014_s3 + $0x44] ss:$16 sps:$4 sm:$0xff]  }
  0x2a   : > { %v4251_v44 = vld [vmem:[%s5014_s3 + $0x40] ss:$16 sps:$4 sm:$0xff]   ;;  %v4256_v45 = vld [vmem:[%s5014_s3 + $0x28] ss:$16 sps:$4 sm:$0xff]   ;;  %v4264_v46 = vld [vmem:[%s5014_s3 + $0x4c] ss:$16 sps:$4 sm:$0xff]  }
  0x2b   : > { %514 = vmatpush1.bf16.msra.mxu0 %v4089_v16  ;;  %557 = vmatpush1.bf16.msra.mxu1 %v4111_v20  ;;  %v4270_v47 = vld [vmem:[%s5014_s3 + $0x64] ss:$16 sps:$4 sm:$0xff]   ;;  %v4275_v48 = vld [vmem:[%s5014_s3 + $0x60] ss:$16 sps:$4 sm:$0xff]   ;;  %v4281_v49 = vld [vmem:[%s5014_s3 + $0x48] ss:$16 sps:$4 sm:$0xff]  }
  0x2c   : > { %515 = vmatprep.subr.bf16.mxu0 %v4100_v18  ;;  %558 = vmatprep.subr.bf16.mxu1 %v4118_v21  ;;  %v4288_v50 = vld [vmem:[%s5014_s3 + $0x84] ss:$16 sps:$4 sm:$0xff]   ;;  %v4293_v51 = vld [vmem:[%s5014_s3 + $0x6c] ss:$16 sps:$4 sm:$0xff]   ;;  %v4299_v52 = vld [vmem:[%s5014_s3 + $0x68] ss:$16 sps:$4 sm:$0xff]  }
  0x2d   : > { %v4304_v53 = vld [vmem:[%s5014_s3 + $0x80] ss:$16 sps:$4 sm:$0xff]   ;;  %v4309_v54 = vld [vmem:[%s5014_s3 + $0x8c] ss:$16 sps:$4 sm:$0xff]   ;;  %v4315_v55 = vld [vmem:[%s5014_s3 + $0xa4] ss:$16 sps:$4 sm:$0xff]  }
  0x2e   : > { %v4323_v56 = vld [vmem:[%s5014_s3 + $0x88] ss:$16 sps:$4 sm:$0xff]   ;;  %v4328_v57 = vld [vmem:[%s5014_s3 + $0xa0] ss:$16 sps:$4 sm:$0xff]   ;;  %v4333_v58 = vld [vmem:[%s5014_s3 + $0xac] ss:$16 sps:$4 sm:$0xff]  }
  0x2f   : > { %516 = vmatpush1.bf16.msra.mxu0 %v4106_v19  ;;  %559 = vmatpush1.bf16.msra.mxu1 %v4130_v23  ;;  %v4339_v59 = vld [vmem:[%s5014_s3 + $0xc4] ss:$16 sps:$4 sm:$0xff]   ;;  %v4347_v60 = vld [vmem:[%s5014_s3 + $0xa8] ss:$16 sps:$4 sm:$0xff]   ;;  %v4352_v61 = vld [vmem:[%s5014_s3 + $0xc0] ss:$16 sps:$4 sm:$0xff]  }
  0x30   : > { %517 = vmatprep.subr.bf16.mxu0 %v4124_v22  ;;  %560 = vmatprep.subr.bf16.mxu1 %v4142_v25  ;;  %5035 = vst [vmem:[#allocation6_spill] sm:$0xff] %v4339_v59  ;;  %v4357_v62 = vld [vmem:[%s5014_s3 + $0xcc] ss:$16 sps:$4 sm:$0xff]   ;;  %v4363_v63 = vld [vmem:[%s5014_s3 + $0xe4] ss:$16 sps:$4 sm:$0xff]  }
  0x31   : > { %5036 = vst [vmem:[#allocation7_spill] sm:$0xff] %v4363_v63  ;;  %v4371_v0 = vld [vmem:[%s5014_s3 + $0xc8] ss:$16 sps:$4 sm:$0xff]   ;;  %v4376_v1 = vld [vmem:[%s5014_s3 + $0xe0] ss:$16 sps:$4 sm:$0xff]  }
  0x33   : > { %518 = vmatpush1.bf16.msra.mxu0 %v4137_v24  ;;  %561 = vmatpush1.bf16.msra.mxu1 %v4159_v28 }
  0x34   : > { %519 = vmatprep.subr.bf16.mxu0 %v4148_v26  ;;  %562 = vmatprep.subr.bf16.mxu1 %v4166_v29 }
  0x37   : > { %520 = vmatpush1.bf16.msra.mxu0 %v4154_v27  ;;  %563 = vmatpush1.bf16.msra.mxu1 %v4183_v32 }
  0x38   : > { %521 = vmatprep.subr.bf16.mxu0 %v4172_v30  ;;  %564 = vmatprep.subr.bf16.mxu1 %v4190_v33 }
  0x3b   : > { %522 = vmatpush1.bf16.msra.mxu0 %v4178_v31  ;;  %565 = vmatpush1.bf16.msra.mxu1 %v4207_v37 }
  0x3c   : > { %806 = vmatprep.subr.bf16.mxu0 %v4196_v34  ;;  %849 = vmatprep.subr.bf16.mxu1 %v4214_v38 }
  0x3e   : > { %540 = vmatmul.mubr.bf16.vlgmr.msra.gmra.mrb[0].mxu0 %v297_v35  ;;  %583 = vmatmul.mubr.bf16.vlgmr.msra.gmra.mrb[0].mxu1 %v297_v35  ;;  %v4381_v35 = vld [vmem:[%s5014_s3 + $0xec] ss:$16 sps:$4 sm:$0xff]  }
  0x3f   : > { %807 = vmatpush1.bf16.msra.mxu0 %v4202_v36  ;;  %838 = vmatprep.mubr.bf16.mxu0 %v5017_v4 }
  0x40   : > { %808 = vmatprep.subr.bf16.mxu0 %v4220_v39  ;;  %850 = vmatpush1.bf16.msra.mxu1 %v4231_v41 }
  0x41   : > { %881 = vmatprep.mubr.bf16.mxu1 %v5017_v4  ;;  %851 = vmatprep.subr.bf16.mxu1 %v4238_v42  ;;  %v4390_v4 = vld [vmem:[%s5014_s3 + $0xe8] ss:$16 sps:$4 sm:$0xff]  }
  0x43   : > { %809 = vmatpush1.bf16.msra.mxu0 %v4226_v40 }
  0x44   : > { %810 = vmatprep.subr.bf16.mxu0 %v4244_v43  ;;  %852 = vmatpush1.bf16.msra.mxu1 %v4256_v45 }
  0x45   : > { %853 = vmatprep.subr.bf16.mxu1 %v4264_v46 }
  0x47   : > { %811 = vmatpush1.bf16.msra.mxu0 %v4251_v44 }
  0x48   : > { %812 = vmatprep.subr.bf16.mxu0 %v4270_v47  ;;  %854 = vmatpush1.bf16.msra.mxu1 %v4281_v49 }
  0x49   : > { %855 = vmatprep.subr.bf16.mxu1 %v4293_v51 }
  0x4b   : > { %813 = vmatpush1.bf16.msra.mxu0 %v4275_v48 }
  0x4c   : > { %814 = vmatprep.subr.bf16.mxu0 %v4288_v50  ;;  %856 = vmatpush1.bf16.msra.mxu1 %v4299_v52 }
  0x4d   : > { %857 = vmatprep.subr.bf16.mxu1 %v4309_v54 }
  0x4f   : > { %815 = vmatpush1.bf16.msra.mxu0 %v4304_v53 }
  0x50   : > { %816 = vmatprep.subr.bf16.mxu0 %v4315_v55  ;;  %858 = vmatpush1.bf16.msra.mxu1 %v4323_v56 }
  0x51   : > { %859 = vmatprep.subr.bf16.mxu1 %v4333_v58 }
  0x53   : > { %817 = vmatpush1.bf16.msra.mxu0 %v4328_v57 }
  0x54   : > { %818 = vmatprep.subr.bf16.mxu0 %v4339_v59  ;;  %860 = vmatpush1.bf16.msra.mxu1 %v4347_v60  ;;  %v300_v59 = vld [vmem:[#allocation4] sm:$0xff] }
  0x55   : > { %861 = vmatprep.subr.bf16.mxu1 %v4357_v62 }
  0x57   : > { %819 = vmatpush1.bf16.msra.mxu0 %v4352_v61 }
  0x58   : > { %820 = vmatprep.subr.bf16.mxu0 %v4363_v63  ;;  %862 = vmatpush1.bf16.msra.mxu1 %v4371_v0  ;;  %v5037_v63 = vmov 0  }
  0x59   : > { %863 = vmatprep.subr.bf16.mxu1 %v4381_v35 }
  0x5b   : > { %821 = vmatpush1.bf16.msra.mxu0 %v4376_v1 }
  0x5c   : > { %1198 = vmatprep.subr.bf16.mxu0 %v4011_v2  ;;  %864 = vmatpush1.bf16.msra.mxu1 %v4390_v4  ;;  %v303_v2 = vld [vmem:[%s3991_s27] sm:$0xff] }
  0x5d   : > { %1241 = vmatprep.subr.bf16.mxu1 %v4030_v6  ;;  %v308_v6 = vunpack.c.h.bf16 %v303_v2 }
  0x5e   : > { %839 = vmatmul.mubr.bf16.vlgmr.msra.gmra.mrb[4].mxu0 %v300_v59 }
  0x5f   : > { %1199 = vmatpush1.bf16.msra.mxu0 %v4016_v3  ;;  %1230 = vmatprep.mubr.bf16.mxu0 %v5037_v63  ;;  %v305_v3 = vld [vmem:[%s3991_s27 + $0x10] sm:$0xff] }
  0x60   : > { %1200 = vmatprep.subr.bf16.mxu0 %v4024_v5  ;;  %882 = vmatmul.mubr.bf16.vlgmr.msra.gmra.mrb[4].mxu1 %v300_v59  ;;  %v307_v5 = vunpack.c.l.bf16 %v303_v2 }
  0x61   : > { %1242 = vmatpush1.bf16.msra.mxu1 %v4040_v8  ;;  %1273 = vmatprep.mubr.bf16.mxu1 %v5037_v63  ;;  %v311_v8 = vunpack.c.l.bf16 %v305_v3 }
  0x62   : > { %1243 = vmatprep.subr.bf16.mxu1 %v4052_v10  ;;  %v312_v10 = vunpack.c.h.bf16 %v305_v3 }
  0x63   : > { %1201 = vmatpush1.bf16.msra.mxu0 %v4035_v7  ;;  %v304_v7 = vld [vmem:[%s3991_s27 + $0x8] sm:$0xff] }
  0x64   : > { %1202 = vmatprep.subr.bf16.mxu0 %v4046_v9 }
  0x65   : > { %1244 = vmatpush1.bf16.msra.mxu1 %v4058_v11  ;;  %v306_v11 = vld [vmem:[%s3991_s27 + $0x18] sm:$0xff] }
  0x66   : > { %1245 = vmatprep.subr.bf16.mxu1 %v4076_v14  ;;  %v309_v14 = vunpack.c.l.bf16 %v304_v7 }
  0x67   : > { %1203 = vmatpush1.bf16.msra.mxu0 %v4065_v12 }
  0x68   : > { %1204 = vmatprep.subr.bf16.mxu0 %v4071_v13 }
  0x69   : > { %1246 = vmatpush1.bf16.msra.mxu1 %v4082_v15 }
  0x6a   : > { %1247 = vmatprep.subr.bf16.mxu1 %v4094_v17 }
  0x6b   : > { %1205 = vmatpush1.bf16.msra.mxu0 %v4089_v16 }
  0x6c   : > { %1206 = vmatprep.subr.bf16.mxu0 %v4100_v18 }
  0x6d   : > { %1248 = vmatpush1.bf16.msra.mxu1 %v4111_v20 }
  0x6e   : > { %1249 = vmatprep.subr.bf16.mxu1 %v4118_v21  ;;  %v313_v21 = vunpack.c.l.bf16 %v306_v11 }
  0x6f   : > { %1207 = vmatpush1.bf16.msra.mxu0 %v4106_v19 }
  0x70   : > { %1208 = vmatprep.subr.bf16.mxu0 %v4124_v22 }
  0x71   : > { %1250 = vmatpush1.bf16.msra.mxu1 %v4130_v23 }
  0x72   : > { %1251 = vmatprep.subr.bf16.mxu1 %v4142_v25 }
  0x73   : > { %1209 = vmatpush1.bf16.msra.mxu0 %v4137_v24 }
  0x74   : > { %1210 = vmatprep.subr.bf16.mxu0 %v4148_v26 }
  0x75   : > { %1252 = vmatpush1.bf16.msra.mxu1 %v4159_v28 }
  0x76   : > { %1253 = vmatprep.subr.bf16.mxu1 %v4166_v29  ;;  %v310_v29 = vunpack.c.h.bf16 %v304_v7 }
  0x77   : > { %1211 = vmatpush1.bf16.msra.mxu0 %v4154_v27 }
  0x78   : > { %1212 = vmatprep.subr.bf16.mxu0 %v4172_v30 }
  0x79   : > { %1254 = vmatpush1.bf16.msra.mxu1 %v4183_v32  ;;  %v314_v32 = vunpack.c.h.bf16 %v306_v11 }
  0x7a   : > { %1255 = vmatprep.subr.bf16.mxu1 %v4190_v33 }
  0x7b   : > { %1213 = vmatpush1.bf16.msra.mxu0 %v4178_v31 }
  0x7c   : > { %1497 = vmatprep.subr.bf16.mxu0 %v4196_v34 }
  0x7d   : > { %1256 = vmatpush1.bf16.msra.mxu1 %v4207_v37 }
  0x7e   : > { %1540 = vmatprep.subr.bf16.mxu1 %v4214_v38 }
 0x111   : > { %v541_v9 = vpop.f32.mrb[0].mxu0  ;;  %v584_v20 = vpop.f32.mrb[0].mxu1 }
 0x112   : > { %v593_v12 = vadd.f32 %v541_v9, %v307_v5  ;;  %v543_v13 = vpop.f32.mrb[1].mxu0  ;;  %v586_v24 = vpop.f32.mrb[1].mxu1  ;;  %v595_v26 = vadd.f32 %v584_v20, %v309_v14 }
 0x113   : > { %v594_v15 = vadd.f32 %v543_v13, %v308_v6  ;;  %v545_v16 = vpop.f32.mrb[2].mxu0  ;;  %v588_v27 = vpop.f32.mrb[2].mxu1  ;;  %v596_v33 = vadd.f32 %v586_v24, %v310_v29  ;;  %v3232_v24 = vld [vmem:[%s3996_s6 + $0x60] sm:$0xff] }
 0x114   : > { %v900_v17 = vmul.f32 0.5, %v593_v12  ;;  %v597_v18 = vadd.f32 %v545_v16, %v311_v8  ;;  %v547_v19 = vpop.f32.mrb[3].mxu0  ;;  %v590_v30 = vpop.f32.mrb[3].mxu1  ;;  %v599_v31 = vadd.f32 %v588_v27, %v313_v21  ;;  %v607_v29 = vunpack.c.h.bf16 %v3232_v24 }
 0x115   : > { %v908_v22 = vmul.f32 0.5, %v594_v15  ;;  %v598_v23 = vadd.f32 %v547_v19, %v312_v10  ;;  %v600_v34 = vadd.f32 %v590_v30, %v314_v32  ;;  %v918_v37 = vmul.f32 0.5, %v596_v33  ;;  %v298_v10 = vld [vmem:[#allocation3] sm:$0xff]  ;;  %v299_v15 = vld [vmem:[#allocation3 + $0x8] sm:$0xff] }
 0x116   : > { %3779 = vtanh.f32 %v900_v17  ;;  %v901_v25 = vmul.f32 0.5, %v597_v18  ;;  %v3233_v30 = vld [vmem:[%s3996_s6 + $0x68] sm:$0xff] }
 0x117   : > { %3781 = vtanh.f32 %v908_v22  ;;  %v909_v28 = vmul.f32 0.5, %v598_v23  ;;  %v919_v59 = vmul.f32 0.5, %v600_v34 }
 0x118   : > { %3783 = vtanh.f32 %v901_v25 }
 0x119   : > { %3785 = vtanh.f32 %v909_v28  ;;  %v606_v28 = vunpack.c.l.bf16 %v3232_v24 }
 0x11a   : > { %3787 = vtanh.f32 %v595_v26  ;;  %v3234_v26 = vld [vmem:[%s3996_s6 + $0x70] sm:$0xff] }
 0x11b   : > { %3789 = vtanh.f32 %v599_v31  ;;  %v610_v31 = vunpack.c.l.bf16 %v3234_v26 }
 0x11c   : > { %3791 = vtanh.f32 %v918_v37  ;;  %v611_v37 = vunpack.c.h.bf16 %v3234_v26 }
 0x11d   : > { %3793 = vtanh.f32 %v919_v59 }
 0x120   : > { %v3780_v38 = vpop.eup %3779 }
 0x121   : > { %v3782_v2 = vpop.eup %3781  ;;  %v904_v3 = vmul.f32 0.5, %v3780_v38  ;;  %v3235_v38 = vld [vmem:[%s3996_s6 + $0x78] sm:$0xff] }
 0x122   : > { %v3784_v5 = vpop.eup %3783  ;;  %v912_v6 = vmul.f32 0.5, %v3782_v2 }
 0x123   : > { %v3786_v8 = vpop.eup %3785  ;;  %v906_v9 = vadd.f32 0.5, %v904_v3  ;;  %v905_v7 = vmul.f32 0.5, %v3784_v5  ;;  %v608_v3 = vunpack.c.l.bf16 %v3233_v30 }
 0x124   : > { %v3788_v12 = vpop.eup %3787  ;;  %v914_v11 = vadd.f32 0.5, %v912_v6  ;;  %v913_v13 = vmul.f32 0.5, %v3786_v8 }
 0x125   : > { %v907_v14 = vadd.f32 0.5, %v905_v7  ;;  %v928_v16 = vmul.f32 %v3788_v12, %v906_v9  ;;  %v3790_v17 = vpop.eup %3789 }
 0x126   : > { %v926_v18 = vmul.f32 %v914_v11, %v298_v10  ;;  %v915_v19 = vadd.f32 0.5, %v913_v13  ;;  %v3792_v25 = vpop.eup %3791  ;;  %v612_v11 = vunpack.c.l.bf16 %v3235_v38 }
 0x127   : > { %v929_v20 = vmul.f32 %v3790_v17, %v907_v14  ;;  %v3794_v27 = vpop.eup %3793  ;;  %v922_v32 = vmul.f32 0.5, %v3792_v25 }
 0x128   : > { %v927_v21 = vmul.f32 %v915_v19, %v299_v15  ;;  %v4436_v22 = vadd.f32 %v928_v16, %v926_v18  ;;  %v923_v33 = vmul.f32 0.5, %v3794_v27 }
 0x129   : > { %v924_v13 = vadd.f32 0.5, %v922_v32 }
 0x12a   : > { %3795 = vtanh.f32 %v4436_v22  ;;  %v4439_v23 = vadd.f32 %v929_v20, %v927_v21  ;;  %v925_v14 = vadd.f32 0.5, %v923_v33  ;;  %v609_v21 = vunpack.c.h.bf16 %v3233_v30 }
 0x12c   : > { %3797 = vtanh.f32 %v4439_v23 }
 0x131   : > { %v840_v34 = vpop.f32.mrb[4].mxu0 }
 0x132   : > { %v892_v59 = vadd.f32 %v840_v34, %v606_v28  ;;  %v842_v2 = vpop.f32.mrb[5].mxu0 }
 0x133   : > { %v893_v5 = vadd.f32 %v842_v2, %v607_v29  ;;  %v844_v6 = vpop.f32.mrb[6].mxu0  ;;  %v883_v12 = vpop.f32.mrb[4].mxu1 }
 0x134   : > { %v3796_v8 = vpop.eup %3795  ;;  %v937_v9 = vmul.f32 0.5, %v892_v59  ;;  %v896_v10 = vadd.f32 %v844_v6, %v610_v31  ;;  %v846_v7 = vpop.f32.mrb[7].mxu0  ;;  %v894_v20 = vadd.f32 %v883_v12, %v608_v3  ;;  %v613_v31 = vunpack.c.h.bf16 %v3235_v38  ;;  %v301_v3 = vld [vmem:[#allocation5] sm:$0xff] }
 0x135   : > { %v945_v15 = vmul.f32 0.5, %v893_v5  ;;  %v897_v16 = vadd.f32 %v846_v7, %v611_v37  ;;  %v885_v17 = vpop.f32.mrb[5].mxu1  ;;  %v934_v25 = vmul.f32 %v3796_v8, %v924_v13 }
 0x136   : > { %v3798_v18 = vpop.eup %3797  ;;  %3799 = vtanh.f32 %v937_v9  ;;  %v938_v19 = vmul.f32 0.5, %v896_v10  ;;  %v887_v24 = vpop.f32.mrb[6].mxu1  ;;  %v895_v33 = vadd.f32 %v885_v17, %v609_v21  ;;  %v4544_v17 = vld [vmem:[%s5013_s2 + $0x4c] ss:$16 sps:$4 sm:$0xff]  }
 0x137   : > { %v935_v26 = vmul.f32 %v3798_v18, %v925_v14  ;;  %3801 = vtanh.f32 %v945_v15  ;;  %v946_v27 = vmul.f32 0.5, %v897_v16  ;;  %v889_v28 = vpop.f32.mrb[7].mxu1  ;;  %v898_v29 = vadd.f32 %v887_v24, %v612_v11  ;;  %v4525_v14 = vld [vmem:[%s5013_s2 + $0x20] ss:$16 sps:$4 sm:$0xff]   ;;  %v4530_v15 = vld [vmem:[%s5013_s2 + $0x28] ss:$16 sps:$4 sm:$0xff]  }
 0x138   : > { %3803 = vtanh.f32 %v938_v19  ;;  %v899_v34 = vadd.f32 %v889_v28, %v613_v31  ;;  %v955_v30 = vmul.f32 0.5, %v895_v33  ;;  %v4539_v16 = vld [vmem:[%s5013_s2 + $0x44] ss:$16 sps:$4 sm:$0xff]   ;;  %v4549_v18 = vld [vmem:[%s5013_s2 + $0x40] ss:$16 sps:$4 sm:$0xff]  }
 0x139   : > { %3805 = vtanh.f32 %v946_v27  ;;  %v936_v32 = vpack.c.bf16 %v935_v26, %v934_v25  ;;  %v4554_v19 = vld [vmem:[%s5013_s2 + $0x48] ss:$16 sps:$4 sm:$0xff]   ;;  %v4568_v21 = vld [vmem:[%s5013_s2 + $0x6c] ss:$16 sps:$4 sm:$0xff]   ;;  %v4573_v24 = vld [vmem:[%s5013_s2 + $0x60] ss:$16 sps:$4 sm:$0xff]  }
 0x13a   : > { %3807 = vtanh.f32 %v894_v20  ;;  %v956_v38 = vmul.f32 0.5, %v899_v34  ;;  %v4563_v20 = vld [vmem:[%s5013_s2 + $0x64] ss:$16 sps:$4 sm:$0xff]   ;;  %v4578_v25 = vld [vmem:[%s5013_s2 + $0x68] ss:$16 sps:$4 sm:$0xff]  }
 0x13b   : > { %3534 = vst [vmem:[%s4001_s9] sm:$0xff] %v936_v32   ;;  %1231 = vmatmul.mubr.bf16.vlgmr.msra.gmra.mrb[8].mxu0 %v936_v32  ;;  %1274 = vmatmul.mubr.bf16.vlgmr.msra.gmra.mrb[8].mxu1 %v936_v32  ;;  %3809 = vtanh.f32 %v898_v29  ;;  %v4587_v26 = vld [vmem:[%s5013_s2 + $0x84] ss:$16 sps:$4 sm:$0xff]   ;;  %v4592_v27 = vld [vmem:[%s5013_s2 + $0x8c] ss:$16 sps:$4 sm:$0xff]   ;;  %v4597_v28 = vld [vmem:[%s5013_s2 + $0x80] ss:$16 sps:$4 sm:$0xff]  }
 0x13c   : > { %1498 = vmatpush1.bf16.msra.mxu0 %v4202_v36  ;;  %1541 = vmatpush1.bf16.msra.mxu1 %v4231_v41  ;;  %3811 = vtanh.f32 %v955_v30  ;;  %v4602_v29 = vld [vmem:[%s5013_s2 + $0x88] ss:$16 sps:$4 sm:$0xff]   ;;  %v4611_v31 = vld [vmem:[%s5013_s2 + $0xa4] ss:$16 sps:$4 sm:$0xff]   ;;  %v4616_v32 = vld [vmem:[%s5013_s2 + $0xac] ss:$16 sps:$4 sm:$0xff]  }
 0x13d   : > { %1499 = vmatprep.subr.bf16.mxu0 %v4220_v39  ;;  %1542 = vmatprep.subr.bf16.mxu1 %v4238_v42  ;;  %3813 = vtanh.f32 %v956_v38  ;;  %v4621_v33 = vld [vmem:[%s5013_s2 + $0xa0] ss:$16 sps:$4 sm:$0xff]   ;;  %v4626_v34 = vld [vmem:[%s5013_s2 + $0xa8] ss:$16 sps:$4 sm:$0xff]   ;;  %v4635_v30 = vld [vmem:[%s5013_s2 + $0xc4] ss:$16 sps:$4 sm:$0xff]  }
 0x13e   : > { %1529 = vmatprep.mubr.bf16.mxu0 %v5037_v63  ;;  %1572 = vmatprep.mubr.bf16.mxu1 %v5037_v63  ;;  %v4645_v38 = vld [vmem:[%s5013_s2 + $0xc8] ss:$16 sps:$4 sm:$0xff]  }
 0x140   : > { %v3800_v37 = vpop.eup %3799  ;;  %1500 = vmatpush1.bf16.msra.mxu0 %v4226_v40  ;;  %1543 = vmatpush1.bf16.msra.mxu1 %v4256_v45  ;;  %v302_v45 = vld [vmem:[#allocation5 + $0x8] sm:$0xff] }
 0x141   : > { %v3802_v59 = vpop.eup %3801  ;;  %v941_v2 = vmul.f32 0.5, %v3800_v37  ;;  %1501 = vmatprep.subr.bf16.mxu0 %v4244_v43  ;;  %1544 = vmatprep.subr.bf16.mxu1 %v4264_v46  ;;  %v4640_v37 = vld [vmem:[%s5013_s2 + $0xc0] ss:$16 sps:$4 sm:$0xff]  }
 0x142   : > { %v3804_v36 = vpop.eup %3803  ;;  %v949_v39 = vmul.f32 0.5, %v3802_v59  ;;  %v4650_v59 = vld [vmem:[%s5013_s2 + $0xcc] ss:$16 sps:$4 sm:$0xff]  }
 0x143   : > { %v3806_v41 = vpop.eup %3805  ;;  %v943_v42 = vadd.f32 0.5, %v941_v2  ;;  %v942_v5 = vmul.f32 0.5, %v3804_v36  ;;  %v4659_v2 = vld [vmem:[%s5013_s2 + $0xe4] ss:$16 sps:$4 sm:$0xff]   ;;  %v4664_v36 = vld [vmem:[%s5013_s2 + $0xec] ss:$16 sps:$4 sm:$0xff]  }
 0x144   : > { %v3808_v6 = vpop.eup %3807  ;;  %v951_v8 = vadd.f32 0.5, %v949_v39  ;;  %v950_v9 = vmul.f32 0.5, %v3806_v41  ;;  %1502 = vmatpush1.bf16.msra.mxu0 %v4251_v44  ;;  %1545 = vmatpush1.bf16.msra.mxu1 %v4281_v49  ;;  %v4669_v39 = vld [vmem:[%s5013_s2 + $0xe0] ss:$16 sps:$4 sm:$0xff]   ;;  %v4674_v41 = vld [vmem:[%s5013_s2 + $0xe8] ss:$16 sps:$4 sm:$0xff]  }
 0x145   : > { %v944_v40 = vadd.f32 0.5, %v942_v5  ;;  %v965_v43 = vmul.f32 %v3808_v6, %v943_v42  ;;  %1503 = vmatprep.subr.bf16.mxu0 %v4270_v47  ;;  %1546 = vmatprep.subr.bf16.mxu1 %v4293_v51  ;;  %v3810_v46 = vpop.eup %3809  ;;  %v5038_v51 = vld [vmem:[#allocation6_spill] sm:$0xff]  ;;  %v3274_v5 = vld [vmem:[%s3991_s27 + $0x20] sm:$0xff] }
 0x146   : > { %v963_v10 = vmul.f32 %v951_v8, %v301_v3  ;;  %v952_v7 = vadd.f32 0.5, %v950_v9  ;;  %v3812_v47 = vpop.eup %3811  ;;  %5040 = vst [vmem:[#allocation6_spill] sm:$0xff] %v4674_v41  ;;  %v4683_v42 = vld [vmem:[%s5014_s3 + $0x4] ss:$16 sps:$4 sm:$0xff]   ;;  %v4688_v3 = vld [vmem:[%s5014_s3 + $0xc] ss:$16 sps:$4 sm:$0xff]   ;;  %v998_v8 = vunpack.c.l.bf16 %v3274_v5 }
 0x147   : > { %v966_v12 = vmul.f32 %v3810_v46, %v944_v40  ;;  %v959_v49 = vmul.f32 0.5, %v3812_v47  ;;  %5042 = vst [vmem:[#allocation8_spill] sm:$0xff] %v4688_v3  ;;  %v3276_v6 = vld [vmem:[%s3991_s27 + $0x30] sm:$0xff]  ;;  %v3275_v9 = vld [vmem:[%s3991_s27 + $0x28] sm:$0xff]  ;;  %v999_v40 = vunpack.c.h.bf16 %v3274_v5 }
 0x148   : > { %v964_v11 = vmul.f32 %v952_v7, %v302_v45  ;;  %v4461_v13 = vadd.f32 %v965_v43, %v963_v10  ;;  %1504 = vmatpush1.bf16.msra.mxu0 %v4275_v48  ;;  %1547 = vmatpush1.bf16.msra.mxu1 %v4299_v52  ;;  %v3814_v48 = vpop.eup %3813  ;;  %v1002_v45 = vunpack.c.l.bf16 %v3276_v6  ;;  %v1003_v10 = vunpack.c.h.bf16 %v3276_v6 }
 0x149   : > { %1505 = vmatprep.subr.bf16.mxu0 %v4288_v50  ;;  %1548 = vmatprep.subr.bf16.mxu1 %v4309_v54  ;;  %v960_v50 = vmul.f32 0.5, %v3814_v48  ;;  %v3277_v48 = vld [vmem:[%s3991_s27 + $0x38] sm:$0xff] }
 0x14a   : > { %3815 = vtanh.f32 %v4461_v13  ;;  %v4468_v44 = vadd.f32 %v966_v12, %v964_v11  ;;  %v1000_v12 = vunpack.c.l.bf16 %v3275_v9 }
 0x14b   : > { %v962_v54 = vadd.f32 0.5, %v960_v50 }
 0x14c   : > { %3817 = vtanh.f32 %v4468_v44  ;;  %1506 = vmatpush1.bf16.msra.mxu0 %v4304_v53  ;;  %1549 = vmatpush1.bf16.msra.mxu1 %v4323_v56  ;;  %v961_v53 = vadd.f32 0.5, %v959_v49 }
 0x14d   : > { %1507 = vmatprep.subr.bf16.mxu0 %v4315_v55  ;;  %1550 = vmatprep.subr.bf16.mxu1 %v4333_v58  ;;  %v5039_v55 = vld [vmem:[#allocation7_spill] sm:$0xff] }
 0x14e   : > { %5041 = vst [vmem:[#allocation7_spill] sm:$0xff] %v4683_v42 }
 0x150   : > { %1508 = vmatpush1.bf16.msra.mxu0 %v4328_v57  ;;  %1551 = vmatpush1.bf16.msra.mxu1 %v4347_v60 }
 0x151   : > { %1509 = vmatprep.subr.bf16.mxu0 %v5038_v51  ;;  %1552 = vmatprep.subr.bf16.mxu1 %v4357_v62  ;;  %v4496_v62 = vld [vmem:[%s5013_s2 + $0xc] ss:$16 sps:$4 sm:$0xff]  }
 0x154   : > { %v3816_v52 = vpop.eup %3815  ;;  %1510 = vmatpush1.bf16.msra.mxu0 %v4352_v61  ;;  %1553 = vmatpush1.bf16.msra.mxu1 %v4371_v0  ;;  %v4491_v61 = vld [vmem:[%s5013_s2 + $0x4] ss:$16 sps:$4 sm:$0xff]   ;;  %v4506_v0 = vld [vmem:[%s5013_s2 + $0x8] ss:$16 sps:$4 sm:$0xff]  }
 0x155   : > { %1511 = vmatprep.subr.bf16.mxu0 %v5039_v55  ;;  %1554 = vmatprep.subr.bf16.mxu1 %v4381_v35  ;;  %v971_v57 = vmul.f32 %v3816_v52, %v961_v53  ;;  %v4520_v35 = vld [vmem:[%s5013_s2 + $0x2c] ss:$16 sps:$4 sm:$0xff]  }
 0x156   : > { %v3818_v56 = vpop.eup %3817 }
 0x157   : > { %v972_v58 = vmul.f32 %v3818_v56, %v962_v54 }
 0x158   : > { %1512 = vmatpush1.bf16.msra.mxu0 %v4376_v1  ;;  %1555 = vmatpush1.bf16.msra.mxu1 %v4390_v4  ;;  %v4501_v4 = vld [vmem:[%s5013_s2] ss:$16 sps:$4 sm:$0xff]   ;;  %v4515_v1 = vld [vmem:[%s5013_s2 + $0x24] ss:$16 sps:$4 sm:$0xff]  }
 0x159   : > { %v973_v60 = vpack.c.bf16 %v972_v58, %v971_v57  ;;  %1890 = vmatprep.subr.bf16.mxu0 %v4491_v61  ;;  %1933 = vmatprep.subr.bf16.mxu1 %v4496_v62  ;;  %v1004_v57 = vunpack.c.l.bf16 %v3277_v48 }
 0x15b   : > { %3570 = vst [vmem:[%s4006_s13 + $0x18] sm:$0xff] %v973_v60   ;;  %1530 = vmatmul.mubr.bf16.vlgmr.msra.gmra.mrb[12].mxu0 %v973_v60  ;;  %1573 = vmatmul.mubr.bf16.vlgmr.msra.gmra.mrb[12].mxu1 %v973_v60 }
 0x15c   : > { %1922 = vmatprep.mubr.bf16.mxu0 %v5037_v63  ;;  %1965 = vmatprep.mubr.bf16.mxu1 %v5037_v63 }
 0x15d   : > { %1891 = vmatpush1.bf16.msra.mxu0 %v4501_v4  ;;  %1934 = vmatpush1.bf16.msra.mxu1 %v4506_v0 }
 0x15e   : > { %1892 = vmatprep.subr.bf16.mxu0 %v4515_v1  ;;  %1935 = vmatprep.subr.bf16.mxu1 %v4520_v35 }
 0x161   : > { %1893 = vmatpush1.bf16.msra.mxu0 %v4525_v14  ;;  %1936 = vmatpush1.bf16.msra.mxu1 %v4530_v15 }
 0x162   : > { %1894 = vmatprep.subr.bf16.mxu0 %v4539_v16  ;;  %1937 = vmatprep.subr.bf16.mxu1 %v4544_v17 }
 0x165   : > { %1895 = vmatpush1.bf16.msra.mxu0 %v4549_v18  ;;  %1938 = vmatpush1.bf16.msra.mxu1 %v4554_v19 }
 0x166   : > { %1896 = vmatprep.subr.bf16.mxu0 %v4563_v20  ;;  %1939 = vmatprep.subr.bf16.mxu1 %v4568_v21 }
 0x169   : > { %1897 = vmatpush1.bf16.msra.mxu0 %v4573_v24  ;;  %1940 = vmatpush1.bf16.msra.mxu1 %v4578_v25 }
 0x16a   : > { %1898 = vmatprep.subr.bf16.mxu0 %v4587_v26  ;;  %1941 = vmatprep.subr.bf16.mxu1 %v4592_v27 }
 0x16d   : > { %1899 = vmatpush1.bf16.msra.mxu0 %v4597_v28  ;;  %1942 = vmatpush1.bf16.msra.mxu1 %v4602_v29 }
 0x16e   : > { %1900 = vmatprep.subr.bf16.mxu0 %v4611_v31  ;;  %1943 = vmatprep.subr.bf16.mxu1 %v4616_v32 }
 0x171   : > { %1901 = vmatpush1.bf16.msra.mxu0 %v4621_v33  ;;  %1944 = vmatpush1.bf16.msra.mxu1 %v4626_v34 }
 0x172   : > { %1902 = vmatprep.subr.bf16.mxu0 %v4635_v30  ;;  %1945 = vmatprep.subr.bf16.mxu1 %v4650_v59 }
 0x175   : > { %1903 = vmatpush1.bf16.msra.mxu0 %v4640_v37  ;;  %1946 = vmatpush1.bf16.msra.mxu1 %v4645_v38 }
 0x176   : > { %1904 = vmatprep.subr.bf16.mxu0 %v4659_v2  ;;  %1947 = vmatprep.subr.bf16.mxu1 %v4664_v36 }
 0x179   : > { %1905 = vmatpush1.bf16.msra.mxu0 %v4669_v39  ;;  %1948 = vmatpush1.bf16.msra.mxu1 %v4674_v41 }
 0x17a   : > { %2189 = vmatprep.subr.bf16.mxu0 %v4683_v42  ;;  %2232 = vmatprep.subr.bf16.mxu1 %v4688_v3  ;;  %v1005_v3 = vunpack.c.h.bf16 %v3277_v48 }
 0x20e   : > { %v1232_v43 = vpop.f32.mrb[8].mxu0  ;;  %v1275_v46 = vpop.f32.mrb[8].mxu1 }
 0x20f   : > { %v1284_v7 = vadd.f32 %v1232_v43, %v998_v8  ;;  %v1234_v11 = vpop.f32.mrb[9].mxu0  ;;  %v1277_v47 = vpop.f32.mrb[9].mxu1  ;;  %v1286_v60 = vadd.f32 %v1275_v46, %v1000_v12  ;;  %v1001_v8 = vunpack.c.h.bf16 %v3275_v9 }
 0x210   : > { %v1285_v49 = vadd.f32 %v1234_v11, %v999_v40  ;;  %v1236_v50 = vpop.f32.mrb[10].mxu0  ;;  %v1279_v51 = vpop.f32.mrb[10].mxu1 }
 0x211   : > { %v1591_v52 = vmul.f32 0.5, %v1284_v7  ;;  %v1288_v53 = vadd.f32 %v1236_v50, %v1002_v45  ;;  %v1238_v54 = vpop.f32.mrb[11].mxu0  ;;  %v1281_v55 = vpop.f32.mrb[11].mxu1  ;;  %v1290_v43 = vadd.f32 %v1279_v51, %v1004_v57  ;;  %v1287_v40 = vadd.f32 %v1277_v47, %v1001_v8 }
 0x212   : > { %v1599_v56 = vmul.f32 0.5, %v1285_v49  ;;  %v1289_v58 = vadd.f32 %v1238_v54, %v1003_v10  ;;  %v1291_v7 = vadd.f32 %v1281_v55, %v1005_v3 }
 0x213   : > { %3819 = vtanh.f32 %v1591_v52  ;;  %v1592_v5 = vmul.f32 0.5, %v1288_v53  ;;  %v1609_v49 = vmul.f32 0.5, %v1287_v40 }
 0x214   : > { %3821 = vtanh.f32 %v1599_v56  ;;  %v1600_v6 = vmul.f32 0.5, %v1289_v58  ;;  %v1610_v10 = vmul.f32 0.5, %v1291_v7 }
 0x215   : > { %3823 = vtanh.f32 %v1592_v5  ;;  %v3310_v5 = vld [vmem:[%s3996_s6 + $0x40] sm:$0xff] }
 0x216   : > { %3825 = vtanh.f32 %v1286_v60  ;;  %v1298_v40 = vunpack.c.h.bf16 %v3310_v5 }
 0x217   : > { %3827 = vtanh.f32 %v1600_v6  ;;  %v3312_v6 = vld [vmem:[%s3996_s6 + $0x50] sm:$0xff] }
 0x218   : > { %3829 = vtanh.f32 %v1290_v43  ;;  %v3311_v43 = vld [vmem:[%s3996_s6 + $0x48] sm:$0xff] }
 0x219   : > { %3831 = vtanh.f32 %v1609_v49  ;;  %v1302_v49 = vunpack.c.h.bf16 %v3312_v6 }
 0x21a   : > { %3833 = vtanh.f32 %v1610_v10 }
 0x21d   : > { %v3820_v45 = vpop.eup %3819 }
 0x21e   : > { %v3822_v11 = vpop.eup %3821  ;;  %v1595_v50 = vmul.f32 0.5, %v3820_v45  ;;  %v1301_v45 = vunpack.c.l.bf16 %v3312_v6 }
 0x21f   : > { %v1603_v42 = vmul.f32 0.5, %v3822_v11  ;;  %v3824_v52 = vpop.eup %3823 }
 0x220   : > { %v1597_v46 = vadd.f32 0.5, %v1595_v50  ;;  %v3826_v12 = vpop.eup %3825  ;;  %v1596_v9 = vmul.f32 0.5, %v3824_v52 }
 0x221   : > { %v1605_v53 = vadd.f32 0.5, %v1603_v42  ;;  %v3828_v51 = vpop.eup %3827 }
 0x222   : > { %v1619_v54 = vmul.f32 %v3826_v12, %v1597_v46  ;;  %v1598_v3 = vadd.f32 0.5, %v1596_v9  ;;  %v1604_v48 = vmul.f32 0.5, %v3828_v51  ;;  %v3830_v55 = vpop.eup %3829  ;;  %v3313_v12 = vld [vmem:[%s3996_s6 + $0x58] sm:$0xff] }
 0x223   : > { %v1617_v47 = vmul.f32 %v1605_v53, %v4436_v22  ;;  %v1297_v22 = vunpack.c.l.bf16 %v3310_v5  ;;  %v3832_v8 = vpop.eup %3831 }
 0x224   : > { %v1606_v57 = vadd.f32 0.5, %v1604_v48  ;;  %v1620_v58 = vmul.f32 %v3830_v55, %v1598_v3  ;;  %v3834_v7 = vpop.eup %3833  ;;  %v1613_v53 = vmul.f32 0.5, %v3832_v8 }
 0x225   : > { %v4697_v56 = vadd.f32 %v1619_v54, %v1617_v47  ;;  %v1614_v9 = vmul.f32 0.5, %v3834_v7 }
 0x226   : > { %v1618_v60 = vmul.f32 %v1606_v57, %v4439_v23  ;;  %v1299_v23 = vunpack.c.l.bf16 %v3311_v43 }
 0x227   : > { %5043 = vst [vmem:[#allocation9_spill] sm:$0xff] %v4697_v56  ;;  %3835 = vtanh.f32 %v4697_v56  ;;  %v1616_v56 = vadd.f32 0.5, %v1614_v9  ;;  %v4751_v9 = vld [vmem:[%s5014_s3 + $0x4c] ss:$16 sps:$4 sm:$0xff]  }
 0x228   : > { %v4702_v42 = vadd.f32 %v1620_v58, %v1618_v60  ;;  %v1303_v60 = vunpack.c.l.bf16 %v3313_v12 }
 0x22a   : > { %5044 = vst [vmem:[#allocation10_spill] sm:$0xff] %v4702_v42  ;;  %3837 = vtanh.f32 %v4702_v42 }
 0x22e   : > { %v1531_v11 = vpop.f32.mrb[12].mxu0  ;;  %v1574_v50 = vpop.f32.mrb[12].mxu1 }
 0x22f   : > { %v1583_v10 = vadd.f32 %v1531_v11, %v1297_v22  ;;  %v1533_v52 = vpop.f32.mrb[13].mxu0  ;;  %v1576_v46 = vpop.f32.mrb[13].mxu1  ;;  %v1585_v6 = vadd.f32 %v1574_v50, %v1299_v23  ;;  %v1615_v11 = vadd.f32 0.5, %v1613_v53  ;;  %v4716_v50 = vld [vmem:[%s5014_s3 + $0x8] ss:$16 sps:$4 sm:$0xff]  }
 0x230   : > { %v1584_v51 = vadd.f32 %v1533_v52, %v1298_v40  ;;  %v1535_v54 = vpop.f32.mrb[14].mxu0  ;;  %v1578_v47 = vpop.f32.mrb[14].mxu1  ;;  %v1300_v40 = vunpack.c.h.bf16 %v3311_v43  ;;  %v4739_v53 = vld [vmem:[%s5014_s3 + $0x28] ss:$16 sps:$4 sm:$0xff]  }
 0x231   : > { %v1628_v3 = vmul.f32 0.5, %v1583_v10  ;;  %v1587_v48 = vadd.f32 %v1535_v54, %v1301_v45  ;;  %v1537_v55 = vpop.f32.mrb[15].mxu0  ;;  %v1580_v57 = vpop.f32.mrb[15].mxu1  ;;  %v1589_v45 = vadd.f32 %v1578_v47, %v1303_v60  ;;  %v1304_v10 = vunpack.c.h.bf16 %v3313_v12 }
 0x232   : > { %v1636_v58 = vmul.f32 0.5, %v1584_v51  ;;  %v1588_v5 = vadd.f32 %v1537_v55, %v1302_v49  ;;  %v3836_v42 = vpop.eup %3835  ;;  %v4711_v49 = vld [vmem:[%s5014_s3] ss:$16 sps:$4 sm:$0xff]   ;;  %v1586_v43 = vadd.f32 %v1576_v46, %v1300_v40  ;;  %v4746_v46 = vld [vmem:[%s5014_s3 + $0x44] ss:$16 sps:$4 sm:$0xff]  }
 0x233   : > { %3839 = vtanh.f32 %v1628_v3  ;;  %v1629_v22 = vmul.f32 0.5, %v1587_v48  ;;  %v1625_v7 = vmul.f32 %v3836_v42, %v1615_v11  ;;  %v4726_v42 = vld [vmem:[%s5014_s3 + $0x2c] ss:$16 sps:$4 sm:$0xff]   ;;  %v1590_v12 = vadd.f32 %v1580_v57, %v1304_v10  ;;  %v4760_v57 = vld [vmem:[%s5014_s3 + $0x40] ss:$16 sps:$4 sm:$0xff]  }
 0x234   : > { %3841 = vtanh.f32 %v1636_v58  ;;  %v1637_v41 = vmul.f32 0.5, %v1588_v5  ;;  %v3838_v8 = vpop.eup %3837  ;;  %v1646_v3 = vmul.f32 0.5, %v1586_v43  ;;  %v4765_v58 = vld [vmem:[%s5014_s3 + $0x48] ss:$16 sps:$4 sm:$0xff]   ;;  %v4785_v43 = vld [vmem:[%s5014_s3 + $0x60] ss:$16 sps:$4 sm:$0xff]  }
 0x235   : > { %v1626_v52 = vmul.f32 %v3838_v8, %v1616_v56  ;;  %3843 = vtanh.f32 %v1629_v22  ;;  %v4721_v56 = vld [vmem:[%s5014_s3 + $0x24] ss:$16 sps:$4 sm:$0xff]   ;;  %v1647_v55 = vmul.f32 0.5, %v1590_v12  ;;  %v4777_v22 = vld [vmem:[%s5014_s3 + $0x6c] ss:$16 sps:$4 sm:$0xff]  }
 0x236   : > { %3845 = vtanh.f32 %v1585_v6  ;;  %v4772_v6 = vld [vmem:[%s5014_s3 + $0x64] ss:$16 sps:$4 sm:$0xff]   ;;  %v4790_v12 = vld [vmem:[%s5014_s3 + $0x68] ss:$16 sps:$4 sm:$0xff]  }
 0x237   : > { %3847 = vtanh.f32 %v1637_v41  ;;  %v1627_v23 = vpack.c.bf16 %v1626_v52, %v1625_v7  ;;  %v4734_v41 = vld [vmem:[%s5014_s3 + $0x20] ss:$16 sps:$4 sm:$0xff]  }
 0x238   : > { %3849 = vtanh.f32 %v1589_v45 }
 0x239   : > { %3571 = vst [vmem:[%s4001_s9 + $0x8] sm:$0xff] %v1627_v23   ;;  %1923 = vmatmul.mubr.bf16.vlgmr.msra.gmra.mrb[16].mxu0 %v1627_v23  ;;  %1966 = vmatmul.mubr.bf16.vlgmr.msra.gmra.mrb[16].mxu1 %v1627_v23  ;;  %3851 = vtanh.f32 %v1646_v3 }
 0x23a   : > { %2190 = vmatpush1.bf16.msra.mxu0 %v4711_v49  ;;  %2233 = vmatpush1.bf16.msra.mxu1 %v4716_v50  ;;  %3853 = vtanh.f32 %v1647_v55 }
 0x23b   : > { %2191 = vmatprep.subr.bf16.mxu0 %v4721_v56  ;;  %2234 = vmatprep.subr.bf16.mxu1 %v4726_v42 }
 0x23c   : > { %2221 = vmatprep.mubr.bf16.mxu0 %v5037_v63  ;;  %2264 = vmatprep.mubr.bf16.mxu1 %v5037_v63 }
 0x23d   : > { %v3840_v51 = vpop.eup %3839 }
 0x23e   : > { %v3842_v54 = vpop.eup %3841  ;;  %v1632_v47 = vmul.f32 0.5, %v3840_v51  ;;  %2192 = vmatpush1.bf16.msra.mxu0 %v4734_v41  ;;  %2235 = vmatpush1.bf16.msra.mxu1 %v4739_v53 }
 0x23f   : > { %v1640_v48 = vmul.f32 0.5, %v3842_v54  ;;  %v3844_v60 = vpop.eup %3843  ;;  %2193 = vmatprep.subr.bf16.mxu0 %v4746_v46  ;;  %2236 = vmatprep.subr.bf16.mxu1 %v4751_v9  ;;  %v4802_v54 = vld [vmem:[%s5014_s3 + $0x8c] ss:$16 sps:$4 sm:$0xff]  }
 0x240   : > { %v1634_v5 = vadd.f32 0.5, %v1632_v47  ;;  %v3846_v11 = vpop.eup %3845  ;;  %v1633_v40 = vmul.f32 0.5, %v3844_v60  ;;  %v4812_v60 = vld [vmem:[%s5014_s3 + $0x80] ss:$16 sps:$4 sm:$0xff]  }
 0x241   : > { %v1642_v8 = vadd.f32 0.5, %v1640_v48  ;;  %v3848_v7 = vpop.eup %3847 }
 0x242   : > { %v1656_v52 = vmul.f32 %v3846_v11, %v1634_v5  ;;  %v1635_v10 = vadd.f32 0.5, %v1633_v40  ;;  %v1641_v23 = vmul.f32 0.5, %v3848_v7  ;;  %2194 = vmatpush1.bf16.msra.mxu0 %v4760_v57  ;;  %2237 = vmatpush1.bf16.msra.mxu1 %v4765_v58  ;;  %v3850_v51 = vpop.eup %3849  ;;  %v4817_v5 = vld [vmem:[%s5014_s3 + $0x88] ss:$16 sps:$4 sm:$0xff]   ;;  %v4829_v11 = vld [vmem:[%s5014_s3 + $0xac] ss:$16 sps:$4 sm:$0xff]  }
 0x243   : > { %v1654_v45 = vmul.f32 %v1642_v8, %v4461_v13  ;;  %2195 = vmatprep.subr.bf16.mxu0 %v4772_v6  ;;  %2238 = vmatprep.subr.bf16.mxu1 %v4777_v22  ;;  %v4797_v13 = vld [vmem:[%s5014_s3 + $0x84] ss:$16 sps:$4 sm:$0xff]   ;;  %5045 = vst [vmem:[#allocation11_spill] sm:$0xff] %v4817_v5  ;;  %5047 = vst [vmem:[#allocation13_spill] sm:$0xff] %v4829_v11  ;;  %v4840_v40 = vld [vmem:[%s5014_s3 + $0xa0] ss:$16 sps:$4 sm:$0xff]  }
 0x244   : > { %v1643_v3 = vadd.f32 0.5, %v1641_v23  ;;  %v1657_v48 = vmul.f32 %v3850_v51, %v1635_v10  ;;  %5048 = vst [vmem:[#allocation14_spill] sm:$0xff] %v4840_v40  ;;  %v4845_v7 = vld [vmem:[%s5014_s3 + $0xa8] ss:$16 sps:$4 sm:$0xff]   ;;  %v4857_v10 = vld [vmem:[%s5014_s3 + $0xcc] ss:$16 sps:$4 sm:$0xff]  }
 0x245   : > { %v4804_v47 = vadd.f32 %v1656_v52, %v1654_v45  ;;  %5049 = vst [vmem:[#allocation15_spill] sm:$0xff] %v4845_v7  ;;  %v3852_v52 = vpop.eup %3851  ;;  %v4852_v45 = vld [vmem:[%s5014_s3 + $0xc4] ss:$16 sps:$4 sm:$0xff]   ;;  %5051 = vst [vmem:[#allocation17_spill] sm:$0xff] %v4857_v10  ;;  %v4864_v51 = vld [vmem:[%s5014_s3 + $0xc0] ss:$16 sps:$4 sm:$0xff]  }
 0x246   : > { %v1655_v55 = vmul.f32 %v1643_v3, %v4468_v44  ;;  %2196 = vmatpush1.bf16.msra.mxu0 %v4785_v43  ;;  %2239 = vmatpush1.bf16.msra.mxu1 %v4790_v12  ;;  %v4824_v44 = vld [vmem:[%s5014_s3 + $0xa4] ss:$16 sps:$4 sm:$0xff]   ;;  %5050 = vst [vmem:[#allocation16_spill] sm:$0xff] %v4852_v45  ;;  %v3854_v23 = vpop.eup %3853  ;;  %5052 = vst [vmem:[#allocation18_spill] sm:$0xff] %v4864_v51  ;;  %v4869_v3 = vld [vmem:[%s5014_s3 + $0xc8] ss:$16 sps:$4 sm:$0xff]  }
 0x247   : > { %2197 = vmatprep.subr.bf16.mxu0 %v4797_v13  ;;  %2240 = vmatprep.subr.bf16.mxu1 %v4802_v54  ;;  %5046 = vst [vmem:[#allocation12_spill] sm:$0xff] %v4824_v44  ;;  %3855 = vtanh.f32 %v4804_v47  ;;  %5053 = vst [vmem:[#allocation19_spill] sm:$0xff] %v4869_v3 }
 0x248   : > { %v4832_v8 = vadd.f32 %v1657_v48, %v1655_v55  ;;  %v1650_v48 = vmul.f32 0.5, %v3852_v52  ;;  %v1651_v55 = vmul.f32 0.5, %v3854_v23  ;;  %v4888_v52 = vld [vmem:[%s5014_s3 + $0xe0] ss:$16 sps:$4 sm:$0xff]   ;;  %v4893_v23 = vld [vmem:[%s5014_s3 + $0xe8] ss:$16 sps:$4 sm:$0xff]  }
 0x24a   : > { %3857 = vtanh.f32 %v4832_v8  ;;  %2198 = vmatpush1.bf16.msra.mxu0 %v4812_v60  ;;  %2241 = vmatpush1.bf16.msra.mxu1 %v4817_v5 }
 0x24b   : > { %2199 = vmatprep.subr.bf16.mxu0 %v4824_v44  ;;  %2242 = vmatprep.subr.bf16.mxu1 %v4829_v11 }
 0x24e   : > { %2200 = vmatpush1.bf16.msra.mxu0 %v4840_v40  ;;  %2243 = vmatpush1.bf16.msra.mxu1 %v4845_v7  ;;  %v4876_v7 = vld [vmem:[%s5014_s3 + $0xe4] ss:$16 sps:$4 sm:$0xff]   ;;  %v4881_v40 = vld [vmem:[%s5014_s3 + $0xec] ss:$16 sps:$4 sm:$0xff]  }
 0x24f   : > { %2201 = vmatprep.subr.bf16.mxu0 %v4852_v45  ;;  %2244 = vmatprep.subr.bf16.mxu1 %v4857_v10  ;;  %v1652_v10 = vadd.f32 0.5, %v1650_v48  ;;  %v1653_v45 = vadd.f32 0.5, %v1651_v55 }
 0x251   : > { %v3856_v11 = vpop.eup %3855 }
 0x252   : > { %2202 = vmatpush1.bf16.msra.mxu0 %v4864_v51  ;;  %2245 = vmatpush1.bf16.msra.mxu1 %v4869_v3  ;;  %v1662_v44 = vmul.f32 %v3856_v11, %v1652_v10 }
 0x253   : > { %2203 = vmatprep.subr.bf16.mxu0 %v4876_v7  ;;  %2246 = vmatprep.subr.bf16.mxu1 %v4881_v40 }
 0x254   : > { %v3858_v51 = vpop.eup %3857 }
 0x255   : > { %v1663_v5 = vmul.f32 %v3858_v51, %v1653_v45 }
 0x256   : > { %2204 = vmatpush1.bf16.msra.mxu0 %v4888_v52  ;;  %2247 = vmatpush1.bf16.msra.mxu1 %v4893_v23 }
 0x257   : > { %v1664_v3 = vpack.c.bf16 %v1663_v5, %v1662_v44  ;;  %2582 = vmatprep.subr.bf16.mxu0 %v4491_v61  ;;  %2625 = vmatprep.subr.bf16.mxu1 %v4496_v62  ;;  %v5054_v61 = vld [vmem:[#allocation6_spill] sm:$0xff]  ;;  %v5055_v62 = vld [vmem:[#allocation7_spill] sm:$0xff] }
 0x259   : > { %3572 = vst [vmem:[%s4006_s13 + $0x10] sm:$0xff] %v1664_v3   ;;  %2222 = vmatmul.mubr.bf16.vlgmr.msra.gmra.mrb[20].mxu0 %v1664_v3  ;;  %2265 = vmatmul.mubr.bf16.vlgmr.msra.gmra.mrb[20].mxu1 %v1664_v3 }
 0x25a   : > { %2583 = vmatpush1.bf16.msra.mxu0 %v4501_v4  ;;  %2626 = vmatpush1.bf16.msra.mxu1 %v4506_v0  ;;  %v5056_v4 = vld [vmem:[#allocation8_spill] sm:$0xff] }
 0x25b   : > { %2584 = vmatprep.subr.bf16.mxu0 %v4515_v1  ;;  %2627 = vmatprep.subr.bf16.mxu1 %v4520_v35  ;;  %v3354_v0 = vld [vmem:[%s3991_s27 + $0x40] sm:$0xff]  ;;  %v3356_v1 = vld [vmem:[%s3991_s27 + $0x50] sm:$0xff] }
 0x25c   : > { %2614 = vmatprep.mubr.bf16.mxu0 %v5037_v63  ;;  %2657 = vmatprep.mubr.bf16.mxu1 %v5037_v63  ;;  %v1690_v35 = vunpack.c.l.bf16 %v3354_v0 }
 0x25e   : > { %2585 = vmatpush1.bf16.msra.mxu0 %v4525_v14  ;;  %2628 = vmatpush1.bf16.msra.mxu1 %v4530_v15  ;;  %v3355_v14 = vld [vmem:[%s3991_s27 + $0x48] sm:$0xff]  ;;  %v1691_v15 = vunpack.c.h.bf16 %v3354_v0 }
 0x25f   : > { %2586 = vmatprep.subr.bf16.mxu0 %v4539_v16  ;;  %2629 = vmatprep.subr.bf16.mxu1 %v4544_v17  ;;  %v1694_v16 = vunpack.c.l.bf16 %v3356_v1 }
 0x262   : > { %2587 = vmatpush1.bf16.msra.mxu0 %v4549_v18  ;;  %2630 = vmatpush1.bf16.msra.mxu1 %v4554_v19  ;;  %v1695_v19 = vunpack.c.h.bf16 %v3356_v1 }
 0x263   : > { %2588 = vmatprep.subr.bf16.mxu0 %v4563_v20  ;;  %2631 = vmatprep.subr.bf16.mxu1 %v4568_v21  ;;  %v1692_v21 = vunpack.c.l.bf16 %v3355_v14 }
 0x266   : > { %2589 = vmatpush1.bf16.msra.mxu0 %v4573_v24  ;;  %2632 = vmatpush1.bf16.msra.mxu1 %v4578_v25 }
 0x267   : > { %2590 = vmatprep.subr.bf16.mxu0 %v4587_v26  ;;  %2633 = vmatprep.subr.bf16.mxu1 %v4592_v27  ;;  %v3357_v26 = vld [vmem:[%s3991_s27 + $0x58] sm:$0xff] }
 0x268   : > { %v1697_v44 = vunpack.c.h.bf16 %v3357_v26 }
 0x26a   : > { %2591 = vmatpush1.bf16.msra.mxu0 %v4597_v28  ;;  %2634 = vmatpush1.bf16.msra.mxu1 %v4602_v29 }
 0x26b   : > { %2592 = vmatprep.subr.bf16.mxu0 %v4611_v31  ;;  %2635 = vmatprep.subr.bf16.mxu1 %v4616_v32 }
 0x26e   : > { %2593 = vmatpush1.bf16.msra.mxu0 %v4621_v33  ;;  %2636 = vmatpush1.bf16.msra.mxu1 %v4626_v34 }
 0x26f   : > { %2594 = vmatprep.subr.bf16.mxu0 %v4635_v30  ;;  %2637 = vmatprep.subr.bf16.mxu1 %v4650_v59 }
 0x272   : > { %2595 = vmatpush1.bf16.msra.mxu0 %v4640_v37  ;;  %2638 = vmatpush1.bf16.msra.mxu1 %v4645_v38  ;;  %v1696_v37 = vunpack.c.l.bf16 %v3357_v26  ;;  %v5058_v26 = vld [vmem:[#allocation10_spill] sm:$0xff] }
 0x273   : > { %2596 = vmatprep.subr.bf16.mxu0 %v4659_v2  ;;  %2639 = vmatprep.subr.bf16.mxu1 %v4664_v36 }
 0x276   : > { %2597 = vmatpush1.bf16.msra.mxu0 %v4669_v39  ;;  %2640 = vmatpush1.bf16.msra.mxu1 %v5054_v61  ;;  %v1693_v39 = vunpack.c.h.bf16 %v3355_v14 }
 0x277   : > { %2880 = vmatprep.subr.bf16.mxu0 %v5055_v62  ;;  %2923 = vmatprep.subr.bf16.mxu1 %v5056_v4 }
 0x30c   : > { %v1924_v17 = vpop.f32.mrb[16].mxu0  ;;  %v1967_v18 = vpop.f32.mrb[16].mxu1 }
 0x30d   : > { %v1976_v20 = vadd.f32 %v1924_v17, %v1690_v35  ;;  %v1926_v24 = vpop.f32.mrb[17].mxu0  ;;  %v1969_v25 = vpop.f32.mrb[17].mxu1  ;;  %v1978_v59 = vadd.f32 %v1967_v18, %v1692_v21 }
 0x30e   : > { %v1977_v27 = vadd.f32 %v1926_v24, %v1691_v15  ;;  %v1928_v28 = vpop.f32.mrb[18].mxu0  ;;  %v1971_v29 = vpop.f32.mrb[18].mxu1  ;;  %v1979_v11 = vadd.f32 %v1969_v25, %v1693_v39 }
 0x30f   : > { %v2283_v31 = vmul.f32 0.5, %v1976_v20  ;;  %v1980_v32 = vadd.f32 %v1928_v28, %v1694_v16  ;;  %v1930_v33 = vpop.f32.mrb[19].mxu0  ;;  %v1973_v34 = vpop.f32.mrb[19].mxu1  ;;  %v1982_v5 = vadd.f32 %v1971_v29, %v1696_v37  ;;  %v5057_v16 = vld [vmem:[#allocation9_spill] sm:$0xff]  ;;  %v3390_v28 = vld [vmem:[%s3996_s6 + $0x20] sm:$0xff] }
 0x310   : > { %v2291_v30 = vmul.f32 0.5, %v1977_v27  ;;  %v1981_v38 = vadd.f32 %v1930_v33, %v1695_v19  ;;  %v1983_v45 = vadd.f32 %v1973_v34, %v1697_v44  ;;  %v2301_v48 = vmul.f32 0.5, %v1979_v11  ;;  %v3391_v34 = vld [vmem:[%s3996_s6 + $0x28] sm:$0xff] }
 0x311   : > { %3859 = vtanh.f32 %v2283_v31  ;;  %v2284_v2 = vmul.f32 0.5, %v1980_v32  ;;  %v3392_v31 = vld [vmem:[%s3996_s6 + $0x30] sm:$0xff]  ;;  %v1989_v32 = vunpack.c.l.bf16 %v3390_v28 }
 0x312   : > { %3861 = vtanh.f32 %v2291_v30  ;;  %v2292_v36 = vmul.f32 0.5, %v1981_v38  ;;  %v2302_v61 = vmul.f32 0.5, %v1983_v45  ;;  %v1990_v30 = vunpack.c.h.bf16 %v3390_v28  ;;  %v3393_v45 = vld [vmem:[%s3996_s6 + $0x38] sm:$0xff] }
 0x313   : > { %3863 = vtanh.f32 %v2284_v2  ;;  %v1993_v38 = vunpack.c.l.bf16 %v3392_v31 }
 0x314   : > { %3865 = vtanh.f32 %v1978_v59 }
 0x315   : > { %3867 = vtanh.f32 %v2292_v36  ;;  %v1994_v36 = vunpack.c.h.bf16 %v3392_v31  ;;  %v1996_v31 = vunpack.c.h.bf16 %v3393_v45 }
 0x316   : > { %3869 = vtanh.f32 %v1982_v5  ;;  %v1991_v5 = vunpack.c.l.bf16 %v3391_v34 }
 0x317   : > { %3871 = vtanh.f32 %v2301_v48 }
 0x318   : > { %3873 = vtanh.f32 %v2302_v61 }
 0x31b   : > { %v3860_v10 = vpop.eup %3859 }
 0x31c   : > { %v3862_v51 = vpop.eup %3861  ;;  %v2287_v3 = vmul.f32 0.5, %v3860_v10 }
 0x31d   : > { %v2295_v55 = vmul.f32 0.5, %v3862_v51  ;;  %v3864_v62 = vpop.eup %3863 }
 0x31e   : > { %v2289_v4 = vadd.f32 0.5, %v2287_v3  ;;  %v3866_v0 = vpop.eup %3865  ;;  %v2288_v35 = vmul.f32 0.5, %v3864_v62 }
 0x31f   : > { %v2297_v1 = vadd.f32 0.5, %v2295_v55  ;;  %v3868_v14 = vpop.eup %3867 }
 0x320   : > { %v2311_v15 = vmul.f32 %v3866_v0, %v2289_v4  ;;  %v2290_v18 = vadd.f32 0.5, %v2288_v35  ;;  %v2296_v19 = vmul.f32 0.5, %v3868_v14  ;;  %v3870_v20 = vpop.eup %3869  ;;  %v1995_v35 = vunpack.c.l.bf16 %v3393_v45 }
 0x321   : > { %v2309_v17 = vmul.f32 %v2297_v1, %v5057_v16  ;;  %v3872_v33 = vpop.eup %3871 }
 0x322   : > { %v2298_v24 = vadd.f32 0.5, %v2296_v19  ;;  %v2312_v25 = vmul.f32 %v3870_v20, %v2290_v18  ;;  %v3874_v37 = vpop.eup %3873  ;;  %v2305_v10 = vmul.f32 0.5, %v3872_v33 }
 0x323   : > { %v4941_v21 = vadd.f32 %v2311_v15, %v2309_v17  ;;  %v2306_v51 = vmul.f32 0.5, %v3874_v37 }
 0x324   : > { %v2310_v27 = vmul.f32 %v2298_v24, %v5058_v26  ;;  %v2307_v18 = vadd.f32 0.5, %v2305_v10 }
 0x325   : > { %3875 = vtanh.f32 %v4941_v21  ;;  %v2308_v19 = vadd.f32 0.5, %v2306_v51  ;;  %v5064_v51 = vld [vmem:[#allocation16_spill] sm:$0xff] }
 0x326   : > { %v4946_v29 = vadd.f32 %v2312_v25, %v2310_v27  ;;  %v1992_v25 = vunpack.c.h.bf16 %v3391_v34 }
 0x328   : > { %3877 = vtanh.f32 %v4946_v29 }
 0x32c   : > { %v2223_v59 = vpop.f32.mrb[20].mxu0  ;;  %v2266_v2 = vpop.f32.mrb[20].mxu1 }
 0x32d   : > { %v2275_v39 = vadd.f32 %v2223_v59, %v1989_v32  ;;  %v2225_v44 = vpop.f32.mrb[21].mxu0  ;;  %v2268_v11 = vpop.f32.mrb[21].mxu1  ;;  %v2277_v16 = vadd.f32 %v2266_v2, %v1991_v5 }
 0x32e   : > { %v2276_v3 = vadd.f32 %v2225_v44, %v1990_v30  ;;  %v2227_v48 = vpop.f32.mrb[22].mxu0  ;;  %v2270_v55 = vpop.f32.mrb[22].mxu1  ;;  %v2278_v33 = vadd.f32 %v2268_v11, %v1992_v25 }
 0x32f   : > { %v2320_v61 = vmul.f32 0.5, %v2275_v39  ;;  %v2279_v62 = vadd.f32 %v2227_v48, %v1993_v38  ;;  %v2229_v4 = vpop.f32.mrb[23].mxu0  ;;  %v2272_v0 = vpop.f32.mrb[23].mxu1  ;;  %v2281_v28 = vadd.f32 %v2270_v55, %v1995_v35  ;;  %v5066_v48 = vld [vmem:[#allocation18_spill] sm:$0xff]  ;;  %v5067_v55 = vld [vmem:[#allocation19_spill] sm:$0xff] }
 0x330   : > { %v2328_v1 = vmul.f32 0.5, %v2276_v3  ;;  %v2280_v14 = vadd.f32 %v2229_v4, %v1994_v36  ;;  %v3876_v15 = vpop.eup %3875  ;;  %v2282_v30 = vadd.f32 %v2272_v0, %v1996_v31  ;;  %v2338_v59 = vmul.f32 0.5, %v2278_v33  ;;  %v5065_v3 = vld [vmem:[#allocation17_spill] sm:$0xff] }
 0x331   : > { %3879 = vtanh.f32 %v2320_v61  ;;  %v2321_v17 = vmul.f32 0.5, %v2279_v62  ;;  %v2317_v26 = vmul.f32 %v3876_v15, %v2307_v18  ;;  %v3436_v15 = vld [vmem:[%s3991_s27 + $0x70] sm:$0xff] }
 0x332   : > { %3881 = vtanh.f32 %v2328_v1  ;;  %v2329_v20 = vmul.f32 0.5, %v2280_v14  ;;  %v3878_v24 = vpop.eup %3877  ;;  %v2339_v36 = vmul.f32 0.5, %v2282_v30  ;;  %v3434_v14 = vld [vmem:[%s3991_s27 + $0x60] sm:$0xff] }
 0x333   : > { %v2318_v27 = vmul.f32 %v3878_v24, %v2308_v19  ;;  %3883 = vtanh.f32 %v2321_v17  ;;  %v3435_v17 = vld [vmem:[%s3991_s27 + $0x68] sm:$0xff]  ;;  %v2383_v18 = vunpack.c.h.bf16 %v3434_v14 }
 0x334   : > { %3885 = vtanh.f32 %v2277_v16  ;;  %v2382_v16 = vunpack.c.l.bf16 %v3434_v14  ;;  %v2384_v25 = vunpack.c.l.bf16 %v3435_v17 }
 0x335   : > { %3887 = vtanh.f32 %v2329_v20  ;;  %v2319_v32 = vpack.c.bf16 %v2318_v27, %v2317_v26  ;;  %v2387_v20 = vunpack.c.h.bf16 %v3436_v15  ;;  %v3437_v27 = vld [vmem:[%s3991_s27 + $0x78] sm:$0xff] }
 0x336   : > { %3889 = vtanh.f32 %v2281_v28 }
 0x337   : > { %3573 = vst [vmem:[%s4001_s9 + $0x10] sm:$0xff] %v2319_v32   ;;  %2615 = vmatmul.mubr.bf16.vlgmr.msra.gmra.mrb[24].mxu0 %v2319_v32  ;;  %2658 = vmatmul.mubr.bf16.vlgmr.msra.gmra.mrb[24].mxu1 %v2319_v32  ;;  %3891 = vtanh.f32 %v2338_v59 }
 0x338   : > { %2881 = vmatpush1.bf16.msra.mxu0 %v4711_v49  ;;  %2924 = vmatpush1.bf16.msra.mxu1 %v4716_v50  ;;  %3893 = vtanh.f32 %v2339_v36  ;;  %v2385_v36 = vunpack.c.h.bf16 %v3435_v17 }
 0x339   : > { %2882 = vmatprep.subr.bf16.mxu0 %v4721_v56  ;;  %2925 = vmatprep.subr.bf16.mxu1 %v4726_v42 }
 0x33a   : > { %2912 = vmatprep.mubr.bf16.mxu0 %v5037_v63  ;;  %2955 = vmatprep.mubr.bf16.mxu1 %v5037_v63 }
 0x33b   : > { %v3880_v34 = vpop.eup %3879 }
 0x33c   : > { %v3882_v37 = vpop.eup %3881  ;;  %v2324_v38 = vmul.f32 0.5, %v3880_v34  ;;  %2883 = vmatpush1.bf16.msra.mxu0 %v4734_v41  ;;  %2926 = vmatpush1.bf16.msra.mxu1 %v4739_v53 }
 0x33d   : > { %v2332_v2 = vmul.f32 0.5, %v3882_v37  ;;  %v3884_v49 = vpop.eup %3883  ;;  %2884 = vmatprep.subr.bf16.mxu0 %v4746_v46  ;;  %2927 = vmatprep.subr.bf16.mxu1 %v4751_v9 }
 0x33e   : > { %v2326_v50 = vadd.f32 0.5, %v2324_v38  ;;  %v3886_v56 = vpop.eup %3885  ;;  %v2325_v39 = vmul.f32 0.5, %v3884_v49  ;;  %v2388_v38 = vunpack.c.l.bf16 %v3437_v27 }
 0x33f   : > { %v2334_v42 = vadd.f32 0.5, %v2332_v2  ;;  %v3888_v5 = vpop.eup %3887 }
 0x340   : > { %v2348_v63 = vmul.f32 %v3886_v56, %v2326_v50  ;;  %v2327_v11 = vadd.f32 0.5, %v2325_v39  ;;  %v2333_v45 = vmul.f32 0.5, %v3888_v5  ;;  %2885 = vmatpush1.bf16.msra.mxu0 %v4760_v57  ;;  %2928 = vmatpush1.bf16.msra.mxu1 %v4765_v58  ;;  %v3890_v41 = vpop.eup %3889  ;;  %v5059_v58 = vld [vmem:[#allocation11_spill] sm:$0xff]  ;;  %v2389_v39 = vunpack.c.h.bf16 %v3437_v27 }
 0x341   : > { %v2346_v44 = vmul.f32 %v2334_v42, %v4804_v47  ;;  %2886 = vmatprep.subr.bf16.mxu0 %v4772_v6  ;;  %2929 = vmatprep.subr.bf16.mxu1 %v4777_v22  ;;  %v3892_v6 = vpop.eup %3891  ;;  %v5060_v22 = vld [vmem:[#allocation12_spill] sm:$0xff]  ;;  %v5062_v47 = vld [vmem:[#allocation14_spill] sm:$0xff] }
 0x342   : > { %v2335_v46 = vadd.f32 0.5, %v2333_v45  ;;  %v2349_v9 = vmul.f32 %v3890_v41, %v2327_v11 }
 0x343   : > { %v4968_v53 = vadd.f32 %v2348_v63, %v2346_v44 }
 0x344   : > { %v2347_v10 = vmul.f32 %v2335_v46, %v4832_v8  ;;  %2887 = vmatpush1.bf16.msra.mxu0 %v4785_v43  ;;  %2930 = vmatpush1.bf16.msra.mxu1 %v4790_v12  ;;  %v5061_v43 = vld [vmem:[#allocation13_spill] sm:$0xff]  ;;  %v3894_v12 = vpop.eup %3893 }
 0x345   : > { %2888 = vmatprep.subr.bf16.mxu0 %v4797_v13  ;;  %2931 = vmatprep.subr.bf16.mxu1 %v4802_v54  ;;  %3895 = vtanh.f32 %v4968_v53  ;;  %v5063_v13 = vld [vmem:[#allocation15_spill] sm:$0xff]  ;;  %v2342_v54 = vmul.f32 0.5, %v3892_v6  ;;  %v2343_v8 = vmul.f32 0.5, %v3894_v12 }
 0x346   : > { %v4976_v57 = vadd.f32 %v2349_v9, %v2347_v10 }
 0x347   : > { %v2344_v61 = vadd.f32 0.5, %v2342_v54  ;;  %v2345_v62 = vadd.f32 0.5, %v2343_v8 }
 0x348   : > { %3897 = vtanh.f32 %v4976_v57  ;;  %2889 = vmatpush1.bf16.msra.mxu0 %v4812_v60  ;;  %2932 = vmatpush1.bf16.msra.mxu1 %v5059_v58 }
 0x349   : > { %2890 = vmatprep.subr.bf16.mxu0 %v5060_v22  ;;  %2933 = vmatprep.subr.bf16.mxu1 %v5061_v43 }
 0x34c   : > { %2891 = vmatpush1.bf16.msra.mxu0 %v5062_v47  ;;  %2934 = vmatpush1.bf16.msra.mxu1 %v5063_v13 }
 0x34d   : > { %2892 = vmatprep.subr.bf16.mxu0 %v5064_v51  ;;  %2935 = vmatprep.subr.bf16.mxu1 %v5065_v3 }
 0x34f   : > { %v3896_v60 = vpop.eup %3895 }
 0x350   : > { %2893 = vmatpush1.bf16.msra.mxu0 %v5066_v48  ;;  %2936 = vmatpush1.bf16.msra.mxu1 %v5067_v55  ;;  %v2354_v0 = vmul.f32 %v3896_v60, %v2344_v61  ;;  %v2676_v55 = vld [vmem:[%s3996_s6] sm:$0xff] }
 0x351   : > { %2894 = vmatprep.subr.bf16.mxu0 %v4876_v7  ;;  %2937 = vmatprep.subr.bf16.mxu1 %v4881_v40  ;;  %v2386_v7 = vunpack.c.l.bf16 %v3436_v15 }
 0x352   : > { %v3898_v4 = vpop.eup %3897 }
 0x353   : > { %v2355_v1 = vmul.f32 %v3898_v4, %v2345_v62  ;;  %v2678_v4 = vld [vmem:[%s3996_s6 + $0x10] sm:$0xff] }
 0x354   : > { %2895 = vmatpush1.bf16.msra.mxu0 %v4888_v52  ;;  %2938 = vmatpush1.bf16.msra.mxu1 %v4893_v23  ;;  %v2684_v15 = vunpack.c.l.bf16 %v2678_v4 }
 0x355   : > { %v2356_v35 = vpack.c.bf16 %v2355_v1, %v2354_v0  ;;  %v2677_v1 = vld [vmem:[%s3996_s6 + $0x8] sm:$0xff] }
 0x357   : > { %3574 = vst [vmem:[%s4006_s13 + $0x8] sm:$0xff] %v2356_v35   ;;  %2913 = vmatmul.mubr.bf16.vlgmr.msra.gmra.mrb[28].mxu0 %v2356_v35  ;;  %2956 = vmatmul.mubr.bf16.vlgmr.msra.gmra.mrb[28].mxu1 %v2356_v35  ;;  %v2681_v35 = vunpack.c.h.bf16 %v2676_v55 }
 0x40a   : > { %v2616_v19 = vpop.f32.mrb[24].mxu0  ;;  %v2659_v40 = vpop.f32.mrb[24].mxu1 }
 0x40b   : > { %v2668_v24 = vadd.f32 %v2616_v19, %v2382_v16  ;;  %v2618_v26 = vpop.f32.mrb[25].mxu0  ;;  %v2661_v52 = vpop.f32.mrb[25].mxu1  ;;  %v2670_v2 = vadd.f32 %v2659_v40, %v2384_v25  ;;  %v2682_v19 = vunpack.c.l.bf16 %v2677_v1 }
 0x40c   : > { %v2669_v23 = vadd.f32 %v2618_v26, %v2383_v18  ;;  %v2620_v28 = vpop.f32.mrb[26].mxu0  ;;  %v2663_v31 = vpop.f32.mrb[26].mxu1  ;;  %v2671_v42 = vadd.f32 %v2661_v52, %v2385_v36  ;;  %v2685_v18 = vunpack.c.h.bf16 %v2678_v4 }
 0x40d   : > { %v2974_v32 = vmul.f32 0.5, %v2668_v24  ;;  %v2672_v33 = vadd.f32 %v2620_v28, %v2386_v7  ;;  %v2622_v30 = vpop.f32.mrb[27].mxu0  ;;  %v2665_v34 = vpop.f32.mrb[27].mxu1  ;;  %v2674_v56 = vadd.f32 %v2663_v31, %v2388_v38 }
 0x40e   : > { %v2982_v37 = vmul.f32 0.5, %v2669_v23  ;;  %v2673_v59 = vadd.f32 %v2622_v30, %v2387_v20  ;;  %v2992_v5 = vmul.f32 0.5, %v2671_v42  ;;  %v2675_v63 = vadd.f32 %v2665_v34, %v2389_v39  ;;  %v2679_v20 = vld [vmem:[%s3996_s6 + $0x18] sm:$0xff] }
 0x40f   : > { %3899 = vtanh.f32 %v2974_v32  ;;  %v2975_v49 = vmul.f32 0.5, %v2672_v33 }
 0x410   : > { %3901 = vtanh.f32 %v2982_v37  ;;  %v2983_v50 = vmul.f32 0.5, %v2673_v59  ;;  %v2993_v46 = vmul.f32 0.5, %v2675_v63  ;;  %v2686_v37 = vunpack.c.l.bf16 %v2679_v20 }
 0x411   : > { %3903 = vtanh.f32 %v2975_v49  ;;  %v2687_v63 = vunpack.c.h.bf16 %v2679_v20 }
 0x412   : > { %3905 = vtanh.f32 %v2670_v2  ;;  %v2683_v2 = vunpack.c.h.bf16 %v2677_v1 }
 0x413   : > { %3907 = vtanh.f32 %v2983_v50 }
 0x414   : > { %3909 = vtanh.f32 %v2674_v56 }
 0x415   : > { %3911 = vtanh.f32 %v2992_v5 }
 0x416   : > { %3913 = vtanh.f32 %v2993_v46 }
 0x419   : > { %v3900_v44 = vpop.eup %3899 }
 0x41a   : > { %v3902_v11 = vpop.eup %3901  ;;  %v2978_v45 = vmul.f32 0.5, %v3900_v44 }
 0x41b   : > { %v2986_v41 = vmul.f32 0.5, %v3902_v11  ;;  %v3904_v9 = vpop.eup %3903 }
 0x41c   : > { %v2980_v10 = vadd.f32 0.5, %v2978_v45  ;;  %v3906_v58 = vpop.eup %3905  ;;  %v2979_v22 = vmul.f32 0.5, %v3904_v9 }
 0x41d   : > { %v2988_v6 = vadd.f32 0.5, %v2986_v41  ;;  %v3908_v43 = vpop.eup %3907 }
 0x41e   : > { %v3002_v12 = vmul.f32 %v3906_v58, %v2980_v10  ;;  %v2981_v13 = vadd.f32 0.5, %v2979_v22  ;;  %v2987_v54 = vmul.f32 0.5, %v3908_v43  ;;  %v3910_v8 = vpop.eup %3909 }
 0x41f   : > { %v3000_v47 = vmul.f32 %v2988_v6, %v4941_v21  ;;  %v3912_v61 = vpop.eup %3911  ;;  %v2680_v21 = vunpack.c.l.bf16 %v2676_v55 }
 0x420   : > { %v2989_v3 = vadd.f32 0.5, %v2987_v54  ;;  %v3003_v60 = vmul.f32 %v3910_v8, %v2981_v13  ;;  %v2996_v0 = vmul.f32 0.5, %v3912_v61  ;;  %v3914_v14 = vpop.eup %3913 }
 0x421   : > { %v3004_v51 = vadd.f32 %v3002_v12, %v3000_v47  ;;  %v2997_v25 = vmul.f32 0.5, %v3914_v14 }
 0x422   : > { %v3001_v48 = vmul.f32 %v2989_v3, %v4946_v29  ;;  %v2998_v24 = vadd.f32 0.5, %v2996_v0 }
 0x423   : > { %3915 = vtanh.f32 %v3004_v51  ;;  %3068 = vst [vmem:[#allocation3] sm:$0xff] %v3004_v51  ;;  %v2999_v49 = vadd.f32 0.5, %v2997_v25 }
 0x424   : > { %v3005_v62 = vadd.f32 %v3003_v60, %v3001_v48 }
 0x426   : > { %3917 = vtanh.f32 %v3005_v62  ;;  %3069 = vst [vmem:[#allocation3 + $0x8] sm:$0xff] %v3005_v62 }
 0x42a   : > { %v2914_v16 = vpop.f32.mrb[28].mxu0  ;;  %v2957_v17 = vpop.f32.mrb[28].mxu1 }
 0x42b   : > { %v2966_v7 = vadd.f32 %v2914_v16, %v2680_v21  ;;  %v2916_v40 = vpop.f32.mrb[29].mxu0  ;;  %v2959_v29 = vpop.f32.mrb[29].mxu1  ;;  %v2968_v59 = vadd.f32 %v2957_v17, %v2682_v19 }
 0x42c   : > { %v2967_v26 = vadd.f32 %v2916_v40, %v2681_v35  ;;  %v2918_v52 = vpop.f32.mrb[30].mxu0  ;;  %v2961_v27 = vpop.f32.mrb[30].mxu1  ;;  %v2969_v5 = vadd.f32 %v2959_v29, %v2683_v2 }
 0x42d   : > { %v3916_v23 = vpop.eup %3915  ;;  %v3011_v28 = vmul.f32 0.5, %v2966_v7  ;;  %v2970_v31 = vadd.f32 %v2918_v52, %v2684_v15  ;;  %v2920_v32 = vpop.f32.mrb[31].mxu0  ;;  %v2972_v39 = vadd.f32 %v2961_v27, %v2686_v37 }
 0x42e   : > { %v2963_v33 = vpop.f32.mrb[31].mxu1  ;;  %v3008_v30 = vmul.f32 %v3916_v23, %v2998_v24  ;;  %v3019_v34 = vmul.f32 0.5, %v2967_v26  ;;  %v2971_v38 = vadd.f32 %v2920_v32, %v2685_v18  ;;  %v3029_v11 = vmul.f32 0.5, %v2969_v5 }
 0x42f   : > { %3919 = vtanh.f32 %v3011_v28  ;;  %v3012_v36 = vmul.f32 0.5, %v2970_v31  ;;  %v2973_v45 = vadd.f32 %v2963_v33, %v2687_v63 }
 0x430   : > { %3921 = vtanh.f32 %v3019_v34  ;;  %v3020_v50 = vmul.f32 0.5, %v2971_v38  ;;  %v3918_v56 = vpop.eup %3917 }
 0x431   : > { %v3009_v42 = vmul.f32 %v3918_v56, %v2999_v49  ;;  %3923 = vtanh.f32 %v3012_v36  ;;  %v3030_v58 = vmul.f32 0.5, %v2973_v45 }
 0x432   : > { %3925 = vtanh.f32 %v2968_v59 }
 0x433   : > { %v3010_v44 = vpack.c.bf16 %v3009_v42, %v3008_v30  ;;  %3927 = vtanh.f32 %v3020_v50 }
 0x434   : > { %3929 = vtanh.f32 %v2972_v39 }
 0x435   : > { %3575 = vst [vmem:[%s4001_s9 + $0x18] sm:$0xff] %v3010_v44   ;;  %3067 = vst [vmem:[#allocation2] sm:$0xff] %v3010_v44  ;;  %3931 = vtanh.f32 %v3029_v11 }
 0x436   : > { %3933 = vtanh.f32 %v3030_v58 }
 0x439   : > { %v3920_v41 = vpop.eup %3919 }
 0x43a   : > { %v3922_v46 = vpop.eup %3921  ;;  %v3015_v9 = vmul.f32 0.5, %v3920_v41 }
 0x43b   : > { %v3023_v10 = vmul.f32 0.5, %v3922_v46  ;;  %v3924_v6 = vpop.eup %3923 }
 0x43c   : > { %v3017_v22 = vadd.f32 0.5, %v3015_v9  ;;  %v3926_v43 = vpop.eup %3925  ;;  %v3016_v47 = vmul.f32 0.5, %v3924_v6 }
 0x43d   : > { %v3025_v12 = vadd.f32 0.5, %v3023_v10  ;;  %v3928_v13 = vpop.eup %3927 }
 0x43e   : > { %v3039_v54 = vmul.f32 %v3926_v43, %v3017_v22  ;;  %v3018_v51 = vadd.f32 0.5, %v3016_v47  ;;  %v3024_v3 = vmul.f32 0.5, %v3928_v13  ;;  %v3930_v60 = vpop.eup %3929 }
 0x43f   : > { %v3037_v8 = vmul.f32 %v3025_v12, %v4968_v53  ;;  %v3932_v4 = vpop.eup %3931 }
 0x440   : > { %v3026_v55 = vadd.f32 0.5, %v3024_v3  ;;  %v3040_v61 = vmul.f32 %v3930_v60, %v3018_v51  ;;  %v3033_v0 = vmul.f32 0.5, %v3932_v4  ;;  %v3934_v1 = vpop.eup %3933 }
 0x441   : > { %v3041_v48 = vadd.f32 %v3039_v54, %v3037_v8  ;;  %v3034_v53 = vmul.f32 0.5, %v3934_v1 }
 0x442   : > { %v3038_v62 = vmul.f32 %v3026_v55, %v4976_v57  ;;  %v3035_v35 = vadd.f32 0.5, %v3033_v0 }
 0x443   : > { %3935 = vtanh.f32 %v3041_v48  ;;  %3071 = vst [vmem:[#allocation5] sm:$0xff] %v3041_v48  ;;  %v3036_v16 = vadd.f32 0.5, %v3034_v53 }
 0x444   : > { %v3042_v21 = vadd.f32 %v3040_v61, %v3038_v62 }
 0x446   : > { %3937 = vtanh.f32 %v3042_v21  ;;  %3072 = vst [vmem:[#allocation5 + $0x8] sm:$0xff] %v3042_v21 }
 0x44d   : > { %v3936_v14 = vpop.eup %3935 }
 0x44e   : > { %v3045_v15 = vmul.f32 %v3936_v14, %v3035_v35 }
 0x450   : > { %v3938_v17 = vpop.eup %3937 }
 0x451   : > { %v3046_v18 = vmul.f32 %v3938_v17, %v3036_v16 }
 0x453   : > { %v3047_v7 = vpack.c.bf16 %v3046_v18, %v3045_v15 }
 0x455   : > { %3569 = vst [vmem:[%s4006_s13] sm:$0xff] %v3047_v7   ;;  %3070 = vst [vmem:[#allocation4] sm:$0xff] %v3047_v7 }
 0x456 PF: > { %s16_s18 = sadd.s32 1, %s3945_s18  }
 0x457   : > { %p13_p6 = scmp.ge.s32.totalorder %s16_s18, 5  }
 0x459   :  { %15 = sbr.rel (!%p13_p6) target bundleno = 1 (0x1), region = 97 }

</bundles_post_ra>
